<compile_context>
chip_gen: v5e
topology: v5e:2x2
jax: 0.10.0
libtpu: 0.0.40
codegen_flags: <defaults>
</compile_context>

<pallas_src>
import jax
import jax.numpy as jnp
from jax.experimental import pallas as pl
from jax.experimental.pallas import tpu as pltpu


def _round_up(a, m):
    return (a + m - 1) // m * m


def _forward_block(x_ref, mask_ref, w1_ref, b1_ref, w2_ref, b2_ref, o_ref):
    # fc1: (tb, D) @ (D, H) -> (tb, H), MXU, f32 accumulation.
    h = jnp.dot(x_ref[...], w1_ref[...], preferred_element_type=jnp.float32)
    h = h + b1_ref[...]                       # (1, H) bias broadcast
    h = jnp.maximum(h, 0.0)                   # ReLU (VPU)

    if mask_ref is not None:
        # Dropout(0.5): mask holds 0.0 (dropped) or 2.0 (kept, scaled by 1/(1-p)).
        h = h * mask_ref[...].astype(jnp.float32)

    # fc2 as a lane reduction: (tb, H) * (1, H) -> sum over H -> (tb,)
    logit = jnp.sum(h * w2_ref[...], axis=1) + b2_ref[0]
    # Lane-dense store: one (1, tb) row per grid step.
    o_ref[...] = logit.reshape(1, -1).astype(o_ref.dtype)


def _kernel_eval(x_ref, w1_ref, b1_ref, w2_ref, b2_ref, o_ref):
    _forward_block(x_ref, None, w1_ref, b1_ref, w2_ref, b2_ref, o_ref)


def _kernel_train(x_ref, mask_ref, w1_ref, b1_ref, w2_ref, b2_ref, o_ref):
    _forward_block(x_ref, mask_ref, w1_ref, b1_ref, w2_ref, b2_ref, o_ref)


def domain_classifier(x, w1, b1, w2, b2, *, training=False, dropout_key=None,
                      dropout_mask=None, tb=256):
    """Forward pass of DomainClassifier.

    x:  (B, D) float32
    w1: (D, H)  == fc1.weight.T          b1: (1, H) or (H,)
    w2: (1, H)  == fc2.weight            b2: (1,)   or scalar-like
    Returns (B, 1) float32 logits.
    """
    B, D = x.shape
    H = w1.shape[1]

    b1 = jnp.asarray(b1, jnp.float32).reshape(1, H)
    w2 = jnp.asarray(w2, jnp.float32).reshape(1, H)
    b2 = jnp.asarray(b2, jnp.float32).reshape(-1)[:1]        # (1,) -> SMEM scalar

    # --- batch tiling (MXU-sized rows, lane-dense output blocks) -------------
    tb = max(8, min(tb, _round_up(B, 8)))
    if _round_up(B, tb) > tb:          # more than one grid step -> tb must be %128
        tb = _round_up(tb, 128)

    # VMEM budget: resident W1/b1/W2 + double-buffered x/mask/out tiles.  Keep it
    # well under the 32 MiB scoped default (v7x only has 64 MiB physical VMEM).
    def _vmem_bytes(t):
        resident = D * H * 2 + H * 4 + H * 4
        streamed = 2 * (t * D * 2 + t * 4)
        if training:
            streamed += 2 * t * H * 2
        return resident + streamed

    while tb > 128 and _vmem_bytes(tb) > 24 * 1024 * 1024:
        tb //= 2

    B_pad = _round_up(B, tb)
    grid = (B_pad // tb,)

    # --- dtype / padding plumbing --------------------------------------------
    x_bf = x.astype(jnp.bfloat16)
    w1_bf = w1.astype(jnp.bfloat16)
    if B_pad != B:
        x_bf = jnp.pad(x_bf, ((0, B_pad - B), (0, 0)))

    x_spec = pl.BlockSpec((tb, D), lambda i: (i, 0))
    w1_spec = pl.BlockSpec((D, H), lambda i: (0, 0))          # resident
    b1_spec = pl.BlockSpec((1, H), lambda i: (0, 0))
    w2_spec = pl.BlockSpec((1, H), lambda i: (0, 0))
    b2_spec = pl.BlockSpec(memory_space=pltpu.MemorySpace.SMEM)

    if training:
        if dropout_mask is None:
            key = dropout_key if dropout_key is not None else jax.random.PRNGKey(0)
            keep = jax.random.bernoulli(key, 0.5, (B, H))
            dropout_mask = keep.astype(jnp.float32) * 2.0
        mask = jnp.asarray(dropout_mask, jnp.float32).astype(jnp.bfloat16)
        if B_pad != B:
            mask = jnp.pad(mask, ((0, B_pad - B), (0, 0)))
        kernel = _kernel_train
        args = (x_bf, mask, w1_bf, b1, w2, b2)
        in_specs = [x_spec, pl.BlockSpec((tb, H), lambda i: (i, 0)),
                    w1_spec, b1_spec, w2_spec, b2_spec]
    else:
        kernel = _kernel_eval
        args = (x_bf, w1_bf, b1, w2, b2)
        in_specs = [x_spec, w1_spec, b1_spec, w2_spec, b2_spec]

    out = pl.pallas_call(
        kernel,
        out_shape=jax.ShapeDtypeStruct((1, B_pad), jnp.float32),
        grid=grid,
        in_specs=in_specs,
        out_specs=pl.BlockSpec((1, tb), lambda i: (0, i)),    # lane-dense logits
        compiler_params=pltpu.CompilerParams(
            dimension_semantics=("parallel",)),               # independent batch tiles
    )(*args)

    return out.reshape(B_pad, 1)[:B]


def _ref_forward(x, w1, b1, w2, b2, mask=None):
    h = jnp.maximum(x @ w1 + b1, 0.0)
    if mask is not None:
        h = h * mask
    return h @ w2.T + b2


if __name__ == "__main__":
    # Module defaults: feature_dim=512 -> hidden 1024 -> 1.
    B, D, H = 128, 512, 1024
    key = jax.random.PRNGKey(0)
    kx, k1, k2, k3, k4 = jax.random.split(key, 5)

    x = jax.random.normal(kx, (B, D), dtype=jnp.float32)
    w1 = jax.random.normal(k1, (D, H), dtype=jnp.float32) * (1.0 / jnp.sqrt(D))  # fc1.weight.T
    b1 = jax.random.normal(k2, (1, H), dtype=jnp.float32) * 0.01
    w2 = jax.random.normal(k3, (1, H), dtype=jnp.float32) * (1.0 / jnp.sqrt(H))  # fc2.weight
    b2 = jax.random.normal(k4, (1,), dtype=jnp.float32) * 0.01

    # bf16-rounded copies so the reference sees exactly what the kernel consumes.
    xr = x.astype(jnp.bfloat16).astype(jnp.float32)
    w1r = w1.astype(jnp.bfloat16).astype(jnp.float32)

    # Eval mode (dropout = identity), matching module.eval().
    out = jax.block_until_ready(domain_classifier(x, w1, b1, w2, b2, training=False))
    ref = _ref_forward(xr, w1r, b1, w2, b2)
    assert out.shape == (B, 1)
    assert jnp.allclose(out, ref, atol=2e-2, rtol=2e-2), "eval mismatch vs reference"

    # Training mode with an explicit dropout mask (values in {0, 2}) so the
    # reference can reproduce it exactly.
    keep = jax.random.bernoulli(jax.random.PRNGKey(7), 0.5, (B, H))
    mask = keep.astype(jnp.float32) * 2.0
    out_tr = jax.block_until_ready(
        domain_classifier(x, w1, b1, w2, b2, training=True, dropout_mask=mask))
    ref_tr = _ref_forward(xr, w1r, b1, w2, b2, mask=mask)
    assert out_tr.shape == (B, 1)
    assert jnp.allclose(out_tr, ref_tr, atol=2e-2, rtol=2e-2), "train mismatch vs reference"

    print("KERNEL_OK")
</pallas_src>

<mosaic_0001>
module attributes {stable_mosaic.version = 11 : i64} {
  func.func @_kernel_eval(%arg0: i32, %arg1: memref<128x512xbf16, #tpu.memory_space<vmem>>, %arg2: memref<512x1024xbf16, #tpu.memory_space<vmem>>, %arg3: memref<1x1024xf32, #tpu.memory_space<vmem>>, %arg4: memref<1x1024xf32, #tpu.memory_space<vmem>>, %arg5: memref<1xf32, #tpu.memory_space<smem>>, %arg6: memref<1x128xf32, #tpu.memory_space<vmem>>) attributes {dimension_semantics = [#tpu.dimension_semantics<parallel>], iteration_bounds = array<i64: 1>, scalar_prefetch = 0 : i64, scratch_operands = 0 : i64, tpu.core_type = #tpu.core_type<tc>, window_params = [{transform_indices = @transform_0, window_bounds = array<i64: 128, 512>}, {pipeline_mode = #tpu.pipeline_mode<synchronous>, transform_indices = @transform_1, window_bounds = array<i64: 512, 1024>}, {pipeline_mode = #tpu.pipeline_mode<synchronous>, transform_indices = @transform_2, window_bounds = array<i64: 1, 1024>}, {pipeline_mode = #tpu.pipeline_mode<synchronous>, transform_indices = @transform_3, window_bounds = array<i64: 1, 1024>}, {transform_indices = @transform_4, window_bounds = array<i64: 1>}, {transform_indices = @transform_5, window_bounds = array<i64: 1, 128>}]} {
    %c0 = arith.constant 0 : index
    %c0_0 = arith.constant 0 : index
    %0 = vector.load %arg1[%c0, %c0_0] : memref<128x512xbf16, #tpu.memory_space<vmem>>, vector<128x512xbf16>
    %c0_1 = arith.constant 0 : index
    %c0_2 = arith.constant 0 : index
    %1 = vector.load %arg2[%c0_1, %c0_2] : memref<512x1024xbf16, #tpu.memory_space<vmem>>, vector<512x1024xbf16>
    %cst = arith.constant dense<0.000000e+00> : vector<128x1024xf32>
    %2 = tpu.matmul %0, %1, %cst {dimension_numbers = #tpu.dot_dimension_numbers<[1], [0], [0], [1], [0, 0, 1, 1], [], []>} : vector<128x512xbf16>, vector<512x1024xbf16>, vector<128x1024xf32> -> vector<128x1024xf32>
    %c0_3 = arith.constant 0 : index
    %c0_4 = arith.constant 0 : index
    %3 = vector.load %arg3[%c0_3, %c0_4] : memref<1x1024xf32, #tpu.memory_space<vmem>>, vector<1x1024xf32>
    %4 = vector.broadcast %3 : vector<1x1024xf32> to vector<128x1024xf32>
    %5 = arith.addf %2, %4 : vector<128x1024xf32>
    %cst_5 = arith.constant 0.000000e+00 : f32
    %6 = vector.broadcast %cst_5 : f32 to vector<128x1024xf32>
    %7 = arith.maximumf %5, %6 : vector<128x1024xf32>
    %c0_6 = arith.constant 0 : index
    %c0_7 = arith.constant 0 : index
    %8 = vector.load %arg4[%c0_6, %c0_7] : memref<1x1024xf32, #tpu.memory_space<vmem>>, vector<1x1024xf32>
    %9 = vector.broadcast %8 : vector<1x1024xf32> to vector<128x1024xf32>
    %10 = arith.mulf %7, %9 : vector<128x1024xf32>
    %cst_8 = arith.constant dense<0.000000e+00> : vector<128xf32>
    %11 = vector.multi_reduction <add>, %10, %cst_8 [1] : vector<128x1024xf32> to vector<128xf32>
    %c0_9 = arith.constant 0 : index
    %12 = memref.load %arg5[%c0_9] : memref<1xf32, #tpu.memory_space<smem>>
    %13 = vector.broadcast %12 : f32 to vector<128xf32>
    %14 = arith.addf %11, %13 : vector<128xf32>
    %15 = vector.shape_cast %14 : vector<128xf32> to vector<1x128xf32>
    %c0_10 = arith.constant 0 : index
    %c0_11 = arith.constant 0 : index
    %16 = vector.load %arg6[%c0_10, %c0_11] : memref<1x128xf32, #tpu.memory_space<vmem>>, vector<1x128xf32>
    tpu.vector_store %arg6[%c0_10, %c0_11], %15 {strides = array<i32>} : memref<1x128xf32, #tpu.memory_space<vmem>>, vector<1x128xf32>,
    return
  }
  func.func @transform_0(%arg0: i32) -> (i32, i32) {
    %c0_i32 = arith.constant 0 : i32
    %c0_i32_0 = arith.constant 0 : i32
    return %arg0, %c0_i32 : i32, i32
  }
  func.func @transform_1(%arg0: i32) -> (i32, i32) {
    %c0_i32 = arith.constant 0 : i32
    %c0_i32_0 = arith.constant 0 : i32
    %c0_i32_1 = arith.constant 0 : i32
    return %c0_i32, %c0_i32_0 : i32, i32
  }
  func.func @transform_2(%arg0: i32) -> (i32, i32) {
    %c0_i32 = arith.constant 0 : i32
    %c0_i32_0 = arith.constant 0 : i32
    %c0_i32_1 = arith.constant 0 : i32
    return %c0_i32, %c0_i32_0 : i32, i32
  }
  func.func @transform_3(%arg0: i32) -> (i32, i32) {
    %c0_i32 = arith.constant 0 : i32
    %c0_i32_0 = arith.constant 0 : i32
    %c0_i32_1 = arith.constant 0 : i32
    return %c0_i32, %c0_i32_0 : i32, i32
  }
  func.func @transform_4(%arg0: i32) -> i32 {
    %c0_i32 = arith.constant 0 : i32
    %c0_i32_0 = arith.constant 0 : i32
    return %c0_i32 : i32
  }
  func.func @transform_5(%arg0: i32) -> (i32, i32) {
    %c0_i32 = arith.constant 0 : i32
    %c0_i32_0 = arith.constant 0 : i32
    return %c0_i32, %arg0 : i32, i32
  }
}

</mosaic_0001>

<bundles_post_ra>
// kernel: tpu_custom_call.1
= control target key start
LH: loop header
LB: loop body
LE: loop exit
PB: predicated region body
PF: predicated region fallthrough
CT: control target
= control target key end

     0   :  { %11 = vsyncpa [#allocation4], 0  ;;  %s6587_s0 = inlined_call_operand.hbm [shape: bf16[128,512], index: 0, kind: input, shape index: {}]   ;;  %s6588_s1 = inlined_call_operand.hbm [shape: bf16[512,1024], index: 1, kind: input, shape index: {}]   ;;  %s6589_s2 = inlined_call_operand.hbm [shape: f32[1,1024], index: 2, kind: input, shape index: {}]   ;;  %s6590_s3 = inlined_call_operand.hbm [shape: f32[1,1024], index: 3, kind: input, shape index: {}]   ;;  %s6591_s4 = inlined_call_operand.<no memory space> [shape: f32[1], index: 4, kind: input, shape index: {}]   ;;  %s6592_s5 = inlined_call_operand.hbm [shape: f32[1,128], index: 5, kind: output, shape index: {}]  }
   0x1   :  { %12 = vsyncpa [#allocation7], 0 }
   0x2   :  { %13 = vsyncpa [#allocation10], 0  ;;  %s32_s20 = sshll.u32 %s6588_s1, 4  ;;  %s33_s20 = int_to_ptr.hbm [resolvable:$true] %s32_s20 }
   0x3   :  { %14 = vsyncpa [#allocation5], 0  ;;  %s5513_s21 = smov [#allocation6]   ;;  %s19_s25 = sshll.u32 %s6587_s0, 4  ;;  %s20_s25 = int_to_ptr.hbm [resolvable:$true] %s19_s25 }
   0x4   :  { %s34_s22 = sshll.u32 %s5513_s21, 4  ;;  %s5514_s26 = smov 512   ;;  %s35_s22 = int_to_ptr.vmem [resolvable:$true] %s34_s22 }
   0x5   :  { %s5515_s27 = smov 32   ;;  %s5516_s28 = smov [#allocation3]  }
   0x6   :  { %40 = dma.hbm_to_vmem [thread:$0]  %s33_s20, 32768, %s35_s22, [#allocation7], %s5514_s26, %s5514_s26, %s5515_s27  }
   0x7   :  { %s21_s29 = sshll.u32 %s5516_s28, 4  ;;  %s5517_s30 = smov 256   ;;  %s22_s29 = int_to_ptr.vmem [resolvable:$true] %s21_s29 }
   0x8   :  { %s5518_s6 = smov 16   ;;  %s46_s8 = sshll.u32 %s6589_s2, 4  ;;  %s47_s8 = int_to_ptr.hbm [resolvable:$true] %s46_s8 }
   0x9   :  { %27 = dma.hbm_to_vmem [thread:$0]  %s20_s25, 4096, %s22_s29, [#allocation4], %s5517_s30, %s5517_s30, %s5518_s6  }
   0xa   :  { %s5519_s9 = smov [#allocation8]   ;;  %s57_s12 = sshll.u32 %s6590_s3, 4  ;;  %s58_s12 = int_to_ptr.hbm [resolvable:$true] %s57_s12 }
   0xb   :  { %s48_s10 = sshll.u32 %s5519_s9, 4  ;;  %s5520_s13 = smov [#allocation9]   ;;  %s49_s10 = int_to_ptr.vmem [resolvable:$true] %s48_s10 }
   0xc   :  { %51 = dma.hbm_to_vmem [thread:$0]  %s47_s8, 128, %s49_s10, [#allocation7]  }
   0xd   :  { %s59_s14 = sshll.u32 %s5520_s13, 4  ;;  %s60_s14 = int_to_ptr.vmem [resolvable:$true] %s59_s14 }
   0xe   :  { %62 = dma.hbm_to_vmem [thread:$0]  %s58_s12, 128, %s60_s14, [#allocation10]  }
   0xf   :  { %5505 = dma.done.wait [#allocation4], 4096  }
  0x10   :  { %5506 = vsyncadd [#allocation4], 4294963200 }
  0x11   :  { %5507 = dma.done.wait [#allocation7], 32896  }
  0x12   :  { %5508 = vsyncadd [#allocation7], 4294934400 }
  0x13   :  { %5509 = dma.done.wait [#allocation10], 128  }
  0x14   :  { %5510 = vsyncadd [#allocation10], 4294967168  ;;  %v4285_v0 = vld [vmem:[#allocation6 + $0x1c0] sm:$0xf]  ;;  %vm3852_vm0 = vcmask 130112   ;;  %vm3856_vm1 = vcmask 195712  }
  0x15   :  { %v5175_v1 = vld [vmem:[#allocation6 + $0x1dc] sm:$0xf0]  ;;  %vm3860_vm2 = vcmask 261312   ;;  %vm3864_vm3 = vcmask 326912   ;;  %vm3868_vm4 = vcmask 392512   ;;  %vm3872_vm5 = vcmask 458112  }
  0x16   :  { %v4541_v2 = vld [vmem:[#allocation6 + $0x3c0] sm:$0xf]  ;;  %v4286_v3 = vor.u32 %v5175_v1, %v4285_v0  ;;  %vm3876_vm6 = vcmask 523712   ;;  %vm3880_vm7 = vcmask 589312   ;;  %vm3884_vm8 = vcmask 654912   ;;  %s3919_s18 = sshll.u32 %s6592_s5, 4  ;;  %s3920_s18 = int_to_ptr.hbm [resolvable:$true] %s3919_s18 }
  0x17   :  { %v5239_v4 = vld [vmem:[#allocation6 + $0x3dc] sm:$0xf0]  ;;  %vm3888_vm9 = vcmask 720512   ;;  %vm3892_vm10 = vcmask 786112   ;;  %vm3896_vm11 = vcmask 851712   ;;  %vm3900_vm12 = vcmask 917312  }
  0x18   :  { %v4797_v5 = vld [vmem:[#allocation6 + $0x5c0] sm:$0xf]  ;;  %v4542_v7 = vor.u32 %v5239_v4, %v4541_v2  ;;  %1827 = vmatpush.bf16.msra.mxu0 %v4286_v3  ;;  %vm3904_vm13 = vcmask 982912   ;;  %vm3908_vm14 = vcmask 1048512  }
  0x19   :  { %v5303_v6 = vld [vmem:[#allocation6 + $0x5dc] sm:$0xf0] }
  0x1a   :  { %v4798_v8 = vor.u32 %v5303_v6, %v4797_v5  ;;  %v5053_v9 = vld [vmem:[#allocation6 + $0x7c0] sm:$0xf]  ;;  %1876 = vmatpush.bf16.msra.mxu1 %v4542_v7 }
  0x1b   :  { %v5367_v10 = vld [vmem:[#allocation6 + $0x7dc] sm:$0xf0] }
  0x1c   :  { %v4253_v11 = vld [vmem:[#allocation6 + $0x180] sm:$0xf]  ;;  %v5054_v12 = vor.u32 %v5367_v10, %v5053_v9  ;;  %1925 = vmatpush.bf16.msra.mxu2 %v4798_v8 }
  0x1d   :  { %v5167_v13 = vld [vmem:[#allocation6 + $0x19c] sm:$0xf0] }
  0x1e   :  { %v4509_v14 = vld [vmem:[#allocation6 + $0x380] sm:$0xf]  ;;  %v4254_v16 = vor.u32 %v5167_v13, %v4253_v11  ;;  %1974 = vmatpush.bf16.msra.mxu3 %v5054_v12 }
  0x1f   :  { %v5231_v15 = vld [vmem:[#allocation6 + $0x39c] sm:$0xf0] }
  0x20   :  { %v4510_v17 = vor.u32 %v5231_v15, %v4509_v14  ;;  %v4765_v18 = vld [vmem:[#allocation6 + $0x580] sm:$0xf]  ;;  %1828 = vmatpush.bf16.msra.mxu0 %v4254_v16 }
  0x21   :  { %v5295_v19 = vld [vmem:[#allocation6 + $0x59c] sm:$0xf0] }
  0x22   :  { %v5021_v20 = vld [vmem:[#allocation6 + $0x780] sm:$0xf]  ;;  %v4766_v21 = vor.u32 %v5295_v19, %v4765_v18  ;;  %1877 = vmatpush.bf16.msra.mxu1 %v4510_v17 }
  0x23   :  { %v5359_v22 = vld [vmem:[#allocation6 + $0x79c] sm:$0xf0] }
  0x24   :  { %v4221_v23 = vld [vmem:[#allocation6 + $0x140] sm:$0xf]  ;;  %v5022_v25 = vor.u32 %v5359_v22, %v5021_v20  ;;  %1926 = vmatpush.bf16.msra.mxu2 %v4766_v21 }
  0x25   :  { %v5159_v24 = vld [vmem:[#allocation6 + $0x15c] sm:$0xf0] }
  0x26   :  { %v4477_v26 = vld [vmem:[#allocation6 + $0x340] sm:$0xf]  ;;  %v4222_v29 = vor.u32 %v5159_v24, %v4221_v23  ;;  %1975 = vmatpush.bf16.msra.mxu3 %v5022_v25 }
  0x27   :  { %v5223_v27 = vld [vmem:[#allocation6 + $0x35c] sm:$0xf0] }
  0x28   :  { %v4733_v28 = vld [vmem:[#allocation6 + $0x540] sm:$0xf]  ;;  %v4478_v33 = vor.u32 %v5223_v27, %v4477_v26  ;;  %1829 = vmatpush.bf16.msra.mxu0 %v4222_v29  ;;  %v5085_v29 = vld [vmem:[#allocation3 + $0xc] sm:$0xf0] }
  0x29   :  { %v5287_v30 = vld [vmem:[#allocation6 + $0x55c] sm:$0xf0] }
  0x2a   :  { %v4989_v31 = vld [vmem:[#allocation6 + $0x740] sm:$0xf]  ;;  %v4734_v34 = vor.u32 %v5287_v30, %v4733_v28  ;;  %1878 = vmatpush.bf16.msra.mxu1 %v4478_v33  ;;  %v5083_v30 = vld [vmem:[#allocation3 + $0x4] sm:$0xf] }
  0x2b   :  { %v5351_v32 = vld [vmem:[#allocation6 + $0x75c] sm:$0xf0]  ;;  %v4799_v33 = vld [vmem:[#allocation6 + $0x5e0] sm:$0xf0] }
  0x2c   :  { %v4189_v35 = vld [vmem:[#allocation6 + $0x100] sm:$0xf]  ;;  %v4990_v38 = vor.u32 %v5351_v32, %v4989_v31  ;;  %1927 = vmatpush.bf16.msra.mxu2 %v4734_v34  ;;  %v3935_v31 = vld [vmem:[#allocation3 + $0x10] sm:$0xf0]  ;;  %v5299_v32 = vld [vmem:[#allocation6 + $0x5c4] sm:$0xf] }
  0x2d   :  { %v5151_v36 = vld [vmem:[#allocation6 + $0x11c] sm:$0xf0] }
  0x2e   :  { %v4445_v37 = vld [vmem:[#allocation6 + $0x300] sm:$0xf]  ;;  %v4190_v44 = vor.u32 %v5151_v36, %v4189_v35  ;;  %1976 = vmatpush.bf16.msra.mxu3 %v4990_v38  ;;  %v3941_v35 = vld [vmem:[#allocation3 + $0x8] sm:$0xf]  ;;  %v5363_v36 = vld [vmem:[#allocation6 + $0x7c4] sm:$0xf] }
  0x2f   :  { %v5215_v39 = vld [vmem:[#allocation6 + $0x31c] sm:$0xf0] }
  0x30   :  { %v4701_v40 = vld [vmem:[#allocation6 + $0x500] sm:$0xf]  ;;  %v4446_v45 = vor.u32 %v5215_v39, %v4445_v37  ;;  %1830 = vmatpush.bf16.msra.mxu0 %v4190_v44  ;;  %v5055_v37 = vld [vmem:[#allocation6 + $0x7e0] sm:$0xf0]  ;;  %v4802_v44 = vor.u32 %v5299_v32, %v4799_v33 }
  0x31   :  { %v5279_v41 = vld [vmem:[#allocation6 + $0x51c] sm:$0xf0]  ;;  %v4191_v32 = vld [vmem:[#allocation6 + $0x120] sm:$0xf0] }
  0x32   :  { %v4957_v42 = vld [vmem:[#allocation6 + $0x700] sm:$0xf]  ;;  %v4702_v46 = vor.u32 %v5279_v41, %v4701_v40  ;;  %1879 = vmatpush.bf16.msra.mxu1 %v4446_v45  ;;  %v5086_v40 = vld [vmem:[#allocation3 + $0x14] sm:$0xf0]  ;;  %v5084_v41 = vld [vmem:[#allocation3 + $0xc] sm:$0xf] }
  0x33   :  { %v5343_v43 = vld [vmem:[#allocation6 + $0x71c] sm:$0xf0]  ;;  %v5171_v45 = vld [vmem:[#allocation6 + $0x1c4] sm:$0xf] }
  0x34   :  { %v4157_v47 = vld [vmem:[#allocation6 + $0xc0] sm:$0xf]  ;;  %v4958_v50 = vor.u32 %v5343_v43, %v4957_v42  ;;  %1928 = vmatpush.bf16.msra.mxu2 %v4702_v46  ;;  %v3943_v42 = vld [vmem:[#allocation3 + $0x18] sm:$0xf0]  ;;  %v4287_v46 = vld [vmem:[#allocation6 + $0x1e0] sm:$0xf0] }
  0x35   :  { %v5143_v48 = vld [vmem:[#allocation6 + $0xdc] sm:$0xf0]  ;;  %v5339_v33 = vld [vmem:[#allocation6 + $0x704] sm:$0xf] }
  0x36   :  { %v4413_v49 = vld [vmem:[#allocation6 + $0x2c0] sm:$0xf]  ;;  %v4158_v56 = vor.u32 %v5143_v48, %v4157_v47  ;;  %1977 = vmatpush.bf16.msra.mxu3 %v4958_v50  ;;  %v5235_v47 = vld [vmem:[#allocation6 + $0x3c4] sm:$0xf] }
  0x37   :  { %v5207_v51 = vld [vmem:[#allocation6 + $0x2dc] sm:$0xf0]  ;;  %v4543_v50 = vld [vmem:[#allocation6 + $0x3e0] sm:$0xf0] }
  0x38   :  { %v4669_v52 = vld [vmem:[#allocation6 + $0x4c0] sm:$0xf]  ;;  %v4414_v57 = vor.u32 %v5207_v51, %v4413_v49  ;;  %1831 = vmatpush.bf16.msra.mxu0 %v4158_v56  ;;  %v5058_v49 = vor.u32 %v5363_v36, %v5055_v37  ;;  %v5291_v51 = vld [vmem:[#allocation6 + $0x584] sm:$0xf] }
  0x39   :  { %v5271_v53 = vld [vmem:[#allocation6 + $0x4dc] sm:$0xf0]  ;;  %v5023_v56 = vld [vmem:[#allocation6 + $0x7a0] sm:$0xf0] }
  0x3a   :  { %v4925_v54 = vld [vmem:[#allocation6 + $0x6c0] sm:$0xf]  ;;  %v4670_v58 = vor.u32 %v5271_v53, %v4669_v52  ;;  %1880 = vmatpush.bf16.msra.mxu1 %v4414_v57  ;;  %v4767_v52 = vld [vmem:[#allocation6 + $0x5a0] sm:$0xf0]  ;;  %v5566_v53 = vor.u32 %v5083_v30, %v3935_v31  ;;  %v5570_v57 = vor.u32 %v5084_v41, %v3943_v42  ;;  %v5093_v41 = vld [vmem:[#allocation3 + $0x4c] sm:$0xf0] }
  0x3b   :  { %v5335_v55 = vld [vmem:[#allocation6 + $0x6dc] sm:$0xf0]  ;;  %v5147_v30 = vld [vmem:[#allocation6 + $0x104] sm:$0xf] }
  0x3c   :  { %v4125_v59 = vld [vmem:[#allocation6 + $0x80] sm:$0xf]  ;;  %v4926_v62 = vor.u32 %v5335_v55, %v4925_v54  ;;  %1929 = vmatpush.bf16.msra.mxu2 %v4670_v58  ;;  %6624 = vst [vmem:[#allocation16_spill] sm:$0xff] %v5566_v53  ;;  %v5568_v54 = vor.u32 %v5086_v40, %v3941_v35  ;;  %v5355_v55 = vld [vmem:[#allocation6 + $0x784] sm:$0xf]  ;;  %v4290_v58 = vor.u32 %v5171_v45, %v4287_v46 }
  0x3d   :  { %v5135_v60 = vld [vmem:[#allocation6 + $0x9c] sm:$0xf0]  ;;  %6626 = vst [vmem:[#allocation18_spill] sm:$0xff] %v5570_v57  ;;  %v4194_v35 = vor.u32 %v5147_v30, %v4191_v32  ;;  %v5211_v37 = vld [vmem:[#allocation6 + $0x304] sm:$0xf] }
  0x3e   :  { %v4381_v61 = vld [vmem:[#allocation6 + $0x280] sm:$0xf]  ;;  %v4126_v4 = vor.u32 %v5135_v60, %v4125_v59  ;;  %1978 = vmatpush.bf16.msra.mxu3 %v4926_v62  ;;  %6625 = vst [vmem:[#allocation17_spill] sm:$0xff] %v5568_v54  ;;  %v4546_v59 = vor.u32 %v5235_v47, %v4543_v50  ;;  %v4770_v60 = vor.u32 %v5291_v51, %v4767_v52  ;;  %v4255_v62 = vld [vmem:[#allocation6 + $0x1a0] sm:$0xf0] }
  0x3f   :  { %v5199_v63 = vld [vmem:[#allocation6 + $0x29c] sm:$0xf0]  ;;  %v5091_v42 = vld [vmem:[#allocation3 + $0x44] sm:$0xf]  ;;  %v5094_v45 = vld [vmem:[#allocation3 + $0x54] sm:$0xf0] }
  0x40   :  { %v4637_v0 = vld [vmem:[#allocation6 + $0x480] sm:$0xf]  ;;  %v4382_v5 = vor.u32 %v5199_v63, %v4381_v61  ;;  %1832 = vmatpush.bf16.msra.mxu0 %v4126_v4  ;;  %v5163_v61 = vld [vmem:[#allocation6 + $0x184] sm:$0xf]  ;;  %v5026_v63 = vor.u32 %v5355_v55, %v5023_v56  ;;  %v5092_v46 = vld [vmem:[#allocation3 + $0x4c] sm:$0xf] }
  0x41   :  { %v5263_v1 = vld [vmem:[#allocation6 + $0x49c] sm:$0xf0]  ;;  %v4735_v4 = vld [vmem:[#allocation6 + $0x560] sm:$0xf0]  ;;  %v3975_v47 = vld [vmem:[#allocation3 + $0x58] sm:$0xf0] }
  0x42   :  { %v4893_v2 = vld [vmem:[#allocation6 + $0x680] sm:$0xf]  ;;  %v4638_v6 = vor.u32 %v5263_v1, %v4637_v0  ;;  %1881 = vmatpush.bf16.msra.mxu1 %v4382_v5  ;;  %v5227_v0 = vld [vmem:[#allocation6 + $0x384] sm:$0xf]  ;;  %v5594_v52 = vor.u32 %v5092_v46, %v3975_v47 }
  0x43   :  { %v5327_v3 = vld [vmem:[#allocation6 + $0x69c] sm:$0xf0]  ;;  %v4511_v1 = vld [vmem:[#allocation6 + $0x3a0] sm:$0xf0] }
  0x44   :  { %v4093_v7 = vld [vmem:[#allocation6 + $0x40] sm:$0xf]  ;;  %v4894_v10 = vor.u32 %v5327_v3, %v4893_v2  ;;  %1930 = vmatpush.bf16.msra.mxu2 %v4638_v6  ;;  %v4258_v2 = vor.u32 %v5163_v61, %v4255_v62  ;;  %v5283_v3 = vld [vmem:[#allocation6 + $0x544] sm:$0xf]  ;;  %v4514_v6 = vor.u32 %v5227_v0, %v4511_v1 }
  0x45   :  { %v5127_v8 = vld [vmem:[#allocation6 + $0x5c] sm:$0xf0]  ;;  %v5155_v5 = vld [vmem:[#allocation6 + $0x144] sm:$0xf] }
  0x46   :  { %v4349_v9 = vld [vmem:[#allocation6 + $0x240] sm:$0xf]  ;;  %v4094_v17 = vor.u32 %v5127_v8, %v4093_v7  ;;  %1979 = vmatpush.bf16.msra.mxu3 %v4894_v10  ;;  %v4738_v7 = vor.u32 %v5283_v3, %v4735_v4  ;;  %v4223_v8 = vld [vmem:[#allocation6 + $0x160] sm:$0xf0] }
  0x47   :  { %v5191_v11 = vld [vmem:[#allocation6 + $0x25c] sm:$0xf0]  ;;  %v4991_v10 = vld [vmem:[#allocation6 + $0x760] sm:$0xf0] }
  0x48   :  { %v4605_v12 = vld [vmem:[#allocation6 + $0x440] sm:$0xf]  ;;  %v4350_v21 = vor.u32 %v5191_v11, %v4349_v9  ;;  %1833 = vmatpush.bf16.msra.mxu0 %v4094_v17  ;;  %v5347_v9 = vld [vmem:[#allocation6 + $0x744] sm:$0xf]  ;;  %v5089_v17 = vld [vmem:[#allocation3 + $0x2c] sm:$0xf0] }
  0x49   :  { %v5255_v13 = vld [vmem:[#allocation6 + $0x45c] sm:$0xf0]  ;;  %v4994_v11 = vor.u32 %v5347_v9, %v4991_v10  ;;  %v5267_v55 = vld [vmem:[#allocation6 + $0x4c4] sm:$0xf]  ;;  %v5098_v9 = vld [vmem:[#allocation3 + $0x74] sm:$0xf0] }
  0x4a   :  { %v4861_v14 = vld [vmem:[#allocation6 + $0x640] sm:$0xf]  ;;  %v4606_v22 = vor.u32 %v5255_v13, %v4605_v12  ;;  %1882 = vmatpush.bf16.msra.mxu1 %v4350_v21  ;;  %v5219_v12 = vld [vmem:[#allocation6 + $0x344] sm:$0xf]  ;;  %v5090_v21 = vld [vmem:[#allocation3 + $0x34] sm:$0xf0] }
  0x4b   :  { %v5319_v15 = vld [vmem:[#allocation6 + $0x65c] sm:$0xf0]  ;;  %v4479_v13 = vld [vmem:[#allocation6 + $0x360] sm:$0xf0]  ;;  %v5096_v10 = vld [vmem:[#allocation3 + $0x6c] sm:$0xf] }
  0x4c   :  { %v4061_v16 = vld [vmem:[#allocation6] sm:$0xf]  ;;  %v4862_v26 = vor.u32 %v5319_v15, %v4861_v14  ;;  %1931 = vmatpush.bf16.msra.mxu2 %v4606_v22  ;;  %v4226_v14 = vor.u32 %v5155_v5, %v4223_v8  ;;  %v4482_v15 = vor.u32 %v5219_v12, %v4479_v13  ;;  %v5088_v22 = vld [vmem:[#allocation3 + $0x2c] sm:$0xf]  ;;  %v4671_v56 = vld [vmem:[#allocation6 + $0x4e0] sm:$0xf0] }
  0x4d   :  { %v5119_v18 = vld [vmem:[#allocation6 + $0x1c] sm:$0xf0]  ;;  %v5331_v61 = vld [vmem:[#allocation6 + $0x6c4] sm:$0xf]  ;;  %v5097_v5 = vld [vmem:[#allocation3 + $0x6c] sm:$0xf0] }
  0x4e   :  { %v4317_v19 = vld [vmem:[#allocation6 + $0x200] sm:$0xf]  ;;  %v4062_v34 = vor.u32 %v5119_v18, %v4061_v16  ;;  %1980 = vmatpush.bf16.msra.mxu3 %v4862_v26  ;;  %v5087_v18 = vld [vmem:[#allocation3 + $0x24] sm:$0xf]  ;;  %v3989_v8 = vld [vmem:[#allocation3 + $0x68] sm:$0xf] }
  0x4f   :  { %v5183_v20 = vld [vmem:[#allocation6 + $0x21c] sm:$0xf0]  ;;  %v4927_v62 = vld [vmem:[#allocation6 + $0x6e0] sm:$0xf0] }
  0x50   :  { %v4573_v23 = vld [vmem:[#allocation6 + $0x400] sm:$0xf]  ;;  %v4318_v38 = vor.u32 %v5183_v20, %v4317_v19  ;;  %1834 = vmatpush.bf16.msra.mxu0 %v4062_v34  ;;  %v3951_v19 = vld [vmem:[#allocation3 + $0x30] sm:$0xf0]  ;;  %v3957_v20 = vld [vmem:[#allocation3 + $0x28] sm:$0xf]  ;;  %v4930_v0 = vor.u32 %v5331_v61, %v4927_v62 }
  0x51   :  { %v5247_v24 = vld [vmem:[#allocation6 + $0x41c] sm:$0xf0]  ;;  %v5580_v26 = vor.u32 %v5090_v21, %v3957_v20  ;;  %v4959_v34 = vld [vmem:[#allocation6 + $0x720] sm:$0xf0] }
  0x52   :  { %v4829_v25 = vld [vmem:[#allocation6 + $0x600] sm:$0xf]  ;;  %v4574_v39 = vor.u32 %v5247_v24, %v4573_v23  ;;  %1883 = vmatpush.bf16.msra.mxu1 %v4318_v38  ;;  %v3959_v23 = vld [vmem:[#allocation3 + $0x38] sm:$0xf0]  ;;  %v4962_v36 = vor.u32 %v5339_v33, %v4959_v34  ;;  %v4447_v38 = vld [vmem:[#allocation6 + $0x320] sm:$0xf0] }
  0x53   :  { %v5311_v27 = vld [vmem:[#allocation6 + $0x61c] sm:$0xf0]  ;;  %6629 = vst [vmem:[#allocation21_spill] sm:$0xff] %v5580_v26  ;;  %v5203_v1 = vld [vmem:[#allocation6 + $0x2c4] sm:$0xf] }
  0x54   :  { %v3933_v28 = vld [vmem:[#allocation3] sm:$0xf]  ;;  %v4830_v43 = vor.u32 %v5311_v27, %v4829_v25  ;;  %1932 = vmatpush.bf16.msra.mxu2 %v4574_v39  ;;  %2023 = vmatpush.bf16.msrb.mxu0 %v4290_v58  ;;  %v5578_v25 = vor.u32 %v5087_v18, %v3951_v19  ;;  %v5582_v27 = vor.u32 %v5088_v22, %v3959_v23  ;;  %v5139_v58 = vld [vmem:[#allocation6 + $0xc4] sm:$0xf]  ;;  %v5101_v33 = vld [vmem:[#allocation3 + $0x8c] sm:$0xf0] }
  0x55   :  { %v5564_v48 = vor.u32 %v5085_v29, %v3933_v28  ;;  %1884 = vmatmul.bf16.vlgmr.msra.gmra.mxu1 %v5566_v53  ;;  %v3949_v16 = vld [vmem:[#allocation3 + $0x20] sm:$0xf]  ;;  %v5275_v28 = vld [vmem:[#allocation6 + $0x504] sm:$0xf]  ;;  %v4450_v39 = vor.u32 %v5211_v37, %v4447_v38  ;;  %v5102_v37 = vld [vmem:[#allocation3 + $0x94] sm:$0xf0] }
  0x56   :  { %1981 = vmatpush.bf16.msra.mxu3 %v4830_v43  ;;  %2072 = vmatpush.bf16.msrb.mxu1 %v4546_v59  ;;  %v5576_v24 = vor.u32 %v5089_v17, %v3949_v16  ;;  %6628 = vst [vmem:[#allocation20_spill] sm:$0xff] %v5578_v25  ;;  %v4703_v29 = vld [vmem:[#allocation6 + $0x520] sm:$0xf0]  ;;  %v3965_v40 = vld [vmem:[#allocation3 + $0x40] sm:$0xf]  ;;  %v4674_v59 = vor.u32 %v5267_v55, %v4671_v56 }
  0x57   :  { %1835 = vmatmul.bf16.vlgmr.msra.gmra.mxu0 %v5564_v48  ;;  %1933 = vmatmul.bf16.vlgmr.msra.gmra.mxu2 %v5568_v54  ;;  %6630 = vst [vmem:[#allocation22_spill] sm:$0xff] %v5582_v27  ;;  %v4706_v31 = vor.u32 %v5275_v28, %v4703_v29  ;;  %v3967_v43 = vld [vmem:[#allocation3 + $0x50] sm:$0xf0]  ;;  %v3981_v4 = vld [vmem:[#allocation3 + $0x60] sm:$0xf] }
  0x58   :  { %2121 = vmatpush.bf16.msrb.mxu2 %v4802_v44  ;;  %2024 = vmatpush.bf16.msrb.mxu0 %v4258_v2  ;;  %6627 = vst [vmem:[#allocation19_spill] sm:$0xff] %v5576_v24  ;;  %v3973_v44 = vld [vmem:[#allocation3 + $0x48] sm:$0xf]  ;;  %v5590_v50 = vor.u32 %v5091_v42, %v3967_v43  ;;  %v4415_v2 = vld [vmem:[#allocation6 + $0x2e0] sm:$0xf0]  ;;  %v5600_v12 = vor.u32 %v5097_v5, %v3981_v4 }
  0x59   :  { %1982 = vmatmul.bf16.vlgmr.msra.gmra.mxu3 %v5570_v57  ;;  %v5592_v51 = vor.u32 %v5094_v45, %v3973_v44  ;;  %v4418_v3 = vor.u32 %v5203_v1, %v4415_v2  ;;  %v5259_v16 = vld [vmem:[#allocation6 + $0x484] sm:$0xf]  ;;  %v3997_v32 = vld [vmem:[#allocation3 + $0x80] sm:$0xf]  ;;  %v5100_v38 = vld [vmem:[#allocation3 + $0x8c] sm:$0xf] }
  0x5a   :  { %2170 = vmatpush.bf16.msrb.mxu3 %v5058_v49  ;;  %2073 = vmatpush.bf16.msrb.mxu1 %v4514_v6  ;;  %v5588_v49 = vor.u32 %v5093_v41, %v3965_v40  ;;  %v5095_v6 = vld [vmem:[#allocation3 + $0x64] sm:$0xf]  ;;  %v5612_v40 = vor.u32 %v5101_v33, %v3997_v32  ;;  %v5105_v1 = vld [vmem:[#allocation3 + $0xac] sm:$0xf0]  ;;  %v4021_v4 = vld [vmem:[#allocation3 + $0xa8] sm:$0xf] }
  0x5b   :  { %v4639_v17 = vld [vmem:[#allocation6 + $0x4a0] sm:$0xf0]  ;;  %v5106_v5 = vld [vmem:[#allocation3 + $0xb4] sm:$0xf0]  ;;  %v4029_v32 = vld [vmem:[#allocation3 + $0xc0] sm:$0xf] }
  0x5c   :  { %2122 = vmatpush.bf16.msrb.mxu2 %v4770_v60  ;;  %2025 = vmatpush.bf16.msrb.mxu0 %v4226_v14  ;;  %v4159_v60 = vld [vmem:[#allocation6 + $0xe0] sm:$0xf0]  ;;  %v5604_v14 = vor.u32 %v5098_v9, %v3989_v8  ;;  %v4642_v19 = vor.u32 %v5259_v16, %v4639_v17  ;;  %v5109_v33 = vld [vmem:[#allocation3 + $0xcc] sm:$0xf0] }
  0x5d   :  { %v5131_v18 = vld [vmem:[#allocation6 + $0x84] sm:$0xf] }
  0x5e   :  { %2171 = vmatpush.bf16.msrb.mxu3 %v5026_v63  ;;  %2074 = vmatpush.bf16.msrb.mxu1 %v4482_v15  ;;  %v4162_v63 = vor.u32 %v5139_v58, %v4159_v60  ;;  %v4127_v20 = vld [vmem:[#allocation6 + $0xa0] sm:$0xf0] }
  0x5f   :  { %v5323_v21 = vld [vmem:[#allocation6 + $0x684] sm:$0xf]  ;;  %v4130_v23 = vor.u32 %v5131_v18, %v4127_v20 }
  0x60   :  { %2123 = vmatpush.bf16.msrb.mxu2 %v4738_v7  ;;  %2026 = vmatpush.bf16.msrb.mxu0 %v4194_v35  ;;  %v3983_v7 = vld [vmem:[#allocation3 + $0x70] sm:$0xf0]  ;;  %v4895_v22 = vld [vmem:[#allocation6 + $0x6a0] sm:$0xf0] }
  0x61   :  { %v5602_v13 = vor.u32 %v5095_v6, %v3983_v7  ;;  %v4898_v28 = vor.u32 %v5323_v21, %v4895_v22  ;;  %v5195_v29 = vld [vmem:[#allocation6 + $0x284] sm:$0xf]  ;;  %v3999_v35 = vld [vmem:[#allocation3 + $0x90] sm:$0xf0]  ;;  %v5104_v6 = vld [vmem:[#allocation3 + $0xac] sm:$0xf] }
  0x62   :  { %2172 = vmatpush.bf16.msrb.mxu3 %v4994_v11  ;;  %2075 = vmatpush.bf16.msrb.mxu1 %v4450_v39  ;;  %v3991_v11 = vld [vmem:[#allocation3 + $0x78] sm:$0xf0]  ;;  %v4383_v30 = vld [vmem:[#allocation6 + $0x2a0] sm:$0xf0] }
  0x63   :  { %v5606_v15 = vor.u32 %v5096_v10, %v3991_v11  ;;  %v5099_v34 = vld [vmem:[#allocation3 + $0x84] sm:$0xf]  ;;  %v4007_v39 = vld [vmem:[#allocation3 + $0x98] sm:$0xf0]  ;;  %v5628_v10 = vor.u32 %v5106_v5, %v4021_v4  ;;  %v4047_v4 = vld [vmem:[#allocation3 + $0xf0] sm:$0xf0] }
  0x64   :  { %2124 = vmatpush.bf16.msrb.mxu2 %v4706_v31  ;;  %2027 = vmatpush.bf16.msrb.mxu0 %v4162_v63  ;;  %v4386_v31 = vor.u32 %v5195_v29, %v4383_v30  ;;  %v5614_v41 = vor.u32 %v5099_v34, %v3999_v35  ;;  %v5618_v43 = vor.u32 %v5100_v38, %v4007_v39  ;;  %v5251_v44 = vld [vmem:[#allocation6 + $0x444] sm:$0xf]  ;;  %v4023_v7 = vld [vmem:[#allocation3 + $0xb8] sm:$0xf0]  ;;  %v4031_v35 = vld [vmem:[#allocation3 + $0xd0] sm:$0xf0] }
  0x65   :  { %1889 = vmatmul.bf16.gmra.mxu1 %v5578_v25  ;;  %v4607_v45 = vld [vmem:[#allocation6 + $0x460] sm:$0xf0]  ;;  %6633 = vst [vmem:[#allocation25_spill] sm:$0xff] %v5628_v10  ;;  %v5630_v11 = vor.u32 %v5104_v6, %v4023_v7  ;;  %v5108_v38 = vld [vmem:[#allocation3 + $0xcc] sm:$0xf] }
  0x66   :  { %2173 = vmatpush.bf16.msrb.mxu3 %v4962_v36  ;;  %2076 = vmatpush.bf16.msrb.mxu1 %v4418_v3  ;;  %v4005_v36 = vld [vmem:[#allocation3 + $0x88] sm:$0xf]  ;;  %v5123_v46 = vld [vmem:[#allocation6 + $0x44] sm:$0xf]  ;;  %v4610_v47 = vor.u32 %v5251_v44, %v4607_v45  ;;  %v4015_v3 = vld [vmem:[#allocation3 + $0xb0] sm:$0xf0]  ;;  %v5636_v44 = vor.u32 %v5109_v33, %v4029_v32 }
  0x67   :  { %1840 = vmatmul.bf16.gmra.mxu0 %v5576_v24  ;;  %1938 = vmatmul.bf16.gmra.mxu2 %v5580_v26  ;;  %v5616_v42 = vor.u32 %v5102_v37, %v4005_v36  ;;  %v4095_v55 = vld [vmem:[#allocation6 + $0x60] sm:$0xf0]  ;;  %6634 = vst [vmem:[#allocation26_spill] sm:$0xff] %v5630_v11  ;;  %v4037_v36 = vld [vmem:[#allocation3 + $0xc8] sm:$0xf] }
  0x68   :  { %2125 = vmatpush.bf16.msrb.mxu2 %v4674_v59  ;;  %2028 = vmatpush.bf16.msrb.mxu0 %v4130_v23  ;;  %v5315_v56 = vld [vmem:[#allocation6 + $0x644] sm:$0xf]  ;;  %v4098_v59 = vor.u32 %v5123_v46, %v4095_v55  ;;  %v5110_v37 = vld [vmem:[#allocation3 + $0xd4] sm:$0xf0]  ;;  %v4039_v39 = vld [vmem:[#allocation3 + $0xd8] sm:$0xf0] }
  0x69   :  { %1987 = vmatmul.bf16.gmra.mxu3 %v5582_v27  ;;  %v4863_v58 = vld [vmem:[#allocation6 + $0x660] sm:$0xf0]  ;;  %v5640_v46 = vor.u32 %v5110_v37, %v4037_v36  ;;  %v4805_v55 = vld [vmem:[#allocation6 + $0x5c8] sm:$0xf]  ;;  %v5114_v6 = vld [vmem:[#allocation3 + $0xf4] sm:$0xf0] }
  0x6a   :  { %2174 = vmatpush.bf16.msrb.mxu3 %v4930_v0  ;;  %2077 = vmatpush.bf16.msrb.mxu1 %v4386_v31  ;;  %v4866_v60 = vor.u32 %v5315_v56, %v4863_v58  ;;  %v5187_v61 = vld [vmem:[#allocation6 + $0x244] sm:$0xf]  ;;  %v4013_v0 = vld [vmem:[#allocation3 + $0xa0] sm:$0xf]  ;;  %v5304_v56 = vld [vmem:[#allocation6 + $0x5e4] sm:$0xf0] }
  0x6b   :  { %v4351_v62 = vld [vmem:[#allocation6 + $0x260] sm:$0xf0]  ;;  %v5624_v8 = vor.u32 %v5105_v1, %v4013_v0  ;;  %6635 = vst [vmem:[#allocation27_spill] sm:$0xff] %v5640_v46  ;;  %v4293_v58 = vld [vmem:[#allocation6 + $0x1c8] sm:$0xf] }
  0x6c   :  { %2126 = vmatpush.bf16.msrb.mxu2 %v4642_v19  ;;  %v4354_v63 = vor.u32 %v5187_v61, %v4351_v62  ;;  %2029 = vmatpush.bf16.msrb.mxu0 %v4098_v59  ;;  %v5103_v2 = vld [vmem:[#allocation3 + $0xa4] sm:$0xf]  ;;  %v4806_v59 = vor.u32 %v5304_v56, %v4805_v55  ;;  %v5061_v61 = vld [vmem:[#allocation6 + $0x7c8] sm:$0xf]  ;;  %v4045_v1 = vld [vmem:[#allocation3 + $0xe0] sm:$0xf] }
  0x6d   :  { %6631 = vst [vmem:[#allocation23_spill] sm:$0xff] %v5624_v8  ;;  %v5626_v9 = vor.u32 %v5103_v2, %v4015_v3  ;;  %v5243_v16 = vld [vmem:[#allocation6 + $0x404] sm:$0xf]  ;;  %v5368_v62 = vld [vmem:[#allocation6 + $0x7e4] sm:$0xf0] }
  0x6e   :  { %2175 = vmatpush.bf16.msrb.mxu3 %v4898_v28  ;;  %2078 = vmatpush.bf16.msrb.mxu1 %v4354_v63  ;;  %v4575_v17 = vld [vmem:[#allocation6 + $0x420] sm:$0xf0]  ;;  %v5062_v0 = vor.u32 %v5368_v62, %v5061_v61  ;;  %v5113_v2 = vld [vmem:[#allocation3 + $0xec] sm:$0xf0]  ;;  %v4053_v5 = vld [vmem:[#allocation3 + $0xe8] sm:$0xf] }
  0x6f   :  { %6632 = vst [vmem:[#allocation24_spill] sm:$0xff] %v5626_v9  ;;  %v5115_v18 = vld [vmem:[#allocation6 + $0x4] sm:$0xf]  ;;  %v4578_v19 = vor.u32 %v5243_v16, %v4575_v17  ;;  %v5112_v7 = vld [vmem:[#allocation3 + $0xec] sm:$0xf] }
  0x70   :  { %2127 = vmatpush.bf16.msrb.mxu2 %v4610_v47  ;;  %v4063_v20 = vld [vmem:[#allocation6 + $0x20] sm:$0xf0]  ;;  %v5642_v47 = vor.u32 %v5108_v38, %v4039_v39  ;;  %v4055_v16 = vld [vmem:[#allocation3 + $0xf8] sm:$0xf0]  ;;  %v4549_v17 = vld [vmem:[#allocation6 + $0x3c8] sm:$0xf] }
  0x71   :  { %v5307_v21 = vld [vmem:[#allocation6 + $0x604] sm:$0xf]  ;;  %v4066_v23 = vor.u32 %v5115_v18, %v4063_v20  ;;  %v5240_v18 = vld [vmem:[#allocation6 + $0x3e4] sm:$0xf0] }
  0x72   :  { %2176 = vmatpush.bf16.msrb.mxu3 %v4866_v60  ;;  %v4831_v22 = vld [vmem:[#allocation6 + $0x620] sm:$0xf0]  ;;  %6636 = vst [vmem:[#allocation28_spill] sm:$0xff] %v5642_v47  ;;  %v5176_v60 = vld [vmem:[#allocation6 + $0x1e4] sm:$0xf0]  ;;  %v4550_v20 = vor.u32 %v5240_v18, %v4549_v17 }
  0x73   :  { %v4834_v28 = vor.u32 %v5307_v21, %v4831_v22  ;;  %v5179_v29 = vld [vmem:[#allocation6 + $0x204] sm:$0xf]  ;;  %2030 = vmatpush.bf16.msrb.mxu0 %v4066_v23  ;;  %v4294_v63 = vor.u32 %v5176_v60, %v4293_v58  ;;  %v5652_v22 = vor.u32 %v5114_v6, %v4053_v5  ;;  %v5654_v23 = vor.u32 %v5112_v7, %v4055_v16  ;;  %v5168_v32 = vld [vmem:[#allocation6 + $0x1a4] sm:$0xf0] }
  0x74   :  { %v4319_v30 = vld [vmem:[#allocation6 + $0x220] sm:$0xf0]  ;;  %2128 = vmatpush.bf16.msrb.mxu2 %v4578_v19  ;;  %v5648_v19 = vor.u32 %v5113_v2, %v4045_v1  ;;  %v5029_v33 = vld [vmem:[#allocation6 + $0x788] sm:$0xf] }
  0x75   :  { %1894 = vmatmul.bf16.gmra.mxu1 %v5590_v50  ;;  %v4322_v31 = vor.u32 %v5179_v29, %v4319_v30  ;;  %v5107_v34 = vld [vmem:[#allocation3 + $0xc4] sm:$0xf]  ;;  %6637 = vst [vmem:[#allocation29_spill] sm:$0xff] %v5654_v23  ;;  %v5296_v29 = vld [vmem:[#allocation6 + $0x5a4] sm:$0xf0] }
  0x76   :  { %2177 = vmatpush.bf16.msrb.mxu3 %v4834_v28  ;;  %v5638_v45 = vor.u32 %v5107_v34, %v4031_v35  ;;  %v5111_v3 = vld [vmem:[#allocation3 + $0xe4] sm:$0xf]  ;;  %v4773_v28 = vld [vmem:[#allocation6 + $0x588] sm:$0xf] }
  0x77   :  { %1845 = vmatmul.bf16.gmra.mxu0 %v5588_v49  ;;  %1943 = vmatmul.bf16.gmra.mxu2 %v5592_v51  ;;  %v5650_v21 = vor.u32 %v5111_v3, %v4047_v4  ;;  %v4261_v30 = vld [vmem:[#allocation6 + $0x188] sm:$0xf]  ;;  %v5660_v37 = vld [vmem:[#allocation8] sm:$0xff] }
  0x78   :  { %2079 = vmatpush.bf16.msrb.mxu1 %v4322_v31  ;;  %2317 = vmatpush.bf16.msra.mxu2 %v4806_v59  ;;  %v4774_v31 = vor.u32 %v5296_v29, %v4773_v28  ;;  %v5360_v34 = vld [vmem:[#allocation6 + $0x7a4] sm:$0xf0]  ;;  %v4262_v35 = vor.u32 %v5168_v32, %v4261_v30  ;;  %v5663_v38 = vperm.slane %v5660_v37, 0 }
  0x79   :  { %1992 = vmatmul.bf16.gmra.mxu3 %v5594_v52  ;;  %2219 = vmatpush.bf16.msra.mxu0 %v4294_v63  ;;  %v5030_v36 = vor.u32 %v5360_v34, %v5029_v33  ;;  %v4517_v39 = vld [vmem:[#allocation6 + $0x388] sm:$0xf] }
  0x7a   :  { %2366 = vmatpush.bf16.msra.mxu3 %v5062_v0  ;;  %v5232_v55 = vld [vmem:[#allocation6 + $0x3a4] sm:$0xf0] }
  0x7b   :  { %v4518_v56 = vor.u32 %v5232_v55, %v4517_v39  ;;  %v4741_v62 = vld [vmem:[#allocation6 + $0x548] sm:$0xf] }
  0x7c   :  { %2268 = vmatpush.bf16.msra.mxu1 %v4550_v20  ;;  %2318 = vmatpush.bf16.msra.mxu2 %v4774_v31  ;;  %v5288_v63 = vld [vmem:[#allocation6 + $0x564] sm:$0xf0] }
  0x7d   :  { %2220 = vmatpush.bf16.msra.mxu0 %v4262_v35  ;;  %v4229_v0 = vld [vmem:[#allocation6 + $0x148] sm:$0xf]  ;;  %v4742_v2 = vor.u32 %v5288_v63, %v4741_v62 }
  0x7e   :  { %2367 = vmatpush.bf16.msra.mxu3 %v5030_v36  ;;  %v5160_v3 = vld [vmem:[#allocation6 + $0x164] sm:$0xf0] }
  0x7f   :  { %v4997_v4 = vld [vmem:[#allocation6 + $0x748] sm:$0xf]  ;;  %v4230_v17 = vor.u32 %v5160_v3, %v4229_v0 }
  0x80   :  { %2269 = vmatpush.bf16.msra.mxu1 %v4518_v56  ;;  %v5352_v5 = vld [vmem:[#allocation6 + $0x764] sm:$0xf0]  ;;  %2319 = vmatpush.bf16.msra.mxu2 %v4742_v2 }
  0x81   :  { %v4998_v18 = vor.u32 %v5352_v5, %v4997_v4  ;;  %2221 = vmatpush.bf16.msra.mxu0 %v4230_v17  ;;  %v4485_v31 = vld [vmem:[#allocation6 + $0x348] sm:$0xf] }
  0x82   :  { %v5224_v32 = vld [vmem:[#allocation6 + $0x364] sm:$0xf0] }
  0x83   :  { %2368 = vmatpush.bf16.msra.mxu3 %v4998_v18  ;;  %v4486_v34 = vor.u32 %v5224_v32, %v4485_v31  ;;  %v4197_v62 = vld [vmem:[#allocation6 + $0x108] sm:$0xf] }
  0x84   :  { %v4965_v2 = vld [vmem:[#allocation6 + $0x708] sm:$0xf] }
  0x85   :  { %1899 = vmatmul.bf16.gmra.mxu1 %v5602_v13  ;;  %v5344_v3 = vld [vmem:[#allocation6 + $0x724] sm:$0xf0] }
  0x86   :  { %2270 = vmatpush.bf16.msra.mxu1 %v4486_v34  ;;  %v5216_v31 = vld [vmem:[#allocation6 + $0x324] sm:$0xf0] }
  0x87   :  { %1850 = vmatmul.bf16.gmra.mxu0 %v5600_v12  ;;  %1948 = vmatmul.bf16.gmra.mxu2 %v5604_v14 }
  0x89   :  { %1997 = vmatmul.bf16.gmra.mxu3 %v5606_v15 }
  0x95   :  { %1904 = vmatmul.bf16.gmra.mxu1 %v5614_v41 }
  0x97   :  { %1855 = vmatmul.bf16.gmra.mxu0 %v5612_v40  ;;  %1953 = vmatmul.bf16.gmra.mxu2 %v5616_v42 }
  0x99   :  { %2002 = vmatmul.bf16.gmra.mxu3 %v5618_v43 }
  0xa5   :  { %1909 = vmatmul.bf16.gmra.mxu1 %v5626_v9 }
  0xa7   :  { %1860 = vmatmul.bf16.gmra.mxu0 %v5624_v8  ;;  %1958 = vmatmul.bf16.gmra.mxu2 %v5628_v10 }
  0xa9   :  { %2007 = vmatmul.bf16.gmra.mxu3 %v5630_v11 }
  0xb5   :  { %1914 = vmatmul.bf16.gmra.mxu1 %v5638_v45 }
  0xb7   :  { %1865 = vmatmul.bf16.gmra.mxu0 %v5636_v44  ;;  %1963 = vmatmul.bf16.gmra.mxu2 %v5640_v46 }
  0xb9   :  { %2012 = vmatmul.bf16.gmra.mxu3 %v5642_v47 }
  0xc5   :  { %1919 = vmatmul.bf16.gmra.mxu1 %v5650_v21 }
  0xc7   :  { %1870 = vmatmul.bf16.gmra.mxu0 %v5648_v19  ;;  %1968 = vmatmul.bf16.gmra.mxu2 %v5652_v22 }
  0xc9   :  { %2017 = vmatmul.bf16.gmra.mxu3 %v5654_v23 }
  0xd2   :  { %v1885_v60 = vpop.f32.mrf.mxu1 }
  0xd4   :  { %v1836_v58 = vpop.f32.mrf.mxu0 }
  0xd5   :  { %v1837_v59 = vadd.f32 %v1836_v58, %v5663_v38  ;;  %2080 = vmatmul.bf16.vlgmr.msrb.gmra.mxu1 %v5566_v53 }
  0xd7   :  { %v1886_v61 = vadd.f32 %v1885_v60, %v1837_v59  ;;  %2031 = vmatmul.bf16.vlgmr.msrb.gmra.mxu0 %v5564_v48  ;;  %2129 = vmatmul.bf16.vlgmr.msrb.gmra.mxu2 %v5568_v54  ;;  %v4709_v60 = vld [vmem:[#allocation6 + $0x508] sm:$0xf] }
  0xd9   :  { %2178 = vmatmul.bf16.vlgmr.msrb.gmra.mxu3 %v5570_v57 }
  0xda   :  { %v1934_v1 = vpop.f32.mrf.mxu2  ;;  %v1887_v28 = vpop.f32.mrf.mxu1 }
  0xdb   :  { %v1935_v6 = vadd.f32 %v1934_v1, %v1886_v61  ;;  %v5280_v61 = vld [vmem:[#allocation6 + $0x524] sm:$0xf0] }
  0xdc   :  { %v1983_v7 = vpop.f32.mrf.mxu3  ;;  %v1838_v16 = vpop.f32.mrf.mxu0  ;;  %v4710_v0 = vor.u32 %v5280_v61, %v4709_v60  ;;  %v5152_v1 = vld [vmem:[#allocation6 + $0x124] sm:$0xf0] }
  0xdd   :  { %v1839_v20 = vadd.f32 %v1838_v16, %v5663_v38  ;;  %v5671_v29 = vadd.f32 %v1983_v7, %v1935_v6  ;;  %v4198_v7 = vor.u32 %v5152_v1, %v4197_v62  ;;  %v4966_v16 = vor.u32 %v5344_v3, %v4965_v2  ;;  %v4677_v60 = vld [vmem:[#allocation6 + $0x4c8] sm:$0xf] }
  0xde   :  { %2320 = vmatpush.bf16.msra.mxu2 %v4710_v0  ;;  %v5272_v61 = vld [vmem:[#allocation6 + $0x4e4] sm:$0xf0] }
  0xdf   :  { %v1888_v30 = vadd.f32 %v1887_v28, %v1839_v20  ;;  %2222 = vmatpush.bf16.msra.mxu0 %v4198_v7  ;;  %2369 = vmatpush.bf16.msra.mxu3 %v4966_v16  ;;  %v4165_v62 = vld [vmem:[#allocation6 + $0xc8] sm:$0xf]  ;;  %v4678_v0 = vor.u32 %v5272_v61, %v4677_v60 }
  0xe0   :  { %v5144_v1 = vld [vmem:[#allocation6 + $0xe4] sm:$0xf0] }
  0xe1   :  { %v4933_v2 = vld [vmem:[#allocation6 + $0x6c8] sm:$0xf]  ;;  %v4166_v7 = vor.u32 %v5144_v1, %v4165_v62 }
  0xe2   :  { %v1936_v33 = vpop.f32.mrf.mxu2  ;;  %v1890_v56 = vpop.f32.mrf.mxu1  ;;  %v5336_v3 = vld [vmem:[#allocation6 + $0x6e4] sm:$0xf0]  ;;  %2321 = vmatpush.bf16.msra.mxu2 %v4678_v0 }
  0xe3   :  { %v1937_v35 = vadd.f32 %v1936_v33, %v1888_v30  ;;  %v4453_v30 = vld [vmem:[#allocation6 + $0x308] sm:$0xf]  ;;  %v4934_v16 = vor.u32 %v5336_v3, %v4933_v2  ;;  %2223 = vmatpush.bf16.msra.mxu0 %v4166_v7 }
  0xe4   :  { %v1985_v36 = vpop.f32.mrf.mxu3  ;;  %v1841_v39 = vpop.f32.mrf.mxu0  ;;  %v4454_v33 = vor.u32 %v5216_v31, %v4453_v30  ;;  %v4421_v31 = vld [vmem:[#allocation6 + $0x2c8] sm:$0xf] }
  0xe5   :  { %v1842_v55 = vadd.f32 %v1841_v39, %v5663_v38  ;;  %v5674_v58 = vadd.f32 %v1985_v36, %v1937_v35  ;;  %2085 = vmatmul.bf16.gmra.mxu1 %v5578_v25  ;;  %2370 = vmatpush.bf16.msra.mxu3 %v4934_v16  ;;  %v4645_v62 = vld [vmem:[#allocation6 + $0x488] sm:$0xf] }
  0xe6   :  { %2271 = vmatpush.bf16.msra.mxu1 %v4454_v33  ;;  %v4133_v0 = vld [vmem:[#allocation6 + $0x88] sm:$0xf] }
  0xe7   :  { %v1891_v59 = vadd.f32 %v1890_v56, %v1842_v55  ;;  %2036 = vmatmul.bf16.gmra.mxu0 %v5576_v24  ;;  %2134 = vmatmul.bf16.gmra.mxu2 %v5580_v26  ;;  %v5136_v3 = vld [vmem:[#allocation6 + $0xa4] sm:$0xf0] }
  0xe9   :  { %2183 = vmatmul.bf16.gmra.mxu3 %v5582_v27 }
  0xea   :  { %v1939_v63 = vpop.f32.mrf.mxu2  ;;  %v1892_v18 = vpop.f32.mrf.mxu1 }
  0xeb   :  { %v1940_v4 = vadd.f32 %v1939_v63, %v1891_v59 }
  0xec   :  { %v1988_v5 = vpop.f32.mrf.mxu3  ;;  %v1843_v6 = vpop.f32.mrf.mxu0 }
  0xed   :  { %v1844_v17 = vadd.f32 %v1843_v6, %v5663_v38  ;;  %v5681_v20 = vadd.f32 %v1988_v5, %v1940_v4 }
  0xef   :  { %v1893_v28 = vadd.f32 %v1892_v18, %v1844_v17 }
  0xf2   :  { %v1941_v32 = vpop.f32.mrf.mxu2  ;;  %v1895_v55 = vpop.f32.mrf.mxu1 }
  0xf3   :  { %v1942_v34 = vadd.f32 %v1941_v32, %v1893_v28  ;;  %v5208_v32 = vld [vmem:[#allocation6 + $0x2e4] sm:$0xf0] }
  0xf4   :  { %v1990_v35 = vpop.f32.mrf.mxu3  ;;  %v1846_v36 = vpop.f32.mrf.mxu0 }
  0xf5   :  { %v1847_v39 = vadd.f32 %v1846_v36, %v5663_v38  ;;  %v5684_v56 = vadd.f32 %v1990_v35, %v1942_v34  ;;  %2090 = vmatmul.bf16.gmra.mxu1 %v5590_v50  ;;  %v4422_v34 = vor.u32 %v5208_v32, %v4421_v31 }
  0xf7   :  { %v1896_v59 = vadd.f32 %v1895_v55, %v1847_v39  ;;  %2041 = vmatmul.bf16.gmra.mxu0 %v5588_v49  ;;  %2139 = vmatmul.bf16.gmra.mxu2 %v5592_v51 }
  0xf8   :  { %2272 = vmatpush.bf16.msra.mxu1 %v4422_v34  ;;  %v4389_v34 = vld [vmem:[#allocation6 + $0x288] sm:$0xf] }
  0xf9   :  { %2188 = vmatmul.bf16.gmra.mxu3 %v5594_v52 }
  0xfa   :  { %v1944_v63 = vpop.f32.mrf.mxu2  ;;  %v1897_v18 = vpop.f32.mrf.mxu1 }
  0xfb   :  { %v1945_v4 = vadd.f32 %v1944_v63, %v1896_v59  ;;  %v5264_v63 = vld [vmem:[#allocation6 + $0x4a4] sm:$0xf0] }
  0xfc   :  { %v1993_v5 = vpop.f32.mrf.mxu3  ;;  %v1848_v6 = vpop.f32.mrf.mxu0  ;;  %v4646_v2 = vor.u32 %v5264_v63, %v4645_v62 }
  0xfd   :  { %v1849_v17 = vadd.f32 %v1848_v6, %v5663_v38  ;;  %v5691_v28 = vadd.f32 %v1993_v5, %v1945_v4  ;;  %v4901_v4 = vld [vmem:[#allocation6 + $0x688] sm:$0xf] }
  0xfe   :  { %v5328_v5 = vld [vmem:[#allocation6 + $0x6a4] sm:$0xf0]  ;;  %2322 = vmatpush.bf16.msra.mxu2 %v4646_v2 }
  0xff   :  { %v1898_v30 = vadd.f32 %v1897_v18, %v1849_v17  ;;  %v4134_v17 = vor.u32 %v5136_v3, %v4133_v0  ;;  %v4902_v18 = vor.u32 %v5328_v5, %v4901_v4  ;;  %v4613_v2 = vld [vmem:[#allocation6 + $0x448] sm:$0xf] }
 0x100   :  { %v5256_v3 = vld [vmem:[#allocation6 + $0x464] sm:$0xf0] }
 0x101   :  { %2224 = vmatpush.bf16.msra.mxu0 %v4134_v17  ;;  %2371 = vmatpush.bf16.msra.mxu3 %v4902_v18  ;;  %v4101_v4 = vld [vmem:[#allocation6 + $0x48] sm:$0xf] }
 0x102   :  { %v1946_v33 = vpop.f32.mrf.mxu2  ;;  %v1900_v59 = vpop.f32.mrf.mxu1  ;;  %v5320_v17 = vld [vmem:[#allocation6 + $0x664] sm:$0xf0] }
 0x103   :  { %v1947_v35 = vadd.f32 %v1946_v33, %v1898_v30 }
 0x104   :  { %v1995_v36 = vpop.f32.mrf.mxu3  ;;  %v1851_v39 = vpop.f32.mrf.mxu0 }
 0x105   :  { %v1852_v55 = vadd.f32 %v1851_v39, %v5663_v38  ;;  %v5694_v60 = vadd.f32 %v1995_v36, %v1947_v35  ;;  %2095 = vmatmul.bf16.gmra.mxu1 %v5602_v13  ;;  %v5200_v35 = vld [vmem:[#allocation6 + $0x2a4] sm:$0xf0] }
 0x106   :  { %v4390_v39 = vor.u32 %v5200_v35, %v4389_v34 }
 0x107   :  { %v1901_v61 = vadd.f32 %v1900_v59, %v1852_v55  ;;  %2046 = vmatmul.bf16.gmra.mxu0 %v5600_v12  ;;  %2144 = vmatmul.bf16.gmra.mxu2 %v5604_v14 }
 0x108   :  { %2273 = vmatpush.bf16.msra.mxu1 %v4390_v39 }
 0x109   :  { %2193 = vmatmul.bf16.gmra.mxu3 %v5606_v15 }
 0x10a   :  { %v1949_v1 = vpop.f32.mrf.mxu2  ;;  %v1902_v31 = vpop.f32.mrf.mxu1 }
 0x10b   :  { %v1950_v6 = vadd.f32 %v1949_v1, %v1901_v61 }
 0x10c   :  { %v1998_v7 = vpop.f32.mrf.mxu3  ;;  %v1853_v16 = vpop.f32.mrf.mxu0 }
 0x10d   :  { %v1854_v30 = vadd.f32 %v1853_v16, %v5663_v38  ;;  %v5701_v32 = vadd.f32 %v1998_v7, %v1950_v6  ;;  %v4614_v6 = vor.u32 %v5256_v3, %v4613_v2  ;;  %v5128_v7 = vld [vmem:[#allocation6 + $0x64] sm:$0xf0] }
 0x10e   :  { %v4869_v16 = vld [vmem:[#allocation6 + $0x648] sm:$0xf] }
 0x10f   :  { %v1903_v33 = vadd.f32 %v1902_v31, %v1854_v30  ;;  %v4870_v34 = vor.u32 %v5320_v17, %v4869_v16  ;;  %2323 = vmatpush.bf16.msra.mxu2 %v4614_v6  ;;  %v4581_v6 = vld [vmem:[#allocation6 + $0x408] sm:$0xf] }
 0x110   :  { %v5248_v17 = vld [vmem:[#allocation6 + $0x424] sm:$0xf0] }
 0x111   :  { %2372 = vmatpush.bf16.msra.mxu3 %v4870_v34  ;;  %v4837_v34 = vld [vmem:[#allocation6 + $0x608] sm:$0xf] }
 0x112   :  { %v1951_v36 = vpop.f32.mrf.mxu2  ;;  %v1905_v63 = vpop.f32.mrf.mxu1 }
 0x113   :  { %v1952_v55 = vadd.f32 %v1951_v36, %v1903_v33  ;;  %v4102_v33 = vor.u32 %v5128_v7, %v4101_v4 }
 0x114   :  { %v2000_v59 = vpop.f32.mrf.mxu3  ;;  %v1856_v61 = vpop.f32.mrf.mxu0 }
 0x115   :  { %v1857_v62 = vadd.f32 %v1856_v61, %v5663_v38  ;;  %v5704_v0 = vadd.f32 %v2000_v59, %v1952_v55  ;;  %2100 = vmatmul.bf16.gmra.mxu1 %v5614_v41  ;;  %2225 = vmatpush.bf16.msra.mxu0 %v4102_v33  ;;  %v4357_v59 = vld [vmem:[#allocation6 + $0x248] sm:$0xf] }
 0x116   :  { %v5192_v61 = vld [vmem:[#allocation6 + $0x264] sm:$0xf0] }
 0x117   :  { %v1906_v1 = vadd.f32 %v1905_v63, %v1857_v62  ;;  %2051 = vmatmul.bf16.gmra.mxu0 %v5612_v40  ;;  %2149 = vmatmul.bf16.gmra.mxu2 %v5616_v42  ;;  %v4358_v63 = vor.u32 %v5192_v61, %v4357_v59  ;;  %v5120_v33 = vld [vmem:[#allocation6 + $0x24] sm:$0xf0] }
 0x119   :  { %2198 = vmatmul.bf16.gmra.mxu3 %v5618_v43  ;;  %2274 = vmatpush.bf16.msra.mxu1 %v4358_v63 }
 0x11a   :  { %v1954_v5 = vpop.f32.mrf.mxu2  ;;  %v1907_v36 = vpop.f32.mrf.mxu1 }
 0x11b   :  { %v1955_v18 = vadd.f32 %v1954_v5, %v1906_v1 }
 0x11c   :  { %v2003_v30 = vpop.f32.mrf.mxu3  ;;  %v1858_v31 = vpop.f32.mrf.mxu0 }
 0x11d   :  { %v1859_v35 = vadd.f32 %v1858_v31, %v5663_v38  ;;  %v5711_v39 = vadd.f32 %v2003_v30, %v1955_v18  ;;  %v4069_v18 = vld [vmem:[#allocation6 + $0x8] sm:$0xf]  ;;  %v4582_v31 = vor.u32 %v5248_v17, %v4581_v6 }
 0x11e   :  { %v4070_v61 = vor.u32 %v5120_v33, %v4069_v18 }
 0x11f   :  { %v1908_v55 = vadd.f32 %v1907_v36, %v1859_v35  ;;  %v5312_v35 = vld [vmem:[#allocation6 + $0x624] sm:$0xf0]  ;;  %2324 = vmatpush.bf16.msra.mxu2 %v4582_v31  ;;  %v5300_v31 = vld [vmem:[#allocation6 + $0x5cc] sm:$0xf] }
 0x120   :  { %2226 = vmatpush.bf16.msra.mxu0 %v4070_v61  ;;  %v4295_v61 = vld [vmem:[#allocation6 + $0x1e8] sm:$0xf0] }
 0x122   :  { %v1956_v62 = vpop.f32.mrf.mxu2  ;;  %v1910_v4 = vpop.f32.mrf.mxu1 }
 0x123   :  { %v1957_v2 = vadd.f32 %v1956_v62, %v1908_v55  ;;  %v4838_v62 = vor.u32 %v5312_v35, %v4837_v34  ;;  %v4807_v35 = vld [vmem:[#allocation6 + $0x5e8] sm:$0xf0] }
 0x124   :  { %v2005_v3 = vpop.f32.mrf.mxu3  ;;  %v1861_v1 = vpop.f32.mrf.mxu0 }
 0x125   :  { %v1862_v5 = vadd.f32 %v1861_v1, %v5663_v38  ;;  %v5714_v7 = vadd.f32 %v2005_v3, %v1957_v2  ;;  %2105 = vmatmul.bf16.gmra.mxu1 %v5626_v9  ;;  %2373 = vmatpush.bf16.msra.mxu3 %v4838_v62  ;;  %v5364_v62 = vld [vmem:[#allocation6 + $0x7cc] sm:$0xf] }
 0x127   :  { %v1911_v16 = vadd.f32 %v1910_v4, %v1862_v5  ;;  %2056 = vmatmul.bf16.gmra.mxu0 %v5624_v8  ;;  %2154 = vmatmul.bf16.gmra.mxu2 %v5628_v10  ;;  %v4325_v5 = vld [vmem:[#allocation6 + $0x208] sm:$0xf] }
 0x128   :  { %v5184_v4 = vld [vmem:[#allocation6 + $0x224] sm:$0xf0] }
 0x129   :  { %2203 = vmatmul.bf16.gmra.mxu3 %v5630_v11  ;;  %v4326_v17 = vor.u32 %v5184_v4, %v4325_v5 }
 0x12a   :  { %v1959_v30 = vpop.f32.mrf.mxu2  ;;  %v1912_v2 = vpop.f32.mrf.mxu1 }
 0x12b   :  { %v1960_v36 = vadd.f32 %v1959_v30, %v1911_v16  ;;  %2275 = vmatpush.bf16.msra.mxu1 %v4326_v17 }
 0x12c   :  { %v2008_v55 = vpop.f32.mrf.mxu3  ;;  %v1863_v59 = vpop.f32.mrf.mxu0 }
 0x12d   :  { %v1864_v63 = vadd.f32 %v1863_v59, %v5663_v38  ;;  %v5721_v3 = vadd.f32 %v2008_v55, %v1960_v36  ;;  %v5172_v36 = vld [vmem:[#allocation6 + $0x1cc] sm:$0xf]  ;;  %v4810_v59 = vor.u32 %v5300_v31, %v4807_v35 }
 0x12f   :  { %v1913_v1 = vadd.f32 %v1912_v2, %v1864_v63  ;;  %v5063_v63 = vld [vmem:[#allocation6 + $0x7e8] sm:$0xf0]  ;;  %2513 = vmatpush.bf16.msrb.mxu2 %v4810_v59 }
 0x130   :  { %v5066_v5 = vor.u32 %v5364_v62, %v5063_v63 }
 0x132   :  { %v1961_v6 = vpop.f32.mrf.mxu2  ;;  %v1915_v18 = vpop.f32.mrf.mxu1  ;;  %2562 = vmatpush.bf16.msrb.mxu3 %v5066_v5  ;;  %v5164_v5 = vld [vmem:[#allocation6 + $0x18c] sm:$0xf] }
 0x133   :  { %v1962_v11 = vadd.f32 %v1961_v6, %v1913_v1  ;;  %v4298_v1 = vor.u32 %v5172_v36, %v4295_v61 }
 0x134   :  { %v2010_v10 = vpop.f32.mrf.mxu3  ;;  %v1866_v16 = vpop.f32.mrf.mxu0 }
 0x135   :  { %v1867_v30 = vadd.f32 %v1866_v16, %v5663_v38  ;;  %v5724_v33 = vadd.f32 %v2010_v10, %v1962_v11  ;;  %2110 = vmatmul.bf16.gmra.mxu1 %v5638_v45  ;;  %2415 = vmatpush.bf16.msrb.mxu0 %v4298_v1  ;;  %v4775_v1 = vld [vmem:[#allocation6 + $0x5a8] sm:$0xf0] }
 0x137   :  { %v1916_v34 = vadd.f32 %v1915_v18, %v1867_v30  ;;  %2061 = vmatmul.bf16.gmra.mxu0 %v5636_v44  ;;  %2159 = vmatmul.bf16.gmra.mxu2 %v5640_v46  ;;  %v4551_v46 = vld [vmem:[#allocation6 + $0x3e8] sm:$0xf0] }
 0x139   :  { %2208 = vmatmul.bf16.gmra.mxu3 %v5642_v47  ;;  %v5236_v47 = vld [vmem:[#allocation6 + $0x3cc] sm:$0xf] }
 0x13a   :  { %v1964_v55 = vpop.f32.mrf.mxu2  ;;  %v1917_v6 = vpop.f32.mrf.mxu1  ;;  %v4554_v36 = vor.u32 %v5236_v47, %v4551_v46 }
 0x13b   :  { %v1965_v2 = vadd.f32 %v1964_v55, %v1916_v34 }
 0x13c   :  { %v2013_v10 = vpop.f32.mrf.mxu3  ;;  %v1868_v11 = vpop.f32.mrf.mxu0  ;;  %2464 = vmatpush.bf16.msrb.mxu1 %v4554_v36 }
 0x13d   :  { %v1869_v4 = vadd.f32 %v1868_v11, %v5663_v38  ;;  %v5731_v17 = vadd.f32 %v2013_v10, %v1965_v2  ;;  %v5292_v11 = vld [vmem:[#allocation6 + $0x58c] sm:$0xf] }
 0x13f   :  { %v1918_v16 = vadd.f32 %v1917_v6, %v1869_v4  ;;  %v4778_v4 = vor.u32 %v5292_v11, %v4775_v1  ;;  %v4263_v6 = vld [vmem:[#allocation6 + $0x1a8] sm:$0xf0] }
 0x140   :  { %v4519_v11 = vld [vmem:[#allocation6 + $0x3a8] sm:$0xf0] }
 0x141   :  { %2514 = vmatpush.bf16.msrb.mxu2 %v4778_v4 }
 0x142   :  { %v1966_v30 = vpop.f32.mrf.mxu2  ;;  %v1920_v55 = vpop.f32.mrf.mxu1 }
 0x143   :  { %v1967_v18 = vadd.f32 %v1966_v30, %v1918_v16  ;;  %v5356_v16 = vld [vmem:[#allocation6 + $0x78c] sm:$0xf] }
 0x144   :  { %v2015_v31 = vpop.f32.mrf.mxu3  ;;  %v1871_v35 = vpop.f32.mrf.mxu0  ;;  %v5031_v30 = vld [vmem:[#allocation6 + $0x7a8] sm:$0xf0] }
 0x145   :  { %v1872_v34 = vadd.f32 %v1871_v35, %v5663_v38  ;;  %v5734_v61 = vadd.f32 %v2015_v31, %v1967_v18  ;;  %2115 = vmatmul.bf16.gmra.mxu1 %v5650_v21  ;;  %v4266_v31 = vor.u32 %v5164_v5, %v4263_v6  ;;  %v5034_v35 = vor.u32 %v5356_v16, %v5031_v30  ;;  %v5284_v30 = vld [vmem:[#allocation6 + $0x54c] sm:$0xf] }
 0x147   :  { %v1921_v62 = vadd.f32 %v1920_v55, %v1872_v34  ;;  %2066 = vmatmul.bf16.gmra.mxu0 %v5648_v19  ;;  %2164 = vmatmul.bf16.gmra.mxu2 %v5652_v22  ;;  %v5744_v55 = vperm.slane %v5660_v37, 1  ;;  %v3395_v37 = vmax.f32 %v5671_v29, 0.0 }
 0x148   :  { %2416 = vmatpush.bf16.msrb.mxu0 %v4266_v31  ;;  %2563 = vmatpush.bf16.msrb.mxu3 %v5034_v35  ;;  %v4743_v31 = vld [vmem:[#allocation6 + $0x568] sm:$0xf0] }
 0x149   :  { %2213 = vmatmul.bf16.gmra.mxu3 %v5654_v23  ;;  %v5156_v35 = vld [vmem:[#allocation6 + $0x14c] sm:$0xf] }
 0x14a   :  { %v1969_v59 = vpop.f32.mrf.mxu2  ;;  %v1922_v47 = vpop.f32.mrf.mxu1 }
 0x14b   :  { %v1970_v63 = vadd.f32 %v1969_v59, %v1921_v62 }
 0x14c   :  { %v2018_v2 = vpop.f32.mrf.mxu3  ;;  %v1873_v10 = vpop.f32.mrf.mxu0 }
 0x14d   :  { %v1874_v46 = vadd.f32 %v1873_v10, %v5663_v38  ;;  %v5741_v18 = vadd.f32 %v2018_v2, %v1970_v63  ;;  %v5228_v10 = vld [vmem:[#allocation6 + $0x38c] sm:$0xf] }
 0x14e   :  { %v4522_v63 = vor.u32 %v5228_v10, %v4519_v11  ;;  %v4999_v10 = vld [vmem:[#allocation6 + $0x768] sm:$0xf0] }
 0x14f   :  { %v1923_v34 = vadd.f32 %v1922_v47, %v1874_v46  ;;  %v5750_v46 = vld [vmem:[#allocation9] sm:$0xff] }
 0x150   :  { %2465 = vmatpush.bf16.msrb.mxu1 %v4522_v63  ;;  %6638 = vst [vmem:[#allocation30_spill] sm:$0xff] %v5750_v46  ;;  %v5757_v47 = vperm.slane %v5750_v46, 0  ;;  %v5761_v29 = vperm.slane %v5750_v46, 1  ;;  %v4487_v46 = vld [vmem:[#allocation6 + $0x368] sm:$0xf0] }
 0x152   :  { %v1971_v36 = vpop.f32.mrf.mxu2  ;;  %v2081_v23 = vpop.f32.mrf.mxu1 }
 0x153   :  { %v1972_v62 = vadd.f32 %v1971_v36, %v1923_v34 }
 0x154   :  { %v2020_v59 = vpop.f32.mrf.mxu3  ;;  %v2032_v38 = vpop.f32.mrf.mxu0 }
 0x155   :  { %v2033_v1 = vadd.f32 %v2032_v38, %v5744_v55  ;;  %v5747_v2 = vadd.f32 %v2020_v59, %v1972_v62  ;;  %2276 = vmatmul.bf16.vlgmr.msra.gmra.mxu1 %v5566_v53  ;;  %v4746_v62 = vor.u32 %v5284_v30, %v4743_v31  ;;  %v4231_v59 = vld [vmem:[#allocation6 + $0x168] sm:$0xf0] }
 0x156   :  { %v5348_v38 = vld [vmem:[#allocation6 + $0x74c] sm:$0xf] }
 0x157   :  { %v2082_v5 = vadd.f32 %v2081_v23, %v2033_v1  ;;  %2227 = vmatmul.bf16.vlgmr.msra.gmra.mxu0 %v5564_v48  ;;  %2325 = vmatmul.bf16.vlgmr.msra.gmra.mxu2 %v5568_v54  ;;  %v4234_v1 = vor.u32 %v5156_v35, %v4231_v59  ;;  %v5002_v63 = vor.u32 %v5348_v38, %v4999_v10 }
 0x158   :  { %2515 = vmatpush.bf16.msrb.mxu2 %v4746_v62 }
 0x159   :  { %2374 = vmatmul.bf16.vlgmr.msra.gmra.mxu3 %v5570_v57  ;;  %2417 = vmatpush.bf16.msrb.mxu0 %v4234_v1  ;;  %v5276_v1 = vld [vmem:[#allocation6 + $0x50c] sm:$0xf] }
 0x15a   :  { %v2130_v4 = vpop.f32.mrf.mxu2  ;;  %v2083_v36 = vpop.f32.mrf.mxu1  ;;  %2564 = vmatpush.bf16.msrb.mxu3 %v5002_v63  ;;  %v4711_v63 = vld [vmem:[#allocation6 + $0x528] sm:$0xf0] }
 0x15b   :  { %v2131_v6 = vadd.f32 %v2130_v4, %v2082_v5  ;;  %v3541_v4 = vmul.f32 %v5757_v47, %v3395_v37 }
 0x15c   :  { %v2179_v16 = vpop.f32.mrf.mxu3  ;;  %v2034_v23 = vpop.f32.mrf.mxu0 }
 0x15d   :  { %v2035_v34 = vadd.f32 %v2034_v23, %v5744_v55  ;;  %v2180_v11 = vadd.f32 %v2179_v16, %v2131_v6  ;;  %v5220_v16 = vld [vmem:[#allocation6 + $0x34c] sm:$0xf] }
 0x15f   :  { %v2084_v57 = vadd.f32 %v2083_v36, %v2035_v34  ;;  %v3396_v5 = vmax.f32 %v2180_v11, 0.0  ;;  %v4490_v34 = vor.u32 %v5220_v16, %v4487_v46  ;;  %v3403_v36 = vmax.f32 %v5674_v58, 0.0  ;;  %v5340_v16 = vld [vmem:[#allocation6 + $0x70c] sm:$0xf] }
 0x161   :  { %v3542_v23 = vmul.f32 %v5761_v29, %v3396_v5  ;;  %2466 = vmatpush.bf16.msrb.mxu1 %v4490_v34  ;;  %v5148_v5 = vld [vmem:[#allocation6 + $0x10c] sm:$0xf] }
 0x162   :  { %v2132_v54 = vpop.f32.mrf.mxu2  ;;  %v2086_v59 = vpop.f32.mrf.mxu1 }
 0x163   :  { %v5765_v30 = vadd.f32 %v3542_v23, %v3541_v4  ;;  %v2133_v31 = vadd.f32 %v2132_v54, %v2084_v57  ;;  %v3549_v54 = vmul.f32 %v5757_v47, %v3403_v36 }
 0x164   :  { %v2181_v53 = vpop.f32.mrf.mxu3  ;;  %v2037_v6 = vpop.f32.mrf.mxu0 }
 0x165   :  { %v2038_v35 = vadd.f32 %v2037_v6, %v5744_v55  ;;  %v2182_v62 = vadd.f32 %v2181_v53, %v2133_v31  ;;  %2281 = vmatmul.bf16.gmra.mxu1 %v5578_v25  ;;  %v4714_v31 = vor.u32 %v5276_v1, %v4711_v63  ;;  %v4199_v6 = vld [vmem:[#allocation6 + $0x128] sm:$0xf0] }
 0x166   :  { %v4202_v36 = vor.u32 %v5148_v5, %v4199_v6 }
 0x167   :  { %v2087_v38 = vadd.f32 %v2086_v59, %v2038_v35  ;;  %2232 = vmatmul.bf16.gmra.mxu0 %v5576_v24  ;;  %v3404_v37 = vmax.f32 %v2182_v62, 0.0  ;;  %2330 = vmatmul.bf16.gmra.mxu2 %v5580_v26  ;;  %v4967_v35 = vld [vmem:[#allocation6 + $0x728] sm:$0xf0]  ;;  %v3411_v59 = vmax.f32 %v5681_v20, 0.0 }
 0x168   :  { %v4970_v62 = vor.u32 %v5340_v16, %v4967_v35  ;;  %2516 = vmatpush.bf16.msrb.mxu2 %v4714_v31  ;;  %2418 = vmatpush.bf16.msrb.mxu0 %v4202_v36  ;;  %v4455_v20 = vld [vmem:[#allocation6 + $0x328] sm:$0xf0] }
 0x169   :  { %2379 = vmatmul.bf16.gmra.mxu3 %v5582_v27  ;;  %v3550_v57 = vmul.f32 %v5761_v29, %v3404_v37  ;;  %v5212_v27 = vld [vmem:[#allocation6 + $0x30c] sm:$0xf] }
 0x16a   :  { %v2135_v10 = vpop.f32.mrf.mxu2  ;;  %v2088_v23 = vpop.f32.mrf.mxu1  ;;  %2565 = vmatpush.bf16.msrb.mxu3 %v4970_v62  ;;  %v4458_v5 = vor.u32 %v5212_v27, %v4455_v20  ;;  %v5268_v36 = vld [vmem:[#allocation6 + $0x4cc] sm:$0xf]  ;;  %v3427_v20 = vmax.f32 %v5691_v28, 0.0 }
 0x16b   :  { %v5775_v46 = vadd.f32 %v3550_v57, %v3549_v54  ;;  %v2136_v58 = vadd.f32 %v2135_v10, %v2087_v38  ;;  %v3557_v54 = vmul.f32 %v5757_v47, %v3411_v59  ;;  %v4679_v62 = vld [vmem:[#allocation6 + $0x4e8] sm:$0xf0] }
 0x16c   :  { %v2184_v53 = vpop.f32.mrf.mxu3  ;;  %v2039_v11 = vpop.f32.mrf.mxu0  ;;  %2467 = vmatpush.bf16.msrb.mxu1 %v4458_v5  ;;  %v4423_v28 = vld [vmem:[#allocation6 + $0x2e8] sm:$0xf0] }
 0x16d   :  { %6639 = vst [vmem:[#allocation31_spill] sm:$0xff] %v5775_v46  ;;  %v2040_v4 = vadd.f32 %v2039_v11, %v5744_v55  ;;  %v2185_v34 = vadd.f32 %v2184_v53, %v2136_v58 }
 0x16f   :  { %v2089_v37 = vadd.f32 %v2088_v23, %v2040_v4  ;;  %v3412_v38 = vmax.f32 %v2185_v34, 0.0  ;;  %v3419_v4 = vmax.f32 %v5684_v56, 0.0 }
 0x171   :  { %v3558_v57 = vmul.f32 %v5761_v29, %v3412_v38  ;;  %v3565_v16 = vmul.f32 %v5757_v47, %v3419_v4 }
 0x172   :  { %v2137_v10 = vpop.f32.mrf.mxu2  ;;  %v2091_v53 = vpop.f32.mrf.mxu1 }
 0x173   :  { %v5781_v11 = vadd.f32 %v3558_v57, %v3557_v54  ;;  %v2138_v1 = vadd.f32 %v2137_v10, %v2089_v37  ;;  %v5140_v37 = vld [vmem:[#allocation6 + $0xcc] sm:$0xf]  ;;  %v4682_v57 = vor.u32 %v5268_v36, %v4679_v62 }
 0x174   :  { %v2186_v63 = vpop.f32.mrf.mxu3  ;;  %v2042_v46 = vpop.f32.mrf.mxu0  ;;  %v4167_v10 = vld [vmem:[#allocation6 + $0xe8] sm:$0xf0] }
 0x175   :  { %v2043_v58 = vadd.f32 %v2042_v46, %v5744_v55  ;;  %v2187_v23 = vadd.f32 %v2186_v63, %v2138_v1  ;;  %2286 = vmatmul.bf16.gmra.mxu1 %v5590_v50  ;;  %v5332_v1 = vld [vmem:[#allocation6 + $0x6cc] sm:$0xf]  ;;  %2517 = vmatpush.bf16.msrb.mxu2 %v4682_v57 }
 0x176   :  { %v4935_v63 = vld [vmem:[#allocation6 + $0x6e8] sm:$0xf0] }
 0x177   :  { %v2092_v31 = vadd.f32 %v2091_v53, %v2043_v58  ;;  %2237 = vmatmul.bf16.gmra.mxu0 %v5588_v49  ;;  %v3420_v6 = vmax.f32 %v2187_v23, 0.0  ;;  %2335 = vmatmul.bf16.gmra.mxu2 %v5592_v51  ;;  %v4170_v53 = vor.u32 %v5140_v37, %v4167_v10  ;;  %v4938_v5 = vor.u32 %v5332_v1, %v4935_v63  ;;  %v5204_v62 = vld [vmem:[#allocation6 + $0x2cc] sm:$0xf] }
 0x178   :  { %v4426_v37 = vor.u32 %v5204_v62, %v4423_v28  ;;  %v4903_v62 = vld [vmem:[#allocation6 + $0x6a8] sm:$0xf0]  ;;  %v3443_v28 = vmax.f32 %v5701_v32, 0.0 }
 0x179   :  { %2384 = vmatmul.bf16.gmra.mxu3 %v5594_v52  ;;  %v3566_v46 = vmul.f32 %v5761_v29, %v3420_v6  ;;  %2419 = vmatpush.bf16.msrb.mxu0 %v4170_v53  ;;  %v4391_v32 = vld [vmem:[#allocation6 + $0x2a8] sm:$0xf0] }
 0x17a   :  { %v2140_v35 = vpop.f32.mrf.mxu2  ;;  %v2093_v54 = vpop.f32.mrf.mxu1  ;;  %2566 = vmatpush.bf16.msrb.mxu3 %v4938_v5  ;;  %2468 = vmatpush.bf16.msrb.mxu1 %v4426_v37 }
 0x17b   :  { %v5791_v27 = vadd.f32 %v3566_v46, %v3565_v16  ;;  %v2141_v56 = vadd.f32 %v2140_v35, %v2092_v31  ;;  %v3573_v31 = vmul.f32 %v5757_v47, %v3427_v20 }
 0x17c   :  { %v2189_v59 = vpop.f32.mrf.mxu3  ;;  %v2044_v34 = vpop.f32.mrf.mxu0 }
 0x17d   :  { %v2045_v38 = vadd.f32 %v2044_v34, %v5744_v55  ;;  %v2190_v58 = vadd.f32 %v2189_v59, %v2141_v56 }
 0x17f   :  { %v2094_v4 = vadd.f32 %v2093_v54, %v2045_v38  ;;  %v3428_v23 = vmax.f32 %v2190_v58, 0.0  ;;  %v3435_v38 = vmax.f32 %v5694_v60, 0.0 }
 0x181   :  { %v3574_v6 = vmul.f32 %v5761_v29, %v3428_v23  ;;  %v3581_v1 = vmul.f32 %v5757_v47, %v3435_v38  ;;  %v4647_v23 = vld [vmem:[#allocation6 + $0x4a8] sm:$0xf0] }
 0x182   :  { %v2142_v16 = vpop.f32.mrf.mxu2  ;;  %v2096_v59 = vpop.f32.mrf.mxu1 }
 0x183   :  { %v5797_v46 = vadd.f32 %v3574_v6, %v3573_v31  ;;  %v2143_v35 = vadd.f32 %v2142_v16, %v2094_v4  ;;  %v5260_v4 = vld [vmem:[#allocation6 + $0x48c] sm:$0xf] }
 0x184   :  { %v2191_v34 = vpop.f32.mrf.mxu3  ;;  %v2047_v36 = vpop.f32.mrf.mxu0  ;;  %v5132_v31 = vld [vmem:[#allocation6 + $0x8c] sm:$0xf] }
 0x185   :  { %v2048_v56 = vadd.f32 %v2047_v36, %v5744_v55  ;;  %v2192_v54 = vadd.f32 %v2191_v34, %v2143_v35  ;;  %2291 = vmatmul.bf16.gmra.mxu1 %v5602_v13  ;;  %v4650_v35 = vor.u32 %v5260_v4, %v4647_v23  ;;  %v4135_v34 = vld [vmem:[#allocation6 + $0xa8] sm:$0xf0] }
 0x186   :  { %v5324_v36 = vld [vmem:[#allocation6 + $0x68c] sm:$0xf] }
 0x187   :  { %v2097_v57 = vadd.f32 %v2096_v59, %v2048_v56  ;;  %2242 = vmatmul.bf16.gmra.mxu0 %v5600_v12  ;;  %v3436_v10 = vmax.f32 %v2192_v54, 0.0  ;;  %2340 = vmatmul.bf16.gmra.mxu2 %v5604_v14  ;;  %v4138_v59 = vor.u32 %v5132_v31, %v4135_v34  ;;  %v4906_v37 = vor.u32 %v5324_v36, %v4903_v62  ;;  %v5196_v23 = vld [vmem:[#allocation6 + $0x28c] sm:$0xf] }
 0x188   :  { %2518 = vmatpush.bf16.msrb.mxu2 %v4650_v35  ;;  %v4394_v31 = vor.u32 %v5196_v23, %v4391_v32  ;;  %v4871_v23 = vld [vmem:[#allocation6 + $0x668] sm:$0xf0]  ;;  %v3459_v32 = vmax.f32 %v5711_v39, 0.0 }
 0x189   :  { %2389 = vmatmul.bf16.gmra.mxu3 %v5606_v15  ;;  %v3582_v63 = vmul.f32 %v5761_v29, %v3436_v10  ;;  %2420 = vmatpush.bf16.msrb.mxu0 %v4138_v59  ;;  %v4359_v39 = vld [vmem:[#allocation6 + $0x268] sm:$0xf0] }
 0x18a   :  { %v2145_v20 = vpop.f32.mrf.mxu2  ;;  %v2098_v16 = vpop.f32.mrf.mxu1  ;;  %2567 = vmatpush.bf16.msrb.mxu3 %v4906_v37  ;;  %2469 = vmatpush.bf16.msrb.mxu1 %v4394_v31 }
 0x18b   :  { %v5807_v58 = vadd.f32 %v3582_v63, %v3581_v1  ;;  %v2146_v60 = vadd.f32 %v2145_v20, %v2097_v57  ;;  %v3589_v57 = vmul.f32 %v5757_v47, %v3443_v28 }
 0x18c   :  { %v2194_v53 = vpop.f32.mrf.mxu3  ;;  %v2049_v5 = vpop.f32.mrf.mxu0 }
 0x18d   :  { %v2050_v6 = vadd.f32 %v2049_v5, %v5744_v55  ;;  %v2195_v56 = vadd.f32 %v2194_v53, %v2146_v60 }
 0x18f   :  { %v2099_v38 = vadd.f32 %v2098_v16, %v2050_v6  ;;  %v3444_v54 = vmax.f32 %v2195_v56, 0.0  ;;  %v3451_v6 = vmax.f32 %v5704_v0, 0.0 }
 0x191   :  { %v3590_v10 = vmul.f32 %v5761_v29, %v3444_v54  ;;  %v3597_v36 = vmul.f32 %v5757_v47, %v3451_v6  ;;  %v4615_v54 = vld [vmem:[#allocation6 + $0x468] sm:$0xf0] }
 0x192   :  { %v2147_v1 = vpop.f32.mrf.mxu2  ;;  %v2101_v53 = vpop.f32.mrf.mxu1 }
 0x193   :  { %v5813_v63 = vadd.f32 %v3590_v10, %v3589_v57  ;;  %v2148_v20 = vadd.f32 %v2147_v1, %v2099_v38  ;;  %v5252_v38 = vld [vmem:[#allocation6 + $0x44c] sm:$0xf] }
 0x194   :  { %v2196_v5 = vpop.f32.mrf.mxu3  ;;  %v2052_v4 = vpop.f32.mrf.mxu0  ;;  %v5124_v57 = vld [vmem:[#allocation6 + $0x4c] sm:$0xf] }
 0x195   :  { %v2053_v60 = vadd.f32 %v2052_v4, %v5744_v55  ;;  %v2197_v16 = vadd.f32 %v2196_v5, %v2148_v20  ;;  %2296 = vmatmul.bf16.gmra.mxu1 %v5614_v41  ;;  %v4618_v20 = vor.u32 %v5252_v38, %v4615_v54  ;;  %v4103_v5 = vld [vmem:[#allocation6 + $0x68] sm:$0xf0] }
 0x196   :  { %v5316_v4 = vld [vmem:[#allocation6 + $0x64c] sm:$0xf] }
 0x197   :  { %v2102_v35 = vadd.f32 %v2101_v53, %v2053_v60  ;;  %2247 = vmatmul.bf16.gmra.mxu0 %v5612_v40  ;;  %v3452_v34 = vmax.f32 %v2197_v16, 0.0  ;;  %2345 = vmatmul.bf16.gmra.mxu2 %v5616_v42  ;;  %v4106_v53 = vor.u32 %v5124_v57, %v4103_v5  ;;  %v4874_v31 = vor.u32 %v5316_v4, %v4871_v23  ;;  %v5188_v54 = vld [vmem:[#allocation6 + $0x24c] sm:$0xf]  ;;  %v6640_v4 = vld [vmem:[#allocation25_spill] sm:$0xff]  ;;  %v6641_v23 = vld [vmem:[#allocation26_spill] sm:$0xff] }
 0x198   :  { %2519 = vmatpush.bf16.msrb.mxu2 %v4618_v20  ;;  %v4362_v57 = vor.u32 %v5188_v54, %v4359_v39  ;;  %v4071_v54 = vld [vmem:[#allocation6 + $0x28] sm:$0xf0] }
 0x199   :  { %2394 = vmatmul.bf16.gmra.mxu3 %v5618_v43  ;;  %v3598_v62 = vmul.f32 %v5761_v29, %v3452_v34  ;;  %2421 = vmatpush.bf16.msrb.mxu0 %v4106_v53  ;;  %v5308_v39 = vld [vmem:[#allocation6 + $0x60c] sm:$0xf] }
 0x19a   :  { %v2150_v28 = vpop.f32.mrf.mxu2  ;;  %v2103_v1 = vpop.f32.mrf.mxu1  ;;  %2568 = vmatpush.bf16.msrb.mxu3 %v4874_v31  ;;  %2470 = vmatpush.bf16.msrb.mxu1 %v4362_v57 }
 0x19b   :  { %v5823_v56 = vadd.f32 %v3598_v62, %v3597_v36  ;;  %v2151_v0 = vadd.f32 %v2150_v28, %v2102_v35  ;;  %v3605_v35 = vmul.f32 %v5757_v47, %v3459_v32 }
 0x19c   :  { %v2199_v59 = vpop.f32.mrf.mxu3  ;;  %v2054_v37 = vpop.f32.mrf.mxu0 }
 0x19d   :  { %v2055_v10 = vadd.f32 %v2054_v37, %v5744_v55  ;;  %v2200_v60 = vadd.f32 %v2199_v59, %v2151_v0 }
 0x19f   :  { %v2104_v6 = vadd.f32 %v2103_v1, %v2055_v10  ;;  %v3460_v16 = vmax.f32 %v2200_v60, 0.0  ;;  %v3467_v10 = vmax.f32 %v5714_v7, 0.0 }
 0x1a1   :  { %v3606_v34 = vmul.f32 %v5761_v29, %v3460_v16  ;;  %v3613_v32 = vmul.f32 %v5757_v47, %v3467_v10 }
 0x1a2   :  { %v2152_v36 = vpop.f32.mrf.mxu2  ;;  %v2106_v59 = vpop.f32.mrf.mxu1 }
 0x1a3   :  { %v5829_v62 = vadd.f32 %v3606_v34, %v3605_v35  ;;  %v2153_v28 = vadd.f32 %v2152_v36, %v2104_v6  ;;  %v5244_v35 = vld [vmem:[#allocation6 + $0x40c] sm:$0xf] }
 0x1a4   :  { %v2201_v37 = vpop.f32.mrf.mxu3  ;;  %v2057_v38 = vpop.f32.mrf.mxu0  ;;  %v4583_v34 = vld [vmem:[#allocation6 + $0x428] sm:$0xf0] }
 0x1a5   :  { %v2058_v0 = vadd.f32 %v2057_v38, %v5744_v55  ;;  %v2202_v1 = vadd.f32 %v2201_v37, %v2153_v28  ;;  %2301 = vmatmul.bf16.gmra.mxu1 %v5626_v9  ;;  %v5116_v36 = vld [vmem:[#allocation6 + $0xc] sm:$0xf]  ;;  %v4586_v38 = vor.u32 %v5244_v35, %v4583_v34 }
 0x1a6   :  { %v4074_v10 = vor.u32 %v5116_v36, %v4071_v54  ;;  %v4327_v35 = vld [vmem:[#allocation6 + $0x228] sm:$0xf0] }
 0x1a7   :  { %v2107_v20 = vadd.f32 %v2106_v59, %v2058_v0  ;;  %2252 = vmatmul.bf16.gmra.mxu0 %v5624_v8  ;;  %v3468_v5 = vmax.f32 %v2202_v1, 0.0  ;;  %2350 = vmatmul.bf16.gmra.mxu2 %v6640_v4  ;;  %v4839_v0 = vld [vmem:[#allocation6 + $0x628] sm:$0xf0]  ;;  %v3475_v59 = vmax.f32 %v5721_v3, 0.0 }
 0x1a8   :  { %v4842_v1 = vor.u32 %v5308_v39, %v4839_v0  ;;  %2520 = vmatpush.bf16.msrb.mxu2 %v4586_v38  ;;  %2422 = vmatpush.bf16.msrb.mxu0 %v4074_v10  ;;  %v6643_v39 = vld [vmem:[#allocation27_spill] sm:$0xff]  ;;  %v6644_v0 = vld [vmem:[#allocation28_spill] sm:$0xff] }
 0x1a9   :  { %2399 = vmatmul.bf16.gmra.mxu3 %v6641_v23  ;;  %v3614_v60 = vmul.f32 %v5761_v29, %v3468_v5 }
 0x1aa   :  { %v2155_v53 = vpop.f32.mrf.mxu2  ;;  %v2108_v37 = vpop.f32.mrf.mxu1  ;;  %2569 = vmatpush.bf16.msrb.mxu3 %v4842_v1 }
 0x1ab   :  { %v5839_v31 = vadd.f32 %v3614_v60, %v3613_v32  ;;  %v2156_v7 = vadd.f32 %v2155_v53, %v2107_v20  ;;  %v3621_v32 = vmul.f32 %v5757_v47, %v3475_v59 }
 0x1ac   :  { %v2204_v6 = vpop.f32.mrf.mxu3  ;;  %v2059_v16 = vpop.f32.mrf.mxu0 }
 0x1ad   :  { %6642 = vst [vmem:[#allocation32_spill] sm:$0xff] %v5839_v31  ;;  %v2060_v28 = vadd.f32 %v2059_v16, %v5744_v55  ;;  %v2205_v57 = vadd.f32 %v2204_v6, %v2156_v7  ;;  %v5180_v16 = vld [vmem:[#allocation6 + $0x20c] sm:$0xf] }
 0x1ae   :  { %v4330_v7 = vor.u32 %v5180_v16, %v4327_v35  ;;  %v5177_v35 = vld [vmem:[#allocation6 + $0x1ec] sm:$0xf0] }
 0x1af   :  { %v2109_v5 = vadd.f32 %v2108_v37, %v2060_v28  ;;  %v3476_v20 = vmax.f32 %v2205_v57, 0.0  ;;  %v3483_v28 = vmax.f32 %v5724_v33, 0.0 }
 0x1b0   :  { %2471 = vmatpush.bf16.msrb.mxu1 %v4330_v7  ;;  %v5369_v7 = vld [vmem:[#allocation6 + $0x7ec] sm:$0xf0] }
 0x1b1   :  { %v3622_v60 = vmul.f32 %v5761_v29, %v3476_v20  ;;  %v3629_v59 = vmul.f32 %v5757_v47, %v3483_v28  ;;  %v5305_v20 = vld [vmem:[#allocation6 + $0x5ec] sm:$0xf0] }
 0x1b2   :  { %v2157_v53 = vpop.f32.mrf.mxu2  ;;  %v2111_v36 = vpop.f32.mrf.mxu1 }
 0x1b3   :  { %v5845_v34 = vadd.f32 %v3622_v60, %v3621_v32  ;;  %v2158_v31 = vadd.f32 %v2157_v53, %v2109_v5  ;;  %v4813_v5 = vld [vmem:[#allocation6 + $0x5d0] sm:$0xf] }
 0x1b4   :  { %v2206_v23 = vpop.f32.mrf.mxu3  ;;  %v2062_v3 = vpop.f32.mrf.mxu0  ;;  %v4301_v32 = vld [vmem:[#allocation6 + $0x1d0] sm:$0xf]  ;;  %v4814_v16 = vor.u32 %v5305_v20, %v4813_v5 }
 0x1b5   :  { %v2063_v6 = vadd.f32 %v2062_v3, %v5744_v55  ;;  %v2207_v37 = vadd.f32 %v2206_v23, %v2158_v31  ;;  %2306 = vmatmul.bf16.gmra.mxu1 %v5638_v45  ;;  %v5069_v3 = vld [vmem:[#allocation6 + $0x7d0] sm:$0xf]  ;;  %v4302_v28 = vor.u32 %v5177_v35, %v4301_v32 }
 0x1b6   :  { %2709 = vmatpush.bf16.msra.mxu2 %v4814_v16 }
 0x1b7   :  { %v2112_v38 = vadd.f32 %v2111_v36, %v2063_v6  ;;  %2257 = vmatmul.bf16.gmra.mxu0 %v5636_v44  ;;  %v3484_v54 = vmax.f32 %v2207_v37, 0.0  ;;  %2355 = vmatmul.bf16.gmra.mxu2 %v6643_v39  ;;  %v3491_v6 = vmax.f32 %v5731_v17, 0.0  ;;  %v5070_v37 = vor.u32 %v5369_v7, %v5069_v3  ;;  %v5241_v17 = vld [vmem:[#allocation6 + $0x3ec] sm:$0xf0]  ;;  %v6646_v3 = vld [vmem:[#allocation29_spill] sm:$0xff] }
 0x1b8   :  { %2611 = vmatpush.bf16.msra.mxu0 %v4302_v28 }
 0x1b9   :  { %2404 = vmatmul.bf16.gmra.mxu3 %v6644_v0  ;;  %v3630_v57 = vmul.f32 %v5761_v29, %v3484_v54  ;;  %v4557_v0 = vld [vmem:[#allocation6 + $0x3d0] sm:$0xf] }
 0x1ba   :  { %v2160_v10 = vpop.f32.mrf.mxu2  ;;  %v2113_v53 = vpop.f32.mrf.mxu1  ;;  %2758 = vmatpush.bf16.msra.mxu3 %v5070_v37  ;;  %v4558_v32 = vor.u32 %v5241_v17, %v4557_v0  ;;  %v4781_v37 = vld [vmem:[#allocation6 + $0x590] sm:$0xf] }
 0x1bb   :  { %v5855_v1 = vadd.f32 %v3630_v57, %v3629_v59  ;;  %v2161_v33 = vadd.f32 %v2160_v10, %v2112_v38  ;;  %v3637_v59 = vmul.f32 %v5757_v47, %v3491_v6  ;;  %v5361_v17 = vld [vmem:[#allocation6 + $0x7ac] sm:$0xf0] }
 0x1bc   :  { %v2209_v23 = vpop.f32.mrf.mxu3  ;;  %v2064_v31 = vpop.f32.mrf.mxu0  ;;  %2660 = vmatpush.bf16.msra.mxu1 %v4558_v32 }
 0x1bd   :  { %6645 = vst [vmem:[#allocation27_spill] sm:$0xff] %v5855_v1  ;;  %v2065_v60 = vadd.f32 %v2064_v31, %v5744_v55  ;;  %v2210_v36 = vadd.f32 %v2209_v23, %v2161_v33 }
 0x1bf   :  { %v2114_v54 = vadd.f32 %v2113_v53, %v2065_v60  ;;  %v3492_v38 = vmax.f32 %v2210_v36, 0.0  ;;  %v3499_v60 = vmax.f32 %v5734_v61, 0.0 }
 0x1c1   :  { %v3638_v57 = vmul.f32 %v5761_v29, %v3492_v38  ;;  %v3645_v7 = vmul.f32 %v5757_v47, %v3499_v60  ;;  %v4269_v38 = vld [vmem:[#allocation6 + $0x190] sm:$0xf] }
 0x1c2   :  { %v2162_v10 = vpop.f32.mrf.mxu2  ;;  %v2116_v23 = vpop.f32.mrf.mxu1 }
 0x1c3   :  { %v5861_v31 = vadd.f32 %v3638_v57, %v3637_v59  ;;  %v2163_v5 = vadd.f32 %v2162_v10, %v2114_v54  ;;  %v5297_v54 = vld [vmem:[#allocation6 + $0x5ac] sm:$0xf0] }
 0x1c4   :  { %v2211_v20 = vpop.f32.mrf.mxu3  ;;  %v2067_v1 = vpop.f32.mrf.mxu0  ;;  %v4782_v10 = vor.u32 %v5297_v54, %v4781_v37  ;;  %v4525_v37 = vld [vmem:[#allocation6 + $0x390] sm:$0xf] }
 0x1c5   :  { %v2068_v33 = vadd.f32 %v2067_v1, %v5744_v55  ;;  %v2212_v53 = vadd.f32 %v2211_v20, %v2163_v5  ;;  %2311 = vmatmul.bf16.gmra.mxu1 %v5650_v21  ;;  %v5169_v5 = vld [vmem:[#allocation6 + $0x1ac] sm:$0xf0] }
 0x1c6   :  { %v5037_v20 = vld [vmem:[#allocation6 + $0x790] sm:$0xf]  ;;  %v4270_v32 = vor.u32 %v5169_v5, %v4269_v38  ;;  %2710 = vmatpush.bf16.msra.mxu2 %v4782_v10  ;;  %v3515_v10 = vmax.f32 %v5747_v2, 0.0 }
 0x1c7   :  { %v2117_v16 = vadd.f32 %v2116_v23, %v2068_v33  ;;  %2262 = vmatmul.bf16.gmra.mxu0 %v5648_v19  ;;  %v3500_v35 = vmax.f32 %v2212_v53, 0.0  ;;  %2360 = vmatmul.bf16.gmra.mxu2 %v5652_v22  ;;  %v3507_v33 = vmax.f32 %v5741_v18, 0.0  ;;  %v5038_v60 = vor.u32 %v5361_v17, %v5037_v20  ;;  %v5233_v54 = vld [vmem:[#allocation6 + $0x3ac] sm:$0xf0] }
 0x1c8   :  { %2612 = vmatpush.bf16.msra.mxu0 %v4270_v32  ;;  %v6649_v32 = vld [vmem:[#allocation18_spill] sm:$0xff] }
 0x1c9   :  { %2409 = vmatmul.bf16.gmra.mxu3 %v6646_v3  ;;  %v3646_v1 = vmul.f32 %v5761_v29, %v3500_v35  ;;  %v5875_v35 = vld [vmem:[#allocation8] sm:$0xff] }
 0x1ca   :  { %v2165_v6 = vpop.f32.mrf.mxu2  ;;  %v2118_v57 = vpop.f32.mrf.mxu1  ;;  %2759 = vmatpush.bf16.msra.mxu3 %v5038_v60  ;;  %v3661_v60 = vmul.f32 %v5757_v47, %v3515_v10 }
 0x1cb   :  { %v5871_v0 = vadd.f32 %v3646_v1, %v3645_v7  ;;  %v2166_v61 = vadd.f32 %v2165_v6, %v2117_v16  ;;  %v5878_v7 = vperm.slane %v5875_v35, 2 }
 0x1cc   :  { %v2214_v36 = vpop.f32.mrf.mxu3  ;;  %v2069_v28 = vpop.f32.mrf.mxu0 }
 0x1cd   :  { %v2070_v59 = vadd.f32 %v2069_v28, %v5744_v55  ;;  %v2215_v23 = vadd.f32 %v2214_v36, %v2166_v61  ;;  %v3653_v55 = vmul.f32 %v5757_v47, %v3507_v33  ;;  %v6647_v33 = vld [vmem:[#allocation16_spill] sm:$0xff]  ;;  %v6651_v47 = vld [vmem:[#allocation30_spill] sm:$0xff] }
 0x1ce   :  { %v5896_v10 = vperm.slane %v6651_v47, 2 }
 0x1cf   :  { %v2119_v53 = vadd.f32 %v2118_v57, %v2070_v59  ;;  %v3508_v16 = vmax.f32 %v2215_v23, 0.0  ;;  %v4526_v57 = vor.u32 %v5233_v54, %v4525_v37  ;;  %v6648_v23 = vld [vmem:[#allocation17_spill] sm:$0xff] }
 0x1d1   :  { %v3654_v1 = vmul.f32 %v5761_v29, %v3508_v16  ;;  %2661 = vmatpush.bf16.msra.mxu1 %v4526_v57  ;;  %v5005_v57 = vld [vmem:[#allocation6 + $0x750] sm:$0xf] }
 0x1d2   :  { %v2167_v6 = vpop.f32.mrf.mxu2  ;;  %v2277_v59 = vpop.f32.mrf.mxu1 }
 0x1d3   :  { %v5882_v28 = vadd.f32 %v3654_v1, %v3653_v55  ;;  %v2168_v18 = vadd.f32 %v2167_v6, %v2119_v53 }
 0x1d4   :  { %v2216_v61 = vpop.f32.mrf.mxu3  ;;  %v2228_v36 = vpop.f32.mrf.mxu0 }
 0x1d5   :  { %v2229_v38 = vadd.f32 %v2228_v36, %v5878_v7  ;;  %v2217_v5 = vadd.f32 %v2216_v61, %v2168_v18  ;;  %2472 = vmatmul.bf16.vlgmr.msrb.gmra.mxu1 %v6647_v33  ;;  %v4749_v18 = vld [vmem:[#allocation6 + $0x550] sm:$0xf] }
 0x1d6   :  { %v5289_v61 = vld [vmem:[#allocation6 + $0x56c] sm:$0xf0] }
 0x1d7   :  { %v2278_v20 = vadd.f32 %v2277_v59, %v2229_v38  ;;  %2423 = vmatmul.bf16.vlgmr.msrb.gmra.mxu0 %v5564_v48  ;;  %v3516_v17 = vmax.f32 %v2217_v5, 0.0  ;;  %2521 = vmatmul.bf16.vlgmr.msrb.gmra.mxu2 %v6648_v23  ;;  %v4237_v36 = vld [vmem:[#allocation6 + $0x150] sm:$0xf]  ;;  %v4750_v38 = vor.u32 %v5289_v61, %v4749_v18 }
 0x1d8   :  { %v5161_v59 = vld [vmem:[#allocation6 + $0x16c] sm:$0xf0] }
 0x1d9   :  { %2570 = vmatmul.bf16.vlgmr.msrb.gmra.mxu3 %v6649_v32  ;;  %v3662_v53 = vmul.f32 %v5761_v29, %v3516_v17  ;;  %v5353_v5 = vld [vmem:[#allocation6 + $0x76c] sm:$0xf0]  ;;  %v4238_v29 = vor.u32 %v5161_v59, %v4237_v36  ;;  %2711 = vmatpush.bf16.msra.mxu2 %v4750_v38 }
 0x1da   :  { %v2326_v16 = vpop.f32.mrf.mxu2  ;;  %v2279_v54 = vpop.f32.mrf.mxu1  ;;  %v5006_v17 = vor.u32 %v5353_v5, %v5005_v57  ;;  %v6653_v5 = vld [vmem:[#allocation31_spill] sm:$0xff] }
 0x1db   :  { %v5892_v55 = vadd.f32 %v3662_v53, %v3661_v60  ;;  %v2327_v2 = vadd.f32 %v2326_v16, %v2278_v20  ;;  %2613 = vmatpush.bf16.msra.mxu0 %v4238_v29 }
 0x1dc   :  { %v2375_v1 = vpop.f32.mrf.mxu3  ;;  %v2230_v6 = vpop.f32.mrf.mxu0  ;;  %2760 = vmatpush.bf16.msra.mxu3 %v5006_v17 }
 0x1dd   :  { %6650 = vst [vmem:[#allocation29_spill] sm:$0xff] %v5892_v55  ;;  %v2231_v37 = vadd.f32 %v2230_v6, %v5878_v7  ;;  %v2376_v32 = vadd.f32 %v2375_v1, %v2327_v2  ;;  %v4493_v2 = vld [vmem:[#allocation6 + $0x350] sm:$0xf] }
 0x1de   :  { %v5225_v1 = vld [vmem:[#allocation6 + $0x36c] sm:$0xf0] }
 0x1df   :  { %v2280_v60 = vadd.f32 %v2279_v54, %v2231_v37  ;;  %v3397_v20 = vmax.f32 %v2376_v32, 0.0  ;;  %v4494_v59 = vor.u32 %v5225_v1, %v4493_v2  ;;  %v5153_v1 = vld [vmem:[#allocation6 + $0x12c] sm:$0xf0] }
 0x1e1   :  { %v3543_v53 = vmul.f32 %v5896_v10, %v3397_v20  ;;  %2662 = vmatpush.bf16.msra.mxu1 %v4494_v59  ;;  %v4717_v20 = vld [vmem:[#allocation6 + $0x510] sm:$0xf] }
 0x1e2   :  { %v2328_v16 = vpop.f32.mrf.mxu2  ;;  %v2282_v36 = vpop.f32.mrf.mxu1 }
 0x1e3   :  { %v5900_v6 = vadd.f32 %v5765_v30, %v3543_v53  ;;  %v2329_v18 = vadd.f32 %v2328_v16, %v2280_v60  ;;  %v6652_v30 = vld [vmem:[#allocation22_spill] sm:$0xff]  ;;  %v5281_v53 = vld [vmem:[#allocation6 + $0x52c] sm:$0xf0] }
 0x1e4   :  { %v2377_v61 = vpop.f32.mrf.mxu3  ;;  %v2233_v55 = vpop.f32.mrf.mxu0  ;;  %v4205_v16 = vld [vmem:[#allocation6 + $0x110] sm:$0xf]  ;;  %v4718_v2 = vor.u32 %v5281_v53, %v4717_v20 }
 0x1e5   :  { %v2234_v47 = vadd.f32 %v2233_v55, %v5878_v7  ;;  %v2378_v37 = vadd.f32 %v2377_v61, %v2329_v18  ;;  %2477 = vmatmul.bf16.gmra.mxu1 %v5578_v25  ;;  %v4461_v53 = vld [vmem:[#allocation6 + $0x310] sm:$0xf] }
 0x1e6   :  { %2712 = vmatpush.bf16.msra.mxu2 %v4718_v2 }
 0x1e7   :  { %v2283_v54 = vadd.f32 %v2282_v36, %v2234_v47  ;;  %2428 = vmatmul.bf16.gmra.mxu0 %v5576_v24  ;;  %v3405_v32 = vmax.f32 %v2378_v37, 0.0  ;;  %2526 = vmatmul.bf16.gmra.mxu2 %v5580_v26  ;;  %v4973_v47 = vld [vmem:[#allocation6 + $0x710] sm:$0xf]  ;;  %v4206_v37 = vor.u32 %v5153_v1, %v4205_v16 }
 0x1e8   :  { %v5345_v36 = vld [vmem:[#allocation6 + $0x72c] sm:$0xf0] }
 0x1e9   :  { %2575 = vmatmul.bf16.gmra.mxu3 %v6652_v30  ;;  %v3551_v38 = vmul.f32 %v5896_v10, %v3405_v32  ;;  %v4974_v32 = vor.u32 %v5345_v36, %v4973_v47  ;;  %2614 = vmatpush.bf16.msra.mxu0 %v4206_v37  ;;  %v5217_v26 = vld [vmem:[#allocation6 + $0x32c] sm:$0xf0] }
 0x1ea   :  { %v2331_v57 = vpop.f32.mrf.mxu2  ;;  %v2284_v61 = vpop.f32.mrf.mxu1  ;;  %v4462_v16 = vor.u32 %v5217_v26, %v4461_v53  ;;  %v4685_v36 = vld [vmem:[#allocation6 + $0x4d0] sm:$0xf] }
 0x1eb   :  { %v5909_v29 = vadd.f32 %v6653_v5, %v3551_v38  ;;  %v2332_v55 = vadd.f32 %v2331_v57, %v2283_v54  ;;  %2761 = vmatpush.bf16.msra.mxu3 %v4974_v32  ;;  %v4173_v37 = vld [vmem:[#allocation6 + $0xd0] sm:$0xf] }
 0x1ec   :  { %v2380_v17 = vpop.f32.mrf.mxu3  ;;  %v2235_v60 = vpop.f32.mrf.mxu0  ;;  %2663 = vmatpush.bf16.msra.mxu1 %v4462_v16 }
 0x1ed   :  { %6654 = vst [vmem:[#allocation16_spill] sm:$0xff] %v5909_v29  ;;  %v2236_v18 = vadd.f32 %v2235_v60, %v5878_v7  ;;  %v2381_v59 = vadd.f32 %v2380_v17, %v2332_v55 }
 0x1ef   :  { %v2285_v30 = vadd.f32 %v2284_v61, %v2236_v18  ;;  %v3413_v38 = vmax.f32 %v2381_v59, 0.0  ;;  %v5273_v59 = vld [vmem:[#allocation6 + $0x4ec] sm:$0xf0] }
 0x1f1   :  { %v3559_v54 = vmul.f32 %v5896_v10, %v3413_v38 }
 0x1f2   :  { %v2333_v57 = vpop.f32.mrf.mxu2  ;;  %v2287_v17 = vpop.f32.mrf.mxu1 }
 0x1f3   :  { %v5914_v5 = vadd.f32 %v5781_v11, %v3559_v54  ;;  %v2334_v60 = vadd.f32 %v2333_v57, %v2285_v30  ;;  %v4686_v54 = vor.u32 %v5273_v59, %v4685_v36  ;;  %v5145_v57 = vld [vmem:[#allocation6 + $0xec] sm:$0xf0] }
 0x1f4   :  { %v2382_v29 = vpop.f32.mrf.mxu3  ;;  %v2238_v20 = vpop.f32.mrf.mxu0  ;;  %v4429_v36 = vld [vmem:[#allocation6 + $0x2d0] sm:$0xf] }
 0x1f5   :  { %v2239_v55 = vadd.f32 %v2238_v20, %v5878_v7  ;;  %v2383_v18 = vadd.f32 %v2382_v29, %v2334_v60  ;;  %2482 = vmatmul.bf16.gmra.mxu1 %v5590_v50  ;;  %v4941_v60 = vld [vmem:[#allocation6 + $0x6d0] sm:$0xf]  ;;  %2713 = vmatpush.bf16.msra.mxu2 %v4686_v54 }
 0x1f6   :  { %v5337_v20 = vld [vmem:[#allocation6 + $0x6ec] sm:$0xf0] }
 0x1f7   :  { %v2288_v61 = vadd.f32 %v2287_v17, %v2239_v55  ;;  %2433 = vmatmul.bf16.gmra.mxu0 %v5588_v49  ;;  %v3421_v2 = vmax.f32 %v2383_v18, 0.0  ;;  %2531 = vmatmul.bf16.gmra.mxu2 %v5592_v51  ;;  %v4174_v55 = vor.u32 %v5145_v57, %v4173_v37  ;;  %v4942_v17 = vor.u32 %v5337_v20, %v4941_v60  ;;  %v5209_v59 = vld [vmem:[#allocation6 + $0x2ec] sm:$0xf0] }
 0x1f8   :  { %v4430_v37 = vor.u32 %v5209_v59, %v4429_v36  ;;  %v5329_v36 = vld [vmem:[#allocation6 + $0x6ac] sm:$0xf0] }
 0x1f9   :  { %2580 = vmatmul.bf16.gmra.mxu3 %v5594_v52  ;;  %v3567_v11 = vmul.f32 %v5896_v10, %v3421_v2  ;;  %2615 = vmatpush.bf16.msra.mxu0 %v4174_v55 }
 0x1fa   :  { %v2336_v30 = vpop.f32.mrf.mxu2  ;;  %v2289_v38 = vpop.f32.mrf.mxu1  ;;  %2762 = vmatpush.bf16.msra.mxu3 %v4942_v17  ;;  %2664 = vmatpush.bf16.msra.mxu1 %v4430_v37  ;;  %v4653_v17 = vld [vmem:[#allocation6 + $0x490] sm:$0xf] }
 0x1fb   :  { %v5923_v1 = vadd.f32 %v5791_v27, %v3567_v11  ;;  %v2337_v47 = vadd.f32 %v2336_v30, %v2288_v61 }
 0x1fc   :  { %v2385_v26 = vpop.f32.mrf.mxu3  ;;  %v2240_v29 = vpop.f32.mrf.mxu0 }
 0x1fd   :  { %v2241_v32 = vadd.f32 %v2240_v29, %v5878_v7  ;;  %v2386_v53 = vadd.f32 %v2385_v26, %v2337_v47 }
 0x1ff   :  { %v2290_v16 = vadd.f32 %v2289_v38, %v2241_v32  ;;  %v3429_v27 = vmax.f32 %v2386_v53, 0.0 }
 0x201   :  { %v3575_v18 = vmul.f32 %v5896_v10, %v3429_v27  ;;  %v4141_v27 = vld [vmem:[#allocation6 + $0x90] sm:$0xf] }
 0x202   :  { %v2338_v61 = vpop.f32.mrf.mxu2  ;;  %v2292_v26 = vpop.f32.mrf.mxu1 }
 0x203   :  { %v5928_v2 = vadd.f32 %v5797_v46, %v3575_v18  ;;  %v2339_v11 = vadd.f32 %v2338_v61, %v2290_v16  ;;  %v5265_v16 = vld [vmem:[#allocation6 + $0x4ac] sm:$0xf0] }
 0x204   :  { %v2387_v30 = vpop.f32.mrf.mxu3  ;;  %v2243_v29 = vpop.f32.mrf.mxu0 }
 0x205   :  { %v2244_v47 = vadd.f32 %v2243_v29, %v5878_v7  ;;  %v2388_v32 = vadd.f32 %v2387_v30, %v2339_v11  ;;  %2487 = vmatmul.bf16.gmra.mxu1 %v5602_v13  ;;  %v4654_v11 = vor.u32 %v5265_v16, %v4653_v17  ;;  %v5137_v30 = vld [vmem:[#allocation6 + $0xac] sm:$0xf0] }
 0x206   :  { %v4909_v29 = vld [vmem:[#allocation6 + $0x690] sm:$0xf] }
 0x207   :  { %v2293_v38 = vadd.f32 %v2292_v26, %v2244_v47  ;;  %2438 = vmatmul.bf16.gmra.mxu0 %v5600_v12  ;;  %v3437_v54 = vmax.f32 %v2388_v32, 0.0  ;;  %2536 = vmatmul.bf16.gmra.mxu2 %v5604_v14  ;;  %v4142_v47 = vor.u32 %v5137_v30, %v4141_v27  ;;  %v4910_v26 = vor.u32 %v5329_v36, %v4909_v29  ;;  %v4397_v17 = vld [vmem:[#allocation6 + $0x290] sm:$0xf] }
 0x208   :  { %2714 = vmatpush.bf16.msra.mxu2 %v4654_v11  ;;  %v5201_v16 = vld [vmem:[#allocation6 + $0x2ac] sm:$0xf0] }
 0x209   :  { %2585 = vmatmul.bf16.gmra.mxu3 %v5606_v15  ;;  %v3583_v46 = vmul.f32 %v5896_v10, %v3437_v54  ;;  %2616 = vmatpush.bf16.msra.mxu0 %v4142_v47  ;;  %v4398_v27 = vor.u32 %v5201_v16, %v4397_v17  ;;  %v5321_v17 = vld [vmem:[#allocation6 + $0x66c] sm:$0xf0] }
 0x20a   :  { %v2341_v57 = vpop.f32.mrf.mxu2  ;;  %v2294_v61 = vpop.f32.mrf.mxu1  ;;  %2763 = vmatpush.bf16.msra.mxu3 %v4910_v26  ;;  %v4621_v26 = vld [vmem:[#allocation6 + $0x450] sm:$0xf] }
 0x20b   :  { %v5937_v60 = vadd.f32 %v5807_v58, %v3583_v46  ;;  %v2342_v20 = vadd.f32 %v2341_v57, %v2293_v38  ;;  %2665 = vmatpush.bf16.msra.mxu1 %v4398_v27 }
 0x20c   :  { %v2390_v53 = vpop.f32.mrf.mxu3  ;;  %v2245_v55 = vpop.f32.mrf.mxu0 }
 0x20d   :  { %v2246_v18 = vadd.f32 %v2245_v55, %v5878_v7  ;;  %v2391_v59 = vadd.f32 %v2390_v53, %v2342_v20 }
 0x20f   :  { %v2295_v37 = vadd.f32 %v2294_v61, %v2246_v18  ;;  %v3445_v58 = vmax.f32 %v2391_v59, 0.0 }
 0x211   :  { %v3591_v32 = vmul.f32 %v5896_v10, %v3445_v58  ;;  %v4109_v58 = vld [vmem:[#allocation6 + $0x50] sm:$0xf] }
 0x212   :  { %v2343_v38 = vpop.f32.mrf.mxu2  ;;  %v2297_v53 = vpop.f32.mrf.mxu1 }
 0x213   :  { %v5942_v54 = vadd.f32 %v5813_v63, %v3591_v32  ;;  %v2344_v46 = vadd.f32 %v2343_v38, %v2295_v37  ;;  %v5257_v37 = vld [vmem:[#allocation6 + $0x46c] sm:$0xf0] }
 0x214   :  { %v2392_v57 = vpop.f32.mrf.mxu3  ;;  %v2248_v55 = vpop.f32.mrf.mxu0 }
 0x215   :  { %v2249_v20 = vadd.f32 %v2248_v55, %v5878_v7  ;;  %v2393_v18 = vadd.f32 %v2392_v57, %v2344_v46  ;;  %2492 = vmatmul.bf16.gmra.mxu1 %v5614_v41  ;;  %v4622_v46 = vor.u32 %v5257_v37, %v4621_v26  ;;  %v5129_v57 = vld [vmem:[#allocation6 + $0x6c] sm:$0xf0] }
 0x216   :  { %v4877_v55 = vld [vmem:[#allocation6 + $0x650] sm:$0xf] }
 0x217   :  { %v2298_v61 = vadd.f32 %v2297_v53, %v2249_v20  ;;  %2443 = vmatmul.bf16.gmra.mxu0 %v5612_v40  ;;  %v3453_v11 = vmax.f32 %v2393_v18, 0.0  ;;  %2541 = vmatmul.bf16.gmra.mxu2 %v5616_v42  ;;  %v4110_v20 = vor.u32 %v5129_v57, %v4109_v58  ;;  %v4878_v53 = vor.u32 %v5321_v17, %v4877_v55  ;;  %v4365_v26 = vld [vmem:[#allocation6 + $0x250] sm:$0xf] }
 0x218   :  { %2715 = vmatpush.bf16.msra.mxu2 %v4622_v46  ;;  %v5193_v37 = vld [vmem:[#allocation6 + $0x26c] sm:$0xf0] }
 0x219   :  { %2590 = vmatmul.bf16.gmra.mxu3 %v5618_v43  ;;  %v3599_v63 = vmul.f32 %v5896_v10, %v3453_v11  ;;  %2617 = vmatpush.bf16.msra.mxu0 %v4110_v20  ;;  %v4366_v58 = vor.u32 %v5193_v37, %v4365_v26  ;;  %v6656_v17 = vld [vmem:[#allocation32_spill] sm:$0xff] }
 0x21a   :  { %v2346_v30 = vpop.f32.mrf.mxu2  ;;  %v2299_v38 = vpop.f32.mrf.mxu1  ;;  %2764 = vmatpush.bf16.msra.mxu3 %v4878_v53  ;;  %v5121_v26 = vld [vmem:[#allocation6 + $0x2c] sm:$0xf0] }
 0x21b   :  { %v5951_v29 = vadd.f32 %v5823_v56, %v3599_v63  ;;  %v2347_v36 = vadd.f32 %v2346_v30, %v2298_v61  ;;  %2666 = vmatpush.bf16.msra.mxu1 %v4366_v58  ;;  %v4845_v37 = vld [vmem:[#allocation6 + $0x610] sm:$0xf] }
 0x21c   :  { %v2395_v59 = vpop.f32.mrf.mxu3  ;;  %v2250_v47 = vpop.f32.mrf.mxu0 }
 0x21d   :  { %v2251_v32 = vadd.f32 %v2250_v47, %v5878_v7  ;;  %v2396_v16 = vadd.f32 %v2395_v59, %v2347_v36 }
 0x21f   :  { %v2300_v27 = vadd.f32 %v2299_v38, %v2251_v32  ;;  %v3461_v56 = vmax.f32 %v2396_v16, 0.0 }
 0x221   :  { %v3607_v18 = vmul.f32 %v5896_v10, %v3461_v56  ;;  %v4589_v56 = vld [vmem:[#allocation6 + $0x410] sm:$0xf] }
 0x222   :  { %v2348_v61 = vpop.f32.mrf.mxu2  ;;  %v2302_v59 = vpop.f32.mrf.mxu1 }
 0x223   :  { %v5956_v11 = vadd.f32 %v5829_v62, %v3607_v18  ;;  %v2349_v63 = vadd.f32 %v2348_v61, %v2300_v27  ;;  %v6655_v62 = vld [vmem:[#allocation26_spill] sm:$0xff]  ;;  %v5249_v18 = vld [vmem:[#allocation6 + $0x42c] sm:$0xf0] }
 0x224   :  { %v2397_v30 = vpop.f32.mrf.mxu3  ;;  %v2253_v47 = vpop.f32.mrf.mxu0  ;;  %v4077_v61 = vld [vmem:[#allocation6 + $0x10] sm:$0xf] }
 0x225   :  { %v2254_v36 = vadd.f32 %v2253_v47, %v5878_v7  ;;  %v2398_v32 = vadd.f32 %v2397_v30, %v2349_v63  ;;  %2497 = vmatmul.bf16.gmra.mxu1 %v5626_v9  ;;  %v4590_v47 = vor.u32 %v5249_v18, %v4589_v56  ;;  %v4078_v58 = vor.u32 %v5121_v26, %v4077_v61 }
 0x227   :  { %v2303_v38 = vadd.f32 %v2302_v59, %v2254_v36  ;;  %2448 = vmatmul.bf16.gmra.mxu0 %v5624_v8  ;;  %v3469_v46 = vmax.f32 %v2398_v32, 0.0  ;;  %2546 = vmatmul.bf16.gmra.mxu2 %v6640_v4  ;;  %v5313_v36 = vld [vmem:[#allocation6 + $0x62c] sm:$0xf0] }
 0x228   :  { %v4846_v32 = vor.u32 %v5313_v36, %v4845_v37  ;;  %2716 = vmatpush.bf16.msra.mxu2 %v4590_v47  ;;  %2618 = vmatpush.bf16.msra.mxu0 %v4078_v58  ;;  %v6658_v47 = vld [vmem:[#allocation28_spill] sm:$0xff]  ;;  %v6659_v37 = vld [vmem:[#allocation27_spill] sm:$0xff] }
 0x229   :  { %2595 = vmatmul.bf16.gmra.mxu3 %v6655_v62  ;;  %v3615_v57 = vmul.f32 %v5896_v10, %v3469_v46  ;;  %v4815_v58 = vld [vmem:[#allocation6 + $0x5f0] sm:$0xf0] }
 0x22a   :  { %v2351_v55 = vpop.f32.mrf.mxu2  ;;  %v2304_v30 = vpop.f32.mrf.mxu1  ;;  %2765 = vmatpush.bf16.msra.mxu3 %v4846_v32  ;;  %v5173_v32 = vld [vmem:[#allocation6 + $0x1d4] sm:$0xf] }
 0x22b   :  { %v5965_v16 = vadd.f32 %v6656_v17, %v3615_v57  ;;  %v2352_v20 = vadd.f32 %v2351_v55, %v2303_v38  ;;  %v4333_v17 = vld [vmem:[#allocation6 + $0x210] sm:$0xf] }
 0x22c   :  { %v2400_v53 = vpop.f32.mrf.mxu3  ;;  %v2255_v27 = vpop.f32.mrf.mxu0 }
 0x22d   :  { %6657 = vst [vmem:[#allocation17_spill] sm:$0xff] %v5965_v16  ;;  %v2256_v63 = vadd.f32 %v2255_v27, %v5878_v7  ;;  %v2401_v59 = vadd.f32 %v2400_v53, %v2352_v20  ;;  %v5185_v16 = vld [vmem:[#allocation6 + $0x22c] sm:$0xf0] }
 0x22e   :  { %v4334_v4 = vor.u32 %v5185_v16, %v4333_v17  ;;  %v5365_v17 = vld [vmem:[#allocation6 + $0x7d4] sm:$0xf] }
 0x22f   :  { %v2305_v46 = vadd.f32 %v2304_v30, %v2256_v63  ;;  %v3477_v57 = vmax.f32 %v2401_v59, 0.0 }
 0x230   :  { %2667 = vmatpush.bf16.msra.mxu1 %v4334_v4  ;;  %v5301_v4 = vld [vmem:[#allocation6 + $0x5d4] sm:$0xf] }
 0x231   :  { %v3623_v38 = vmul.f32 %v5896_v10, %v3477_v57 }
 0x232   :  { %v2353_v55 = vpop.f32.mrf.mxu2  ;;  %v2307_v53 = vpop.f32.mrf.mxu1 }
 0x233   :  { %v5970_v27 = vadd.f32 %v5845_v34, %v3623_v38  ;;  %v2354_v56 = vadd.f32 %v2353_v55, %v2305_v46  ;;  %v4818_v38 = vor.u32 %v5301_v4, %v4815_v58  ;;  %v4303_v55 = vld [vmem:[#allocation6 + $0x1f0] sm:$0xf0] }
 0x234   :  { %v2402_v18 = vpop.f32.mrf.mxu3  ;;  %v2258_v62 = vpop.f32.mrf.mxu0  ;;  %v5237_v58 = vld [vmem:[#allocation6 + $0x3d4] sm:$0xf] }
 0x235   :  { %v2259_v20 = vadd.f32 %v2258_v62, %v5878_v7  ;;  %v2403_v61 = vadd.f32 %v2402_v18, %v2354_v56  ;;  %2502 = vmatmul.bf16.gmra.mxu1 %v5638_v45  ;;  %v5071_v56 = vld [vmem:[#allocation6 + $0x7f0] sm:$0xf0]  ;;  %2905 = vmatpush.bf16.msrb.mxu2 %v4818_v38 }
 0x237   :  { %v2308_v63 = vadd.f32 %v2307_v53, %v2259_v20  ;;  %2453 = vmatmul.bf16.gmra.mxu0 %v5636_v44  ;;  %v3485_v30 = vmax.f32 %v2403_v61, 0.0  ;;  %2551 = vmatmul.bf16.gmra.mxu2 %v6643_v39  ;;  %v4306_v20 = vor.u32 %v5173_v32, %v4303_v55  ;;  %v5074_v53 = vor.u32 %v5365_v17, %v5071_v56 }
 0x239   :  { %2600 = vmatmul.bf16.gmra.mxu3 %v6658_v47  ;;  %v3631_v34 = vmul.f32 %v5896_v10, %v3485_v30  ;;  %2807 = vmatpush.bf16.msrb.mxu0 %v4306_v20  ;;  %v5293_v20 = vld [vmem:[#allocation6 + $0x594] sm:$0xf] }
 0x23a   :  { %v2356_v26 = vpop.f32.mrf.mxu2  ;;  %v2309_v57 = vpop.f32.mrf.mxu1  ;;  %2954 = vmatpush.bf16.msrb.mxu3 %v5074_v53  ;;  %v4783_v53 = vld [vmem:[#allocation6 + $0x5b0] sm:$0xf0] }
 0x23b   :  { %v5979_v16 = vadd.f32 %v6659_v37, %v3631_v34  ;;  %v2357_v62 = vadd.f32 %v2356_v26, %v2308_v63 }
 0x23c   :  { %v2405_v36 = vpop.f32.mrf.mxu3  ;;  %v2260_v59 = vpop.f32.mrf.mxu0 }
 0x23d   :  { %6660 = vst [vmem:[#allocation30_spill] sm:$0xff] %v5979_v16  ;;  %v2261_v46 = vadd.f32 %v2260_v59, %v5878_v7  ;;  %v2406_v18 = vadd.f32 %v2405_v36, %v2357_v62  ;;  %v4559_v16 = vld [vmem:[#allocation6 + $0x3f0] sm:$0xf0] }
 0x23e   :  { %v4562_v32 = vor.u32 %v5237_v58, %v4559_v16 }
 0x23f   :  { %v2310_v61 = vadd.f32 %v2309_v57, %v2261_v46  ;;  %v3493_v30 = vmax.f32 %v2406_v18, 0.0 }
 0x240   :  { %2856 = vmatpush.bf16.msrb.mxu1 %v4562_v32 }
 0x241   :  { %v3639_v63 = vmul.f32 %v5896_v10, %v3493_v30 }
 0x242   :  { %v2358_v34 = vpop.f32.mrf.mxu2  ;;  %v2312_v36 = vpop.f32.mrf.mxu1 }
 0x243   :  { %v5984_v26 = vadd.f32 %v5861_v31, %v3639_v63  ;;  %v2359_v37 = vadd.f32 %v2358_v34, %v2310_v61  ;;  %v5165_v61 = vld [vmem:[#allocation6 + $0x194] sm:$0xf]  ;;  %v4786_v34 = vor.u32 %v5293_v20, %v4783_v53 }
 0x244   :  { %v2407_v59 = vpop.f32.mrf.mxu3  ;;  %v2263_v4 = vpop.f32.mrf.mxu0 }
 0x245   :  { %v2264_v62 = vadd.f32 %v2263_v4, %v5878_v7  ;;  %v2408_v46 = vadd.f32 %v2407_v59, %v2359_v37  ;;  %2507 = vmatmul.bf16.gmra.mxu1 %v5650_v21  ;;  %v4271_v37 = vld [vmem:[#allocation6 + $0x1b0] sm:$0xf0]  ;;  %2906 = vmatpush.bf16.msrb.mxu2 %v4786_v34 }
 0x246   :  { %v5357_v59 = vld [vmem:[#allocation6 + $0x794] sm:$0xf] }
 0x247   :  { %v2313_v57 = vadd.f32 %v2312_v36, %v2264_v62  ;;  %2458 = vmatmul.bf16.gmra.mxu0 %v5648_v19  ;;  %v3501_v38 = vmax.f32 %v2408_v46, 0.0  ;;  %2556 = vmatmul.bf16.gmra.mxu2 %v5652_v22  ;;  %v5039_v4 = vld [vmem:[#allocation6 + $0x7b0] sm:$0xf0]  ;;  %v4274_v62 = vor.u32 %v5165_v61, %v4271_v37  ;;  %v5997_v46 = vperm.slane %v5875_v35, 3 }
 0x248   :  { %v5042_v36 = vor.u32 %v5357_v59, %v5039_v4  ;;  %v6662_v59 = vld [vmem:[#allocation29_spill] sm:$0xff] }
 0x249   :  { %2605 = vmatmul.bf16.gmra.mxu3 %v6646_v3  ;;  %v3647_v31 = vmul.f32 %v5896_v10, %v3501_v38  ;;  %2808 = vmatpush.bf16.msrb.mxu0 %v4274_v62 }
 0x24a   :  { %v2361_v55 = vpop.f32.mrf.mxu2  ;;  %v2314_v63 = vpop.f32.mrf.mxu1  ;;  %2955 = vmatpush.bf16.msrb.mxu3 %v5042_v36 }
 0x24b   :  { %v5993_v17 = vadd.f32 %v5871_v0, %v3647_v31  ;;  %v2362_v56 = vadd.f32 %v2361_v55, %v2313_v57 }
 0x24c   :  { %v2410_v16 = vpop.f32.mrf.mxu3  ;;  %v2265_v18 = vpop.f32.mrf.mxu0 }
 0x24d   :  { %v2266_v30 = vadd.f32 %v2265_v18, %v5878_v7  ;;  %v2411_v58 = vadd.f32 %v2410_v16, %v2362_v56  ;;  %v5229_v56 = vld [vmem:[#allocation6 + $0x394] sm:$0xf] }
 0x24e   :  { %v4527_v16 = vld [vmem:[#allocation6 + $0x3b0] sm:$0xf0] }
 0x24f   :  { %v2315_v32 = vadd.f32 %v2314_v63, %v2266_v30  ;;  %v3509_v0 = vmax.f32 %v2411_v58, 0.0  ;;  %v4530_v61 = vor.u32 %v5229_v56, %v4527_v16  ;;  %v5349_v56 = vld [vmem:[#allocation6 + $0x754] sm:$0xf] }
 0x250   :  { %v5007_v16 = vld [vmem:[#allocation6 + $0x770] sm:$0xf0] }
 0x251   :  { %v3655_v57 = vmul.f32 %v5896_v10, %v3509_v0  ;;  %2857 = vmatpush.bf16.msrb.mxu1 %v4530_v61  ;;  %v4751_v0 = vld [vmem:[#allocation6 + $0x570] sm:$0xf0] }
 0x252   :  { %v2363_v38 = vpop.f32.mrf.mxu2  ;;  %v2473_v53 = vpop.f32.mrf.mxu1 }
 0x253   :  { %v6001_v7 = vadd.f32 %v5882_v28, %v3655_v57  ;;  %v2364_v31 = vadd.f32 %v2363_v38, %v2315_v32  ;;  %v6661_v28 = vld [vmem:[#allocation18_spill] sm:$0xff]  ;;  %v5285_v32 = vld [vmem:[#allocation6 + $0x554] sm:$0xf] }
 0x254   :  { %v2412_v55 = vpop.f32.mrf.mxu3  ;;  %v2424_v18 = vpop.f32.mrf.mxu0  ;;  %v5157_v57 = vld [vmem:[#allocation6 + $0x154] sm:$0xf] }
 0x255   :  { %v2425_v20 = vadd.f32 %v2424_v18, %v5997_v46  ;;  %v2413_v30 = vadd.f32 %v2412_v55, %v2364_v31  ;;  %2668 = vmatmul.bf16.vlgmr.msra.gmra.mxu1 %v6647_v33  ;;  %v4754_v55 = vor.u32 %v5285_v32, %v4751_v0  ;;  %v4239_v18 = vld [vmem:[#allocation6 + $0x170] sm:$0xf0] }
 0x256   :  { %v4242_v61 = vor.u32 %v5157_v57, %v4239_v18  ;;  %v5221_v32 = vld [vmem:[#allocation6 + $0x354] sm:$0xf] }
 0x257   :  { %v2474_v63 = vadd.f32 %v2473_v53, %v2425_v20  ;;  %2619 = vmatmul.bf16.vlgmr.msra.gmra.mxu0 %v5564_v48  ;;  %v3517_v35 = vmax.f32 %v2413_v30, 0.0  ;;  %2717 = vmatmul.bf16.vlgmr.msra.gmra.mxu2 %v6648_v23  ;;  %v6013_v53 = vld [vmem:[#allocation9] sm:$0xff]  ;;  %v5010_v30 = vor.u32 %v5349_v56, %v5007_v16  ;;  %v4495_v0 = vld [vmem:[#allocation6 + $0x370] sm:$0xf0]  ;;  %v6664_v56 = vld [vmem:[#allocation21_spill] sm:$0xff] }
 0x258   :  { %6663 = vst [vmem:[#allocation31_spill] sm:$0xff] %v6013_v53  ;;  %2907 = vmatpush.bf16.msrb.mxu2 %v4754_v55  ;;  %2809 = vmatpush.bf16.msrb.mxu0 %v4242_v61  ;;  %v4498_v18 = vor.u32 %v5221_v32, %v4495_v0  ;;  %v6666_v61 = vld [vmem:[#allocation16_spill] sm:$0xff] }
 0x259   :  { %2766 = vmatmul.bf16.vlgmr.msra.gmra.mxu3 %v6661_v28  ;;  %v3663_v34 = vmul.f32 %v5896_v10, %v3517_v35  ;;  %v6016_v10 = vperm.slane %v6013_v53, 3  ;;  %v4207_v0 = vld [vmem:[#allocation6 + $0x130] sm:$0xf0] }
 0x25a   :  { %v2522_v37 = vpop.f32.mrf.mxu2  ;;  %v2475_v31 = vpop.f32.mrf.mxu1  ;;  %2956 = vmatpush.bf16.msrb.mxu3 %v5010_v30  ;;  %2858 = vmatpush.bf16.msrb.mxu1 %v4498_v18  ;;  %v4975_v18 = vld [vmem:[#allocation6 + $0x730] sm:$0xf0] }
 0x25b   :  { %v6010_v4 = vadd.f32 %v6662_v59, %v3663_v34  ;;  %v2523_v58 = vadd.f32 %v2522_v37, %v2474_v63 }
 0x25c   :  { %v2571_v62 = vpop.f32.mrf.mxu3  ;;  %v2426_v36 = vpop.f32.mrf.mxu0 }
 0x25d   :  { %v2427_v38 = vadd.f32 %v2426_v36, %v5997_v46  ;;  %v2572_v20 = vadd.f32 %v2571_v62, %v2523_v58 }
 0x25f   :  { %v2476_v63 = vadd.f32 %v2475_v31, %v2427_v38  ;;  %v3398_v35 = vmax.f32 %v2572_v20, 0.0 }
 0x261   :  { %v3544_v34 = vmul.f32 %v6016_v10, %v3398_v35 }
 0x262   :  { %v2524_v37 = vpop.f32.mrf.mxu2  ;;  %v2478_v57 = vpop.f32.mrf.mxu1 }
 0x263   :  { %v6020_v59 = vadd.f32 %v5900_v6, %v3544_v34  ;;  %v2525_v36 = vadd.f32 %v2524_v37, %v2476_v63  ;;  %v6665_v6 = vld [vmem:[#allocation22_spill] sm:$0xff]  ;;  %v4719_v37 = vld [vmem:[#allocation6 + $0x530] sm:$0xf0] }
 0x264   :  { %v2573_v58 = vpop.f32.mrf.mxu3  ;;  %v2429_v62 = vpop.f32.mrf.mxu0 }
 0x265   :  { %v2430_v53 = vadd.f32 %v2429_v62, %v5997_v46  ;;  %v2574_v38 = vadd.f32 %v2573_v58, %v2525_v36  ;;  %2673 = vmatmul.bf16.gmra.mxu1 %v5578_v25  ;;  %v5149_v36 = vld [vmem:[#allocation6 + $0x114] sm:$0xf] }
 0x266   :  { %v4463_v25 = vld [vmem:[#allocation6 + $0x330] sm:$0xf0] }
 0x267   :  { %v2479_v31 = vadd.f32 %v2478_v57, %v2430_v53  ;;  %2624 = vmatmul.bf16.gmra.mxu0 %v5576_v24  ;;  %v3406_v55 = vmax.f32 %v2574_v38, 0.0  ;;  %2722 = vmatmul.bf16.gmra.mxu2 %v6664_v56  ;;  %v5277_v53 = vld [vmem:[#allocation6 + $0x514] sm:$0xf] }
 0x268   :  { %v4722_v32 = vor.u32 %v5277_v53, %v4719_v37  ;;  %v5341_v57 = vld [vmem:[#allocation6 + $0x714] sm:$0xf] }
 0x269   :  { %2771 = vmatmul.bf16.gmra.mxu3 %v6665_v6  ;;  %v3552_v16 = vmul.f32 %v6016_v10, %v3406_v55  ;;  %v4210_v6 = vor.u32 %v5149_v36, %v4207_v0  ;;  %v4978_v55 = vor.u32 %v5341_v57, %v4975_v18  ;;  %v5213_v37 = vld [vmem:[#allocation6 + $0x314] sm:$0xf] }
 0x26a   :  { %v2527_v20 = vpop.f32.mrf.mxu2  ;;  %v2480_v62 = vpop.f32.mrf.mxu1  ;;  %2908 = vmatpush.bf16.msrb.mxu2 %v4722_v32  ;;  %v4466_v36 = vor.u32 %v5213_v37, %v4463_v25  ;;  %v5269_v57 = vld [vmem:[#allocation6 + $0x4d4] sm:$0xf] }
 0x26b   :  { %v6029_v30 = vadd.f32 %v6666_v61, %v3552_v16  ;;  %v2528_v63 = vadd.f32 %v2527_v20, %v2479_v31  ;;  %2810 = vmatpush.bf16.msrb.mxu0 %v4210_v6  ;;  %2957 = vmatpush.bf16.msrb.mxu3 %v4978_v55  ;;  %v4687_v18 = vld [vmem:[#allocation6 + $0x4f0] sm:$0xf0] }
 0x26c   :  { %v2576_v35 = vpop.f32.mrf.mxu3  ;;  %v2431_v34 = vpop.f32.mrf.mxu0  ;;  %2859 = vmatpush.bf16.msrb.mxu1 %v4466_v36 }
 0x26d   :  { %6667 = vst [vmem:[#allocation32_spill] sm:$0xff] %v6029_v30  ;;  %v2432_v58 = vadd.f32 %v2431_v34, %v5997_v46  ;;  %v2577_v38 = vadd.f32 %v2576_v35, %v2528_v63 }
 0x26f   :  { %v2481_v56 = vadd.f32 %v2480_v62, %v2432_v58  ;;  %v3414_v16 = vmax.f32 %v2577_v38, 0.0  ;;  %v5141_v38 = vld [vmem:[#allocation6 + $0xd4] sm:$0xf] }
 0x271   :  { %v3560_v31 = vmul.f32 %v6016_v10, %v3414_v16 }
 0x272   :  { %v2529_v20 = vpop.f32.mrf.mxu2  ;;  %v2483_v35 = vpop.f32.mrf.mxu1 }
 0x273   :  { %v6034_v61 = vadd.f32 %v5914_v5, %v3560_v31  ;;  %v2530_v34 = vadd.f32 %v2529_v20, %v2481_v56  ;;  %v4690_v31 = vor.u32 %v5269_v57, %v4687_v18  ;;  %v4175_v20 = vld [vmem:[#allocation6 + $0xf0] sm:$0xf0] }
 0x274   :  { %v2578_v30 = vpop.f32.mrf.mxu3  ;;  %v2434_v53 = vpop.f32.mrf.mxu0  ;;  %v5205_v57 = vld [vmem:[#allocation6 + $0x2d4] sm:$0xf] }
 0x275   :  { %v2435_v63 = vadd.f32 %v2434_v53, %v5997_v46  ;;  %v2579_v58 = vadd.f32 %v2578_v30, %v2530_v34  ;;  %2678 = vmatmul.bf16.gmra.mxu1 %v5590_v50  ;;  %v5333_v34 = vld [vmem:[#allocation6 + $0x6d4] sm:$0xf]  ;;  %2909 = vmatpush.bf16.msrb.mxu2 %v4690_v31 }
 0x276   :  { %v4943_v53 = vld [vmem:[#allocation6 + $0x6f0] sm:$0xf0] }
 0x277   :  { %v2484_v62 = vadd.f32 %v2483_v35, %v2435_v63  ;;  %2629 = vmatmul.bf16.gmra.mxu0 %v5588_v49  ;;  %v3422_v6 = vmax.f32 %v2579_v58, 0.0  ;;  %2727 = vmatmul.bf16.gmra.mxu2 %v5592_v51  ;;  %v4178_v63 = vor.u32 %v5141_v38, %v4175_v20  ;;  %v4946_v35 = vor.u32 %v5333_v34, %v4943_v53  ;;  %v4431_v18 = vld [vmem:[#allocation6 + $0x2f0] sm:$0xf0] }
 0x278   :  { %v4434_v38 = vor.u32 %v5205_v57, %v4431_v18  ;;  %v4911_v57 = vld [vmem:[#allocation6 + $0x6b0] sm:$0xf0] }
 0x279   :  { %2776 = vmatmul.bf16.gmra.mxu3 %v5594_v52  ;;  %v3568_v5 = vmul.f32 %v6016_v10, %v3422_v6  ;;  %2811 = vmatpush.bf16.msrb.mxu0 %v4178_v63 }
 0x27a   :  { %v2532_v56 = vpop.f32.mrf.mxu2  ;;  %v2485_v16 = vpop.f32.mrf.mxu1  ;;  %2958 = vmatpush.bf16.msrb.mxu3 %v4946_v35  ;;  %2860 = vmatpush.bf16.msrb.mxu1 %v4434_v38  ;;  %v5261_v35 = vld [vmem:[#allocation6 + $0x494] sm:$0xf] }
 0x27b   :  { %v6043_v32 = vadd.f32 %v5923_v1, %v3568_v5  ;;  %v2533_v0 = vadd.f32 %v2532_v56, %v2484_v62 }
 0x27c   :  { %v2581_v25 = vpop.f32.mrf.mxu3  ;;  %v2436_v30 = vpop.f32.mrf.mxu0 }
 0x27d   :  { %v2437_v55 = vadd.f32 %v2436_v30, %v5997_v46  ;;  %v2582_v37 = vadd.f32 %v2581_v25, %v2533_v0 }
 0x27f   :  { %v2486_v36 = vadd.f32 %v2485_v16, %v2437_v55  ;;  %v3430_v1 = vmax.f32 %v2582_v37, 0.0 }
 0x281   :  { %v3576_v58 = vmul.f32 %v6016_v10, %v3430_v1  ;;  %v5133_v1 = vld [vmem:[#allocation6 + $0x94] sm:$0xf] }
 0x282   :  { %v2534_v62 = vpop.f32.mrf.mxu2  ;;  %v2488_v25 = vpop.f32.mrf.mxu1 }
 0x283   :  { %v6048_v6 = vadd.f32 %v5928_v2, %v3576_v58  ;;  %v2535_v5 = vadd.f32 %v2534_v62, %v2486_v36  ;;  %v4655_v36 = vld [vmem:[#allocation6 + $0x4b0] sm:$0xf0] }
 0x284   :  { %v2583_v56 = vpop.f32.mrf.mxu3  ;;  %v2439_v30 = vpop.f32.mrf.mxu0 }
 0x285   :  { %v2440_v0 = vadd.f32 %v2439_v30, %v5997_v46  ;;  %v2584_v55 = vadd.f32 %v2583_v56, %v2535_v5  ;;  %2683 = vmatmul.bf16.gmra.mxu1 %v5602_v13  ;;  %v4658_v5 = vor.u32 %v5261_v35, %v4655_v36  ;;  %v4143_v56 = vld [vmem:[#allocation6 + $0xb0] sm:$0xf0] }
 0x286   :  { %v5325_v30 = vld [vmem:[#allocation6 + $0x694] sm:$0xf] }
 0x287   :  { %v2489_v16 = vadd.f32 %v2488_v25, %v2440_v0  ;;  %2634 = vmatmul.bf16.gmra.mxu0 %v5600_v12  ;;  %v3438_v31 = vmax.f32 %v2584_v55, 0.0  ;;  %2732 = vmatmul.bf16.gmra.mxu2 %v5604_v14  ;;  %v4146_v0 = vor.u32 %v5133_v1, %v4143_v56  ;;  %v4914_v25 = vor.u32 %v5325_v30, %v4911_v57  ;;  %v5197_v35 = vld [vmem:[#allocation6 + $0x294] sm:$0xf] }
 0x288   :  { %2910 = vmatpush.bf16.msrb.mxu2 %v4658_v5  ;;  %v4399_v36 = vld [vmem:[#allocation6 + $0x2b0] sm:$0xf0] }
 0x289   :  { %2781 = vmatmul.bf16.gmra.mxu3 %v5606_v15  ;;  %v3584_v2 = vmul.f32 %v6016_v10, %v3438_v31  ;;  %2812 = vmatpush.bf16.msrb.mxu0 %v4146_v0  ;;  %v4402_v1 = vor.u32 %v5197_v35, %v4399_v36  ;;  %v4879_v35 = vld [vmem:[#allocation6 + $0x670] sm:$0xf0] }
 0x28a   :  { %v2537_v20 = vpop.f32.mrf.mxu2  ;;  %v2490_v62 = vpop.f32.mrf.mxu1  ;;  %2959 = vmatpush.bf16.msrb.mxu3 %v4914_v25  ;;  %v5253_v25 = vld [vmem:[#allocation6 + $0x454] sm:$0xf] }
 0x28b   :  { %v6057_v34 = vadd.f32 %v5937_v60, %v3584_v2  ;;  %v2538_v53 = vadd.f32 %v2537_v20, %v2489_v16  ;;  %2861 = vmatpush.bf16.msrb.mxu1 %v4402_v1 }
 0x28c   :  { %v2586_v37 = vpop.f32.mrf.mxu3  ;;  %v2441_v63 = vpop.f32.mrf.mxu0 }
 0x28d   :  { %v2442_v58 = vadd.f32 %v2441_v63, %v5997_v46  ;;  %v2587_v18 = vadd.f32 %v2586_v37, %v2538_v53 }
 0x28f   :  { %v2491_v38 = vadd.f32 %v2490_v62, %v2442_v58  ;;  %v3446_v60 = vmax.f32 %v2587_v18, 0.0 }
 0x291   :  { %v3592_v55 = vmul.f32 %v6016_v10, %v3446_v60  ;;  %v5125_v60 = vld [vmem:[#allocation6 + $0x54] sm:$0xf] }
 0x292   :  { %v2539_v16 = vpop.f32.mrf.mxu2  ;;  %v2493_v37 = vpop.f32.mrf.mxu1 }
 0x293   :  { %v6062_v31 = vadd.f32 %v5942_v54, %v3592_v55  ;;  %v2540_v2 = vadd.f32 %v2539_v16, %v2491_v38  ;;  %v4623_v38 = vld [vmem:[#allocation6 + $0x470] sm:$0xf0] }
 0x294   :  { %v2588_v20 = vpop.f32.mrf.mxu3  ;;  %v2444_v63 = vpop.f32.mrf.mxu0 }
 0x295   :  { %v2445_v53 = vadd.f32 %v2444_v63, %v5997_v46  ;;  %v2589_v58 = vadd.f32 %v2588_v20, %v2540_v2  ;;  %2688 = vmatmul.bf16.gmra.mxu1 %v5614_v41  ;;  %v4626_v2 = vor.u32 %v5253_v25, %v4623_v38  ;;  %v4111_v20 = vld [vmem:[#allocation6 + $0x70] sm:$0xf0] }
 0x296   :  { %v5317_v63 = vld [vmem:[#allocation6 + $0x654] sm:$0xf] }
 0x297   :  { %v2494_v62 = vadd.f32 %v2493_v37, %v2445_v53  ;;  %2639 = vmatmul.bf16.gmra.mxu0 %v5612_v40  ;;  %v3454_v5 = vmax.f32 %v2589_v58, 0.0  ;;  %2737 = vmatmul.bf16.gmra.mxu2 %v5616_v42  ;;  %v4114_v53 = vor.u32 %v5125_v60, %v4111_v20  ;;  %v4882_v37 = vor.u32 %v5317_v63, %v4879_v35  ;;  %v5189_v25 = vld [vmem:[#allocation6 + $0x254] sm:$0xf]  ;;  %v6668_v20 = vld [vmem:[#allocation25_spill] sm:$0xff] }
 0x298   :  { %2911 = vmatpush.bf16.msrb.mxu2 %v4626_v2  ;;  %v4367_v38 = vld [vmem:[#allocation6 + $0x270] sm:$0xf0] }
 0x299   :  { %2786 = vmatmul.bf16.gmra.mxu3 %v5618_v43  ;;  %v3600_v54 = vmul.f32 %v6016_v10, %v3454_v5  ;;  %2813 = vmatpush.bf16.msrb.mxu0 %v4114_v53  ;;  %v4370_v60 = vor.u32 %v5189_v25, %v4367_v38  ;;  %v4079_v38 = vld [vmem:[#allocation6 + $0x30] sm:$0xf0] }
 0x29a   :  { %v2542_v56 = vpop.f32.mrf.mxu2  ;;  %v2495_v16 = vpop.f32.mrf.mxu1  ;;  %2960 = vmatpush.bf16.msrb.mxu3 %v4882_v37 }
 0x29b   :  { %v6071_v30 = vadd.f32 %v5951_v29, %v3600_v54  ;;  %v2543_v57 = vadd.f32 %v2542_v56, %v2494_v62  ;;  %2862 = vmatpush.bf16.msrb.mxu1 %v4370_v60 }
 0x29c   :  { %v2591_v18 = vpop.f32.mrf.mxu3  ;;  %v2446_v0 = vpop.f32.mrf.mxu0 }
 0x29d   :  { %v2447_v55 = vadd.f32 %v2446_v0, %v5997_v46  ;;  %v2592_v36 = vadd.f32 %v2591_v18, %v2543_v57 }
 0x29f   :  { %v2496_v1 = vadd.f32 %v2495_v16, %v2447_v55  ;;  %v3462_v29 = vmax.f32 %v2592_v36, 0.0  ;;  %v6670_v36 = vld [vmem:[#allocation17_spill] sm:$0xff] }
 0x2a1   :  { %v3608_v58 = vmul.f32 %v6016_v10, %v3462_v29 }
 0x2a2   :  { %v2544_v62 = vpop.f32.mrf.mxu2  ;;  %v2498_v18 = vpop.f32.mrf.mxu1 }
 0x2a3   :  { %v6076_v5 = vadd.f32 %v5956_v11, %v3608_v58  ;;  %v2545_v54 = vadd.f32 %v2544_v62, %v2496_v1  ;;  %v6669_v11 = vld [vmem:[#allocation26_spill] sm:$0xff]  ;;  %v5245_v58 = vld [vmem:[#allocation6 + $0x414] sm:$0xf] }
 0x2a4   :  { %v2593_v56 = vpop.f32.mrf.mxu3  ;;  %v2449_v0 = vpop.f32.mrf.mxu0  ;;  %v4591_v62 = vld [vmem:[#allocation6 + $0x430] sm:$0xf0] }
 0x2a5   :  { %v2450_v57 = vadd.f32 %v2449_v0, %v5997_v46  ;;  %v2594_v55 = vadd.f32 %v2593_v56, %v2545_v54  ;;  %2693 = vmatmul.bf16.gmra.mxu1 %v5626_v9  ;;  %v5117_v54 = vld [vmem:[#allocation6 + $0x14] sm:$0xf]  ;;  %v4594_v25 = vor.u32 %v5245_v58, %v4591_v62 }
 0x2a7   :  { %v2499_v16 = vadd.f32 %v2498_v18, %v2450_v57  ;;  %2644 = vmatmul.bf16.gmra.mxu0 %v5624_v8  ;;  %v3470_v2 = vmax.f32 %v2594_v55, 0.0  ;;  %2742 = vmatmul.bf16.gmra.mxu2 %v6668_v20  ;;  %v5309_v57 = vld [vmem:[#allocation6 + $0x614] sm:$0xf]  ;;  %v4082_v55 = vor.u32 %v5117_v54, %v4079_v38 }
 0x2a8   :  { %v4847_v18 = vld [vmem:[#allocation6 + $0x630] sm:$0xf0]  ;;  %2912 = vmatpush.bf16.msrb.mxu2 %v4594_v25  ;;  %v6672_v25 = vld [vmem:[#allocation30_spill] sm:$0xff] }
 0x2a9   :  { %2791 = vmatmul.bf16.gmra.mxu3 %v6669_v11  ;;  %v3616_v63 = vmul.f32 %v6016_v10, %v3470_v2  ;;  %v4850_v2 = vor.u32 %v5309_v57, %v4847_v18  ;;  %2814 = vmatpush.bf16.msrb.mxu0 %v4082_v55  ;;  %v5306_v18 = vld [vmem:[#allocation6 + $0x5f4] sm:$0xf0] }
 0x2aa   :  { %v2547_v35 = vpop.f32.mrf.mxu2  ;;  %v2500_v0 = vpop.f32.mrf.mxu1 }
 0x2ab   :  { %v6085_v53 = vadd.f32 %v6670_v36, %v3616_v63  ;;  %v2548_v37 = vadd.f32 %v2547_v35, %v2499_v16  ;;  %2961 = vmatpush.bf16.msrb.mxu3 %v4850_v2  ;;  %v5181_v36 = vld [vmem:[#allocation6 + $0x214] sm:$0xf] }
 0x2ac   :  { %v2596_v1 = vpop.f32.mrf.mxu3  ;;  %v2451_v29 = vpop.f32.mrf.mxu0 }
 0x2ad   :  { %6671 = vst [vmem:[#allocation28_spill] sm:$0xff] %v6085_v53  ;;  %v2452_v56 = vadd.f32 %v2451_v29, %v5997_v46  ;;  %v2597_v60 = vadd.f32 %v2596_v1, %v2548_v37  ;;  %v4335_v53 = vld [vmem:[#allocation6 + $0x230] sm:$0xf0] }
 0x2ae   :  { %v4338_v9 = vor.u32 %v5181_v36, %v4335_v53  ;;  %v5370_v36 = vld [vmem:[#allocation6 + $0x7f4] sm:$0xf0] }
 0x2af   :  { %v2501_v11 = vadd.f32 %v2500_v0, %v2452_v56  ;;  %v3478_v63 = vmax.f32 %v2597_v60, 0.0  ;;  %v4309_v60 = vld [vmem:[#allocation6 + $0x1d8] sm:$0xf] }
 0x2b0   :  { %2863 = vmatpush.bf16.msrb.mxu1 %v4338_v9  ;;  %v4821_v9 = vld [vmem:[#allocation6 + $0x5d8] sm:$0xf] }
 0x2b1   :  { %v3624_v16 = vmul.f32 %v6016_v10, %v3478_v63  ;;  %v4822_v63 = vor.u32 %v5306_v18, %v4821_v9  ;;  %v4565_v9 = vld [vmem:[#allocation6 + $0x3d8] sm:$0xf] }
 0x2b2   :  { %v2549_v35 = vpop.f32.mrf.mxu2  ;;  %v2503_v1 = vpop.f32.mrf.mxu1  ;;  %v5242_v18 = vld [vmem:[#allocation6 + $0x3f4] sm:$0xf0] }
 0x2b3   :  { %v6090_v29 = vadd.f32 %v5970_v27, %v3624_v16  ;;  %v2550_v58 = vadd.f32 %v2549_v35, %v2501_v11  ;;  %v5178_v16 = vld [vmem:[#allocation6 + $0x1f4] sm:$0xf0]  ;;  %3101 = vmatpush.bf16.msra.mxu2 %v4822_v63 }
 0x2b4   :  { %v2598_v62 = vpop.f32.mrf.mxu3  ;;  %v2454_v20 = vpop.f32.mrf.mxu0  ;;  %v5077_v35 = vld [vmem:[#allocation6 + $0x7d8] sm:$0xf] }
 0x2b5   :  { %v2455_v37 = vadd.f32 %v2454_v20, %v5997_v46  ;;  %v2599_v54 = vadd.f32 %v2598_v62, %v2550_v58  ;;  %2698 = vmatmul.bf16.gmra.mxu1 %v5638_v45  ;;  %v4310_v62 = vor.u32 %v5178_v16, %v4309_v60  ;;  %v4566_v60 = vor.u32 %v5242_v18, %v4565_v9  ;;  %v5362_v9 = vld [vmem:[#allocation6 + $0x7b4] sm:$0xf0] }
 0x2b7   :  { %v2504_v56 = vadd.f32 %v2503_v1, %v2455_v37  ;;  %2649 = vmatmul.bf16.gmra.mxu0 %v5636_v44  ;;  %v3486_v0 = vmax.f32 %v2599_v54, 0.0  ;;  %2747 = vmatmul.bf16.gmra.mxu2 %v6643_v39  ;;  %v5078_v37 = vor.u32 %v5370_v36, %v5077_v35 }
 0x2b8   :  { %3003 = vmatpush.bf16.msra.mxu0 %v4310_v62  ;;  %3052 = vmatpush.bf16.msra.mxu1 %v4566_v60 }
 0x2b9   :  { %2796 = vmatmul.bf16.gmra.mxu3 %v6658_v47  ;;  %v3632_v27 = vmul.f32 %v6016_v10, %v3486_v0 }
 0x2ba   :  { %v2552_v11 = vpop.f32.mrf.mxu2  ;;  %v2505_v2 = vpop.f32.mrf.mxu1  ;;  %3150 = vmatpush.bf16.msra.mxu3 %v5078_v37  ;;  %v4789_v37 = vld [vmem:[#allocation6 + $0x598] sm:$0xf] }
 0x2bb   :  { %v6099_v53 = vadd.f32 %v6672_v25, %v3632_v27  ;;  %v2553_v20 = vadd.f32 %v2552_v11, %v2504_v56 }
 0x2bc   :  { %v2601_v38 = vpop.f32.mrf.mxu3  ;;  %v2456_v57 = vpop.f32.mrf.mxu0 }
 0x2bd   :  { %v2457_v55 = vadd.f32 %v2456_v57, %v5997_v46  ;;  %v2602_v58 = vadd.f32 %v2601_v38, %v2553_v20 }
 0x2bf   :  { %v2506_v1 = vadd.f32 %v2505_v2, %v2457_v55  ;;  %v3494_v54 = vmax.f32 %v2602_v58, 0.0 }
 0x2c1   :  { %v3640_v56 = vmul.f32 %v6016_v10, %v3494_v54  ;;  %v4277_v54 = vld [vmem:[#allocation6 + $0x198] sm:$0xf] }
 0x2c2   :  { %v2554_v0 = vpop.f32.mrf.mxu2  ;;  %v2508_v38 = vpop.f32.mrf.mxu1 }
 0x2c3   :  { %v6104_v27 = vadd.f32 %v5984_v26, %v3640_v56  ;;  %v2555_v11 = vadd.f32 %v2554_v0, %v2506_v1  ;;  %v5298_v1 = vld [vmem:[#allocation6 + $0x5b4] sm:$0xf0] }
 0x2c4   :  { %v2603_v25 = vpop.f32.mrf.mxu3  ;;  %v2459_v57 = vpop.f32.mrf.mxu0 }
 0x2c5   :  { %v2460_v20 = vadd.f32 %v2459_v57, %v5997_v46  ;;  %v2604_v55 = vadd.f32 %v2603_v25, %v2555_v11  ;;  %2703 = vmatmul.bf16.gmra.mxu1 %v5650_v21  ;;  %v4790_v11 = vor.u32 %v5298_v1, %v4789_v37  ;;  %v5170_v25 = vld [vmem:[#allocation6 + $0x1b4] sm:$0xf0] }
 0x2c6   :  { %v5045_v57 = vld [vmem:[#allocation6 + $0x798] sm:$0xf] }
 0x2c7   :  { %v2509_v2 = vadd.f32 %v2508_v38, %v2460_v20  ;;  %2654 = vmatmul.bf16.gmra.mxu0 %v5648_v19  ;;  %v3502_v63 = vmax.f32 %v2604_v55, 0.0  ;;  %2752 = vmatmul.bf16.gmra.mxu2 %v5652_v22  ;;  %v4278_v20 = vor.u32 %v5170_v25, %v4277_v54  ;;  %v5046_v38 = vor.u32 %v5362_v9, %v5045_v57  ;;  %v6116_v55 = vld [vmem:[#allocation8] sm:$0xff]  ;;  %v5234_v37 = vld [vmem:[#allocation6 + $0x3b4] sm:$0xf0] }
 0x2c8   :  { %3102 = vmatpush.bf16.msra.mxu2 %v4790_v11 }
 0x2c9   :  { %2801 = vmatmul.bf16.gmra.mxu3 %v6646_v3  ;;  %v3648_v26 = vmul.f32 %v6016_v10, %v3502_v63  ;;  %3004 = vmatpush.bf16.msra.mxu0 %v4278_v20 }
 0x2ca   :  { %v2557_v16 = vpop.f32.mrf.mxu2  ;;  %v2510_v0 = vpop.f32.mrf.mxu1  ;;  %3151 = vmatpush.bf16.msra.mxu3 %v5046_v38 }
 0x2cb   :  { %v6113_v35 = vadd.f32 %v5993_v17, %v3648_v26  ;;  %v2558_v36 = vadd.f32 %v2557_v16, %v2509_v2  ;;  %v6119_v2 = vperm.slane %v6116_v55, 4 }
 0x2cc   :  { %v2606_v58 = vpop.f32.mrf.mxu3  ;;  %v2461_v62 = vpop.f32.mrf.mxu0 }
 0x2cd   :  { %v2462_v56 = vadd.f32 %v2461_v62, %v5997_v46  ;;  %v2607_v18 = vadd.f32 %v2606_v58, %v2558_v36  ;;  %v4533_v62 = vld [vmem:[#allocation6 + $0x398] sm:$0xf] }
 0x2cf   :  { %v2511_v60 = vadd.f32 %v2510_v0, %v2462_v56  ;;  %v3510_v17 = vmax.f32 %v2607_v18, 0.0  ;;  %v4534_v56 = vor.u32 %v5234_v37, %v4533_v62  ;;  %v5013_v62 = vld [vmem:[#allocation6 + $0x758] sm:$0xf] }
 0x2d0   :  { %v5354_v37 = vld [vmem:[#allocation6 + $0x774] sm:$0xf0] }
 0x2d1   :  { %v3656_v46 = vmul.f32 %v6016_v10, %v3510_v17  ;;  %3053 = vmatpush.bf16.msra.mxu1 %v4534_v56  ;;  %v5290_v17 = vld [vmem:[#allocation6 + $0x574] sm:$0xf0] }
 0x2d2   :  { %v2559_v63 = vpop.f32.mrf.mxu2  ;;  %v2669_v54 = vpop.f32.mrf.mxu1 }
 0x2d3   :  { %v6123_v26 = vadd.f32 %v6001_v7, %v3656_v46  ;;  %v2560_v16 = vadd.f32 %v2559_v63, %v2511_v60  ;;  %v4757_v60 = vld [vmem:[#allocation6 + $0x558] sm:$0xf] }
 0x2d4   :  { %v2608_v36 = vpop.f32.mrf.mxu3  ;;  %v2620_v58 = vpop.f32.mrf.mxu0  ;;  %v4245_v46 = vld [vmem:[#allocation6 + $0x158] sm:$0xf] }
 0x2d5   :  { %v2621_v1 = vadd.f32 %v2620_v58, %v6119_v2  ;;  %v2609_v0 = vadd.f32 %v2608_v36, %v2560_v16  ;;  %2864 = vmatmul.bf16.vlgmr.msrb.gmra.mxu1 %v6647_v33  ;;  %v4758_v36 = vor.u32 %v5290_v17, %v4757_v60  ;;  %v5162_v58 = vld [vmem:[#allocation6 + $0x174] sm:$0xf0] }
 0x2d6   :  { %v4246_v56 = vor.u32 %v5162_v58, %v4245_v46 }
 0x2d7   :  { %v2670_v11 = vadd.f32 %v2669_v54, %v2621_v1  ;;  %2815 = vmatmul.bf16.vlgmr.msrb.gmra.mxu0 %v5564_v48  ;;  %v3518_v25 = vmax.f32 %v2609_v0, 0.0  ;;  %2913 = vmatmul.bf16.vlgmr.msrb.gmra.mxu2 %v6648_v23  ;;  %v6673_v54 = vld [vmem:[#allocation31_spill] sm:$0xff] }
 0x2d8   :  { %3103 = vmatpush.bf16.msra.mxu2 %v4758_v36  ;;  %3005 = vmatpush.bf16.msra.mxu0 %v4246_v56 }
 0x2d9   :  { %2962 = vmatmul.bf16.vlgmr.msrb.gmra.mxu3 %v6661_v28  ;;  %v3664_v7 = vmul.f32 %v6016_v10, %v3518_v25  ;;  %v6136_v10 = vperm.slane %v6673_v54, 4 }
 0x2da   :  { %v2718_v57 = vpop.f32.mrf.mxu2  ;;  %v2671_v16 = vpop.f32.mrf.mxu1 }
 0x2db   :  { %v6132_v9 = vadd.f32 %v6010_v4, %v3664_v7  ;;  %v2719_v18 = vadd.f32 %v2718_v57, %v2670_v11  ;;  %v5014_v4 = vor.u32 %v5354_v37, %v5013_v62  ;;  %v6674_v62 = vld [vmem:[#allocation20_spill] sm:$0xff]  ;;  %v6675_v37 = vld [vmem:[#allocation21_spill] sm:$0xff] }
 0x2dc   :  { %v2767_v20 = vpop.f32.mrf.mxu3  ;;  %v2622_v38 = vpop.f32.mrf.mxu0 }
 0x2dd   :  { %v2623_v63 = vadd.f32 %v2622_v38, %v6119_v2  ;;  %v2768_v1 = vadd.f32 %v2767_v20, %v2719_v18  ;;  %3152 = vmatpush.bf16.msra.mxu3 %v5014_v4  ;;  %v4501_v18 = vld [vmem:[#allocation6 + $0x358] sm:$0xf] }
 0x2de   :  { %v5226_v20 = vld [vmem:[#allocation6 + $0x374] sm:$0xf0] }
 0x2df   :  { %v2672_v0 = vadd.f32 %v2671_v16, %v2623_v63  ;;  %v3399_v11 = vmax.f32 %v2768_v1, 0.0  ;;  %v4502_v58 = vor.u32 %v5226_v20, %v4501_v18  ;;  %v6677_v4 = vld [vmem:[#allocation32_spill] sm:$0xff] }
 0x2e1   :  { %v3545_v25 = vmul.f32 %v6136_v10, %v3399_v11  ;;  %3054 = vmatpush.bf16.msra.mxu1 %v4502_v58  ;;  %v4981_v58 = vld [vmem:[#allocation6 + $0x718] sm:$0xf] }
 0x2e2   :  { %v2720_v7 = vpop.f32.mrf.mxu2  ;;  %v2674_v46 = vpop.f32.mrf.mxu1 }
 0x2e3   :  { %v6140_v57 = vadd.f32 %v6020_v59, %v3545_v25  ;;  %v2721_v38 = vadd.f32 %v2720_v7, %v2672_v0  ;;  %v6676_v59 = vld [vmem:[#allocation22_spill] sm:$0xff] }
 0x2e4   :  { %v2769_v60 = vpop.f32.mrf.mxu3  ;;  %v2625_v17 = vpop.f32.mrf.mxu0 }
 0x2e5   :  { %v2626_v54 = vadd.f32 %v2625_v17, %v6119_v2  ;;  %v2770_v63 = vadd.f32 %v2769_v60, %v2721_v38  ;;  %2869 = vmatmul.bf16.gmra.mxu1 %v6674_v62  ;;  %v4725_v38 = vld [vmem:[#allocation6 + $0x518] sm:$0xf] }
 0x2e6   :  { %v5282_v60 = vld [vmem:[#allocation6 + $0x534] sm:$0xf0] }
 0x2e7   :  { %v2675_v16 = vadd.f32 %v2674_v46, %v2626_v54  ;;  %2820 = vmatmul.bf16.gmra.mxu0 %v5576_v24  ;;  %v3407_v36 = vmax.f32 %v2770_v63, 0.0  ;;  %2918 = vmatmul.bf16.gmra.mxu2 %v6675_v37  ;;  %v4213_v17 = vld [vmem:[#allocation6 + $0x118] sm:$0xf]  ;;  %v4726_v54 = vor.u32 %v5282_v60, %v4725_v38 }
 0x2e8   :  { %v5154_v46 = vld [vmem:[#allocation6 + $0x134] sm:$0xf0] }
 0x2e9   :  { %2967 = vmatmul.bf16.gmra.mxu3 %v6676_v59  ;;  %v3553_v1 = vmul.f32 %v6136_v10, %v3407_v36  ;;  %v5346_v63 = vld [vmem:[#allocation6 + $0x734] sm:$0xf0]  ;;  %v4214_v37 = vor.u32 %v5154_v46, %v4213_v17  ;;  %3104 = vmatpush.bf16.msra.mxu2 %v4726_v54 }
 0x2ea   :  { %v2723_v56 = vpop.f32.mrf.mxu2  ;;  %v2676_v20 = vpop.f32.mrf.mxu1  ;;  %v4982_v36 = vor.u32 %v5346_v63, %v4981_v58  ;;  %v4469_v60 = vld [vmem:[#allocation6 + $0x318] sm:$0xf] }
 0x2eb   :  { %v6149_v0 = vadd.f32 %v6677_v4, %v3553_v1  ;;  %v2724_v11 = vadd.f32 %v2723_v56, %v2675_v16  ;;  %3006 = vmatpush.bf16.msra.mxu0 %v4214_v37  ;;  %v5218_v24 = vld [vmem:[#allocation6 + $0x334] sm:$0xf0] }
 0x2ec   :  { %v2772_v25 = vpop.f32.mrf.mxu3  ;;  %v2627_v7 = vpop.f32.mrf.mxu0  ;;  %3153 = vmatpush.bf16.msra.mxu3 %v4982_v36  ;;  %v4470_v17 = vor.u32 %v5218_v24, %v4469_v60  ;;  %v4693_v46 = vld [vmem:[#allocation6 + $0x4d8] sm:$0xf] }
 0x2ed   :  { %6678 = vst [vmem:[#allocation27_spill] sm:$0xff] %v6149_v0  ;;  %v2628_v18 = vadd.f32 %v2627_v7, %v6119_v2  ;;  %v2773_v59 = vadd.f32 %v2772_v25, %v2724_v11  ;;  %v5274_v58 = vld [vmem:[#allocation6 + $0x4f4] sm:$0xf0] }
 0x2ee   :  { %3055 = vmatpush.bf16.msra.mxu1 %v4470_v17  ;;  %v4181_v63 = vld [vmem:[#allocation6 + $0xd8] sm:$0xf] }
 0x2ef   :  { %v2677_v62 = vadd.f32 %v2676_v20, %v2628_v18  ;;  %v3415_v1 = vmax.f32 %v2773_v59, 0.0 }
 0x2f1   :  { %v3561_v16 = vmul.f32 %v6136_v10, %v3415_v1 }
 0x2f2   :  { %v2725_v56 = vpop.f32.mrf.mxu2  ;;  %v2679_v25 = vpop.f32.mrf.mxu1 }
 0x2f3   :  { %v6154_v4 = vadd.f32 %v6034_v61, %v3561_v16  ;;  %v2726_v7 = vadd.f32 %v2725_v56, %v2677_v62  ;;  %v4694_v16 = vor.u32 %v5274_v58, %v4693_v46  ;;  %v5146_v56 = vld [vmem:[#allocation6 + $0xf4] sm:$0xf0] }
 0x2f4   :  { %v2774_v0 = vpop.f32.mrf.mxu3  ;;  %v2630_v38 = vpop.f32.mrf.mxu0  ;;  %v4437_v46 = vld [vmem:[#allocation6 + $0x2d8] sm:$0xf] }
 0x2f5   :  { %v2631_v11 = vadd.f32 %v2630_v38, %v6119_v2  ;;  %v2775_v18 = vadd.f32 %v2774_v0, %v2726_v7  ;;  %2874 = vmatmul.bf16.gmra.mxu1 %v5590_v50  ;;  %v4949_v7 = vld [vmem:[#allocation6 + $0x6d8] sm:$0xf]  ;;  %3105 = vmatpush.bf16.msra.mxu2 %v4694_v16 }
 0x2f6   :  { %v5338_v38 = vld [vmem:[#allocation6 + $0x6f4] sm:$0xf0] }
 0x2f7   :  { %v2680_v20 = vadd.f32 %v2679_v25, %v2631_v11  ;;  %2825 = vmatmul.bf16.gmra.mxu0 %v5588_v49  ;;  %v3423_v37 = vmax.f32 %v2775_v18, 0.0  ;;  %2923 = vmatmul.bf16.gmra.mxu2 %v5592_v51  ;;  %v4182_v11 = vor.u32 %v5146_v56, %v4181_v63  ;;  %v4950_v25 = vor.u32 %v5338_v38, %v4949_v7  ;;  %v5210_v58 = vld [vmem:[#allocation6 + $0x2f4] sm:$0xf0] }
 0x2f8   :  { %v4438_v63 = vor.u32 %v5210_v58, %v4437_v46  ;;  %v5330_v46 = vld [vmem:[#allocation6 + $0x6b4] sm:$0xf0] }
 0x2f9   :  { %2972 = vmatmul.bf16.gmra.mxu3 %v5594_v52  ;;  %v3569_v61 = vmul.f32 %v6136_v10, %v3423_v37  ;;  %3007 = vmatpush.bf16.msra.mxu0 %v4182_v11 }
 0x2fa   :  { %v2728_v62 = vpop.f32.mrf.mxu2  ;;  %v2681_v1 = vpop.f32.mrf.mxu1  ;;  %3154 = vmatpush.bf16.msra.mxu3 %v4950_v25  ;;  %3056 = vmatpush.bf16.msra.mxu1 %v4438_v63  ;;  %v4661_v25 = vld [vmem:[#allocation6 + $0x498] sm:$0xf] }
 0x2fb   :  { %v6163_v59 = vadd.f32 %v6043_v32, %v3569_v61  ;;  %v2729_v54 = vadd.f32 %v2728_v62, %v2680_v20 }
 0x2fc   :  { %v2777_v24 = vpop.f32.mrf.mxu3  ;;  %v2632_v0 = vpop.f32.mrf.mxu0 }
 0x2fd   :  { %v2633_v36 = vadd.f32 %v2632_v0, %v6119_v2  ;;  %v2778_v60 = vadd.f32 %v2777_v24, %v2729_v54 }
 0x2ff   :  { %v2682_v17 = vadd.f32 %v2681_v1, %v2633_v36  ;;  %v3431_v32 = vmax.f32 %v2778_v60, 0.0 }
 0x301   :  { %v3577_v18 = vmul.f32 %v6136_v10, %v3431_v32  ;;  %v4149_v32 = vld [vmem:[#allocation6 + $0x98] sm:$0xf] }
 0x302   :  { %v2730_v20 = vpop.f32.mrf.mxu2  ;;  %v2684_v24 = vpop.f32.mrf.mxu1 }
 0x303   :  { %v6168_v37 = vadd.f32 %v6048_v6, %v3577_v18  ;;  %v2731_v61 = vadd.f32 %v2730_v20, %v2682_v17  ;;  %v5266_v17 = vld [vmem:[#allocation6 + $0x4b4] sm:$0xf0] }
 0x304   :  { %v2779_v62 = vpop.f32.mrf.mxu3  ;;  %v2635_v0 = vpop.f32.mrf.mxu0 }
 0x305   :  { %v2636_v54 = vadd.f32 %v2635_v0, %v6119_v2  ;;  %v2780_v36 = vadd.f32 %v2779_v62, %v2731_v61  ;;  %2879 = vmatmul.bf16.gmra.mxu1 %v5602_v13  ;;  %v4662_v61 = vor.u32 %v5266_v17, %v4661_v25  ;;  %v5138_v62 = vld [vmem:[#allocation6 + $0xb4] sm:$0xf0] }
 0x306   :  { %v4917_v0 = vld [vmem:[#allocation6 + $0x698] sm:$0xf] }
 0x307   :  { %v2685_v1 = vadd.f32 %v2684_v24, %v2636_v54  ;;  %2830 = vmatmul.bf16.gmra.mxu0 %v5600_v12  ;;  %v3439_v16 = vmax.f32 %v2780_v36, 0.0  ;;  %2928 = vmatmul.bf16.gmra.mxu2 %v5604_v14  ;;  %v4150_v54 = vor.u32 %v5138_v62, %v4149_v32  ;;  %v4918_v24 = vor.u32 %v5330_v46, %v4917_v0  ;;  %v4405_v25 = vld [vmem:[#allocation6 + $0x298] sm:$0xf] }
 0x308   :  { %3106 = vmatpush.bf16.msra.mxu2 %v4662_v61  ;;  %v5202_v17 = vld [vmem:[#allocation6 + $0x2b4] sm:$0xf0] }
 0x309   :  { %2977 = vmatmul.bf16.gmra.mxu3 %v5606_v15  ;;  %v3585_v6 = vmul.f32 %v6136_v10, %v3439_v16  ;;  %3008 = vmatpush.bf16.msra.mxu0 %v4150_v54  ;;  %v4406_v32 = vor.u32 %v5202_v17, %v4405_v25  ;;  %v5322_v25 = vld [vmem:[#allocation6 + $0x674] sm:$0xf0] }
 0x30a   :  { %v2733_v56 = vpop.f32.mrf.mxu2  ;;  %v2686_v20 = vpop.f32.mrf.mxu1  ;;  %3155 = vmatpush.bf16.msra.mxu3 %v4918_v24  ;;  %v4629_v24 = vld [vmem:[#allocation6 + $0x458] sm:$0xf] }
 0x30b   :  { %v6177_v7 = vadd.f32 %v6057_v34, %v3585_v6  ;;  %v2734_v38 = vadd.f32 %v2733_v56, %v2685_v1  ;;  %3057 = vmatpush.bf16.msra.mxu1 %v4406_v32 }
 0x30c   :  { %v2782_v60 = vpop.f32.mrf.mxu3  ;;  %v2637_v11 = vpop.f32.mrf.mxu0 }
 0x30d   :  { %v2638_v18 = vadd.f32 %v2637_v11, %v6119_v2  ;;  %v2783_v58 = vadd.f32 %v2782_v60, %v2734_v38 }
 0x30f   :  { %v2687_v63 = vadd.f32 %v2686_v20, %v2638_v18  ;;  %v3447_v34 = vmax.f32 %v2783_v58, 0.0 }
 0x311   :  { %v3593_v36 = vmul.f32 %v6136_v10, %v3447_v34  ;;  %v4117_v34 = vld [vmem:[#allocation6 + $0x58] sm:$0xf] }
 0x312   :  { %v2735_v1 = vpop.f32.mrf.mxu2  ;;  %v2689_v60 = vpop.f32.mrf.mxu1 }
 0x313   :  { %v6182_v16 = vadd.f32 %v6062_v31, %v3593_v36  ;;  %v2736_v6 = vadd.f32 %v2735_v1, %v2687_v63  ;;  %v5258_v63 = vld [vmem:[#allocation6 + $0x474] sm:$0xf0] }
 0x314   :  { %v2784_v56 = vpop.f32.mrf.mxu3  ;;  %v2640_v11 = vpop.f32.mrf.mxu0 }
 0x315   :  { %v2641_v38 = vadd.f32 %v2640_v11, %v6119_v2  ;;  %v2785_v18 = vadd.f32 %v2784_v56, %v2736_v6  ;;  %2884 = vmatmul.bf16.gmra.mxu1 %v5614_v41  ;;  %v4630_v6 = vor.u32 %v5258_v63, %v4629_v24  ;;  %v5130_v56 = vld [vmem:[#allocation6 + $0x74] sm:$0xf0] }
 0x316   :  { %v4885_v11 = vld [vmem:[#allocation6 + $0x658] sm:$0xf] }
 0x317   :  { %v2690_v20 = vadd.f32 %v2689_v60, %v2641_v38  ;;  %2835 = vmatmul.bf16.gmra.mxu0 %v5612_v40  ;;  %v3455_v61 = vmax.f32 %v2785_v18, 0.0  ;;  %2933 = vmatmul.bf16.gmra.mxu2 %v5616_v42  ;;  %v4118_v38 = vor.u32 %v5130_v56, %v4117_v34  ;;  %v4886_v60 = vor.u32 %v5322_v25, %v4885_v11  ;;  %v4373_v24 = vld [vmem:[#allocation6 + $0x258] sm:$0xf] }
 0x318   :  { %3107 = vmatpush.bf16.msra.mxu2 %v4630_v6  ;;  %v5194_v63 = vld [vmem:[#allocation6 + $0x274] sm:$0xf0] }
 0x319   :  { %2982 = vmatmul.bf16.gmra.mxu3 %v5618_v43  ;;  %v3601_v31 = vmul.f32 %v6136_v10, %v3455_v61  ;;  %3009 = vmatpush.bf16.msra.mxu0 %v4118_v38  ;;  %v4374_v34 = vor.u32 %v5194_v63, %v4373_v24  ;;  %v6679_v56 = vld [vmem:[#allocation24_spill] sm:$0xff]  ;;  %v6680_v11 = vld [vmem:[#allocation25_spill] sm:$0xff] }
 0x31a   :  { %v2738_v62 = vpop.f32.mrf.mxu2  ;;  %v2691_v1 = vpop.f32.mrf.mxu1  ;;  %3156 = vmatpush.bf16.msra.mxu3 %v4886_v60  ;;  %v6682_v38 = vld [vmem:[#allocation28_spill] sm:$0xff] }
 0x31b   :  { %v6191_v0 = vadd.f32 %v6071_v30, %v3601_v31  ;;  %v2739_v46 = vadd.f32 %v2738_v62, %v2690_v20  ;;  %3058 = vmatpush.bf16.msra.mxu1 %v4374_v34  ;;  %v5314_v34 = vld [vmem:[#allocation6 + $0x634] sm:$0xf0] }
 0x31c   :  { %v2787_v58 = vpop.f32.mrf.mxu3  ;;  %v2642_v54 = vpop.f32.mrf.mxu0 }
 0x31d   :  { %v2643_v36 = vadd.f32 %v2642_v54, %v6119_v2  ;;  %v2788_v17 = vadd.f32 %v2787_v58, %v2739_v46 }
 0x31f   :  { %v2692_v32 = vadd.f32 %v2691_v1, %v2643_v36  ;;  %v3463_v30 = vmax.f32 %v2788_v17, 0.0 }
 0x321   :  { %v3609_v18 = vmul.f32 %v6136_v10, %v3463_v30 }
 0x322   :  { %v2740_v20 = vpop.f32.mrf.mxu2  ;;  %v2694_v58 = vpop.f32.mrf.mxu1 }
 0x323   :  { %v6196_v61 = vadd.f32 %v6076_v5, %v3609_v18  ;;  %v2741_v31 = vadd.f32 %v2740_v20, %v2692_v32  ;;  %v6681_v5 = vld [vmem:[#allocation26_spill] sm:$0xff]  ;;  %v4597_v20 = vld [vmem:[#allocation6 + $0x418] sm:$0xf] }
 0x324   :  { %v2789_v62 = vpop.f32.mrf.mxu3  ;;  %v2645_v54 = vpop.f32.mrf.mxu0 }
 0x325   :  { %v2646_v46 = vadd.f32 %v2645_v54, %v6119_v2  ;;  %v2790_v36 = vadd.f32 %v2789_v62, %v2741_v31  ;;  %2889 = vmatmul.bf16.gmra.mxu1 %v6679_v56  ;;  %v5250_v31 = vld [vmem:[#allocation6 + $0x434] sm:$0xf0] }
 0x326   :  { %v4085_v62 = vld [vmem:[#allocation6 + $0x18] sm:$0xf]  ;;  %v4598_v63 = vor.u32 %v5250_v31, %v4597_v20 }
 0x327   :  { %v2695_v1 = vadd.f32 %v2694_v58, %v2646_v46  ;;  %2840 = vmatmul.bf16.gmra.mxu0 %v5624_v8  ;;  %v3471_v6 = vmax.f32 %v2790_v36, 0.0  ;;  %2938 = vmatmul.bf16.gmra.mxu2 %v6680_v11  ;;  %v5122_v46 = vld [vmem:[#allocation6 + $0x34] sm:$0xf0] }
 0x328   :  { %v4853_v58 = vld [vmem:[#allocation6 + $0x618] sm:$0xf]  ;;  %3108 = vmatpush.bf16.msra.mxu2 %v4598_v63 }
 0x329   :  { %2987 = vmatmul.bf16.gmra.mxu3 %v6681_v5  ;;  %v3617_v25 = vmul.f32 %v6136_v10, %v3471_v6  ;;  %v4086_v5 = vor.u32 %v5122_v46, %v4085_v62  ;;  %v4854_v6 = vor.u32 %v5314_v34, %v4853_v58  ;;  %v4823_v46 = vld [vmem:[#allocation6 + $0x5f8] sm:$0xf0] }
 0x32a   :  { %v2743_v17 = vpop.f32.mrf.mxu2  ;;  %v2696_v24 = vpop.f32.mrf.mxu1  ;;  %v5174_v58 = vld [vmem:[#allocation6 + $0x1dc] sm:$0xf] }
 0x32b   :  { %v6205_v60 = vadd.f32 %v6682_v38, %v3617_v25  ;;  %v2744_v32 = vadd.f32 %v2743_v17, %v2695_v1  ;;  %3010 = vmatpush.bf16.msra.mxu0 %v4086_v5  ;;  %3157 = vmatpush.bf16.msra.mxu3 %v4854_v6  ;;  %v4341_v38 = vld [vmem:[#allocation6 + $0x218] sm:$0xf] }
 0x32c   :  { %v2792_v30 = vpop.f32.mrf.mxu3  ;;  %v2647_v18 = vpop.f32.mrf.mxu0 }
 0x32d   :  { %6683 = vst [vmem:[#allocation18_spill] sm:$0xff] %v6205_v60  ;;  %v2648_v54 = vadd.f32 %v2647_v18, %v6119_v2  ;;  %v2793_v36 = vadd.f32 %v2792_v30, %v2744_v32  ;;  %v5186_v60 = vld [vmem:[#allocation6 + $0x234] sm:$0xf0] }
 0x32e   :  { %v4342_v8 = vor.u32 %v5186_v60, %v4341_v38 }
 0x32f   :  { %v2697_v11 = vadd.f32 %v2696_v24, %v2648_v54  ;;  %v3479_v25 = vmax.f32 %v2793_v36, 0.0 }
 0x330   :  { %3059 = vmatpush.bf16.msra.mxu1 %v4342_v8  ;;  %v5302_v8 = vld [vmem:[#allocation6 + $0x5dc] sm:$0xf] }
 0x331   :  { %v3625_v1 = vmul.f32 %v6136_v10, %v3479_v25  ;;  %v4826_v6 = vor.u32 %v5302_v8, %v4823_v46  ;;  %v4311_v25 = vld [vmem:[#allocation6 + $0x1f8] sm:$0xf0] }
 0x332   :  { %v2745_v17 = vpop.f32.mrf.mxu2  ;;  %v2699_v30 = vpop.f32.mrf.mxu1 }
 0x333   :  { %v6210_v18 = vadd.f32 %v6090_v29, %v3625_v1  ;;  %v2746_v20 = vadd.f32 %v2745_v17, %v2697_v11  ;;  %v5366_v1 = vld [vmem:[#allocation6 + $0x7dc] sm:$0xf]  ;;  %3297 = vmatpush.bf16.msrb.mxu2 %v4826_v6 }
 0x334   :  { %v2794_v31 = vpop.f32.mrf.mxu3  ;;  %v2650_v56 = vpop.f32.mrf.mxu0  ;;  %v5079_v17 = vld [vmem:[#allocation6 + $0x7f8] sm:$0xf0] }
 0x335   :  { %v2651_v32 = vadd.f32 %v2650_v56, %v6119_v2  ;;  %v2795_v62 = vadd.f32 %v2794_v31, %v2746_v20  ;;  %2894 = vmatmul.bf16.gmra.mxu1 %v5638_v45  ;;  %v4314_v20 = vor.u32 %v5174_v58, %v4311_v25  ;;  %v5082_v31 = vor.u32 %v5366_v1, %v5079_v17  ;;  %v5294_v6 = vld [vmem:[#allocation6 + $0x59c] sm:$0xf] }
 0x336   :  { %v4791_v25 = vld [vmem:[#allocation6 + $0x5b8] sm:$0xf0] }
 0x337   :  { %v2700_v54 = vadd.f32 %v2699_v30, %v2651_v32  ;;  %2845 = vmatmul.bf16.gmra.mxu0 %v5636_v44  ;;  %v3487_v5 = vmax.f32 %v2795_v62, 0.0  ;;  %2943 = vmatmul.bf16.gmra.mxu2 %v6643_v39  ;;  %v5238_v62 = vld [vmem:[#allocation6 + $0x3dc] sm:$0xf] }
 0x338   :  { %3199 = vmatpush.bf16.msrb.mxu0 %v4314_v20  ;;  %3346 = vmatpush.bf16.msrb.mxu3 %v5082_v31  ;;  %v5166_v1 = vld [vmem:[#allocation6 + $0x19c] sm:$0xf] }
 0x339   :  { %2992 = vmatmul.bf16.gmra.mxu3 %v6658_v47  ;;  %v3633_v29 = vmul.f32 %v6136_v10, %v3487_v5  ;;  %v4279_v20 = vld [vmem:[#allocation6 + $0x1b8] sm:$0xf0] }
 0x33a   :  { %v2748_v11 = vpop.f32.mrf.mxu2  ;;  %v2701_v36 = vpop.f32.mrf.mxu1  ;;  %v5358_v31 = vld [vmem:[#allocation6 + $0x79c] sm:$0xf] }
 0x33b   :  { %v6219_v60 = vadd.f32 %v6099_v53, %v3633_v29  ;;  %v2749_v56 = vadd.f32 %v2748_v11, %v2700_v54  ;;  %v4567_v54 = vld [vmem:[#allocation6 + $0x3f8] sm:$0xf0] }
 0x33c   :  { %v2797_v24 = vpop.f32.mrf.mxu3  ;;  %v2652_v63 = vpop.f32.mrf.mxu0  ;;  %v4570_v29 = vor.u32 %v5238_v62, %v4567_v54 }
 0x33d   :  { %v2653_v34 = vadd.f32 %v2652_v63, %v6119_v2  ;;  %v2798_v38 = vadd.f32 %v2797_v24, %v2749_v56 }
 0x33e   :  { %3248 = vmatpush.bf16.msrb.mxu1 %v4570_v29 }
 0x33f   :  { %v2702_v32 = vadd.f32 %v2701_v36, %v2653_v34  ;;  %v3495_v53 = vmax.f32 %v2798_v38, 0.0  ;;  %v4794_v38 = vor.u32 %v5294_v6, %v4791_v25 }
 0x341   :  { %v3641_v30 = vmul.f32 %v6136_v10, %v3495_v53  ;;  %3298 = vmatpush.bf16.msrb.mxu2 %v4794_v38 }
 0x342   :  { %v2750_v5 = vpop.f32.mrf.mxu2  ;;  %v2704_v24 = vpop.f32.mrf.mxu1 }
 0x343   :  { %v6224_v11 = vadd.f32 %v6104_v27, %v3641_v30  ;;  %v2751_v63 = vadd.f32 %v2750_v5, %v2702_v32  ;;  %v5047_v32 = vld [vmem:[#allocation6 + $0x7b8] sm:$0xf0]  ;;  %v4282_v5 = vor.u32 %v5166_v1, %v4279_v20 }
 0x344   :  { %v2799_v8 = vpop.f32.mrf.mxu3  ;;  %v2655_v46 = vpop.f32.mrf.mxu0  ;;  %v5050_v29 = vor.u32 %v5358_v31, %v5047_v32 }
 0x345   :  { %v2656_v56 = vadd.f32 %v2655_v46, %v6119_v2  ;;  %v2800_v58 = vadd.f32 %v2799_v8, %v2751_v63  ;;  %2899 = vmatmul.bf16.gmra.mxu1 %v5650_v21  ;;  %3200 = vmatpush.bf16.msrb.mxu0 %v4282_v5 }
 0x346   :  { %3347 = vmatpush.bf16.msrb.mxu3 %v5050_v29 }
 0x347   :  { %v2705_v34 = vadd.f32 %v2704_v24, %v2656_v56  ;;  %2850 = vmatmul.bf16.gmra.mxu0 %v5648_v19  ;;  %v3503_v36 = vmax.f32 %v2800_v58, 0.0  ;;  %2948 = vmatmul.bf16.gmra.mxu2 %v5652_v22  ;;  %v6237_v58 = vperm.slane %v6116_v55, 5 }
 0x349   :  { %2997 = vmatmul.bf16.gmra.mxu3 %v6646_v3  ;;  %v3649_v27 = vmul.f32 %v6136_v10, %v3503_v36  ;;  %v5230_v36 = vld [vmem:[#allocation6 + $0x39c] sm:$0xf] }
 0x34a   :  { %v2753_v17 = vpop.f32.mrf.mxu2  ;;  %v2706_v8 = vpop.f32.mrf.mxu1 }
 0x34b   :  { %v6233_v53 = vadd.f32 %v6113_v35, %v3649_v27  ;;  %v2754_v30 = vadd.f32 %v2753_v17, %v2705_v34  ;;  %v4535_v34 = vld [vmem:[#allocation6 + $0x3b8] sm:$0xf0] }
 0x34c   :  { %v2802_v62 = vpop.f32.mrf.mxu3  ;;  %v2657_v54 = vpop.f32.mrf.mxu0  ;;  %v4538_v6 = vor.u32 %v5230_v36, %v4535_v34 }
 0x34d   :  { %v2658_v63 = vadd.f32 %v2657_v54, %v6119_v2  ;;  %v2803_v46 = vadd.f32 %v2802_v62, %v2754_v30  ;;  %v5286_v30 = vld [vmem:[#allocation6 + $0x55c] sm:$0xf] }
 0x34e   :  { %3249 = vmatpush.bf16.msrb.mxu1 %v4538_v6  ;;  %v4759_v62 = vld [vmem:[#allocation6 + $0x578] sm:$0xf0] }
 0x34f   :  { %v2707_v56 = vadd.f32 %v2706_v8, %v2658_v63  ;;  %v3511_v24 = vmax.f32 %v2803_v46, 0.0  ;;  %v5158_v54 = vld [vmem:[#allocation6 + $0x15c] sm:$0xf]  ;;  %v4762_v29 = vor.u32 %v5286_v30, %v4759_v62 }
 0x350   :  { %v4247_v63 = vld [vmem:[#allocation6 + $0x178] sm:$0xf0] }
 0x351   :  { %v3657_v35 = vmul.f32 %v6136_v10, %v3511_v24  ;;  %v5350_v8 = vld [vmem:[#allocation6 + $0x75c] sm:$0xf]  ;;  %v4250_v34 = vor.u32 %v5158_v54, %v4247_v63  ;;  %3299 = vmatpush.bf16.msrb.mxu2 %v4762_v29 }
 0x352   :  { %v2755_v27 = vpop.f32.mrf.mxu2  ;;  %v2865_v20 = vpop.f32.mrf.mxu1  ;;  %v5015_v46 = vld [vmem:[#allocation6 + $0x778] sm:$0xf0] }
 0x353   :  { %v6241_v25 = vadd.f32 %v6123_v26, %v3657_v35  ;;  %v2756_v2 = vadd.f32 %v2755_v27, %v2707_v56  ;;  %v5018_v27 = vor.u32 %v5350_v8, %v5015_v46  ;;  %3201 = vmatpush.bf16.msrb.mxu0 %v4250_v34  ;;  %v6686_v34 = vld [vmem:[#allocation21_spill] sm:$0xff] }
 0x354   :  { %v2804_v1 = vpop.f32.mrf.mxu3  ;;  %v2816_v17 = vpop.f32.mrf.mxu0 }
 0x355   :  { %v2817_v38 = vadd.f32 %v2816_v17, %v6237_v58  ;;  %v2805_v31 = vadd.f32 %v2804_v1, %v2756_v2  ;;  %3060 = vmatmul.bf16.vlgmr.msra.gmra.mxu1 %v6647_v33  ;;  %v6253_v1 = vld [vmem:[#allocation9] sm:$0xff]  ;;  %3348 = vmatpush.bf16.msrb.mxu3 %v5018_v27 }
 0x356   :  { %v6256_v17 = vperm.slane %v6253_v1, 5  ;;  %v6687_v27 = vld [vmem:[#allocation22_spill] sm:$0xff] }
 0x357   :  { %v2866_v32 = vadd.f32 %v2865_v20, %v2817_v38  ;;  %3011 = vmatmul.bf16.vlgmr.msra.gmra.mxu0 %v5564_v48  ;;  %v3519_v55 = vmax.f32 %v2805_v31, 0.0  ;;  %3109 = vmatmul.bf16.vlgmr.msra.gmra.mxu2 %v6648_v23  ;;  %v5222_v31 = vld [vmem:[#allocation6 + $0x35c] sm:$0xf] }
 0x359   :  { %3158 = vmatmul.bf16.vlgmr.msra.gmra.mxu3 %v6661_v28  ;;  %v3665_v26 = vmul.f32 %v6136_v10, %v3519_v55 }
 0x35a   :  { %v2914_v5 = vpop.f32.mrf.mxu2  ;;  %v2867_v2 = vpop.f32.mrf.mxu1 }
 0x35b   :  { %v6250_v56 = vadd.f32 %v6132_v9, %v3665_v26  ;;  %v2915_v24 = vadd.f32 %v2914_v5, %v2866_v32  ;;  %v4503_v32 = vld [vmem:[#allocation6 + $0x378] sm:$0xf0] }
 0x35c   :  { %v2963_v35 = vpop.f32.mrf.mxu3  ;;  %v2818_v36 = vpop.f32.mrf.mxu0  ;;  %v4506_v26 = vor.u32 %v5222_v31, %v4503_v32  ;;  %v5342_v31 = vld [vmem:[#allocation6 + $0x71c] sm:$0xf] }
 0x35d   :  { %v2819_v6 = vadd.f32 %v2818_v36, %v6237_v58  ;;  %v2964_v10 = vadd.f32 %v2963_v35, %v2915_v24  ;;  %v6684_v24 = vld [vmem:[#allocation19_spill] sm:$0xff]  ;;  %v6685_v36 = vld [vmem:[#allocation20_spill] sm:$0xff]  ;;  %v4983_v32 = vld [vmem:[#allocation6 + $0x738] sm:$0xf0] }
 0x35e   :  { %3250 = vmatpush.bf16.msrb.mxu1 %v4506_v26 }
 0x35f   :  { %v2868_v38 = vadd.f32 %v2867_v2, %v2819_v6  ;;  %v3400_v9 = vmax.f32 %v2964_v10, 0.0  ;;  %v5278_v2 = vld [vmem:[#allocation6 + $0x51c] sm:$0xf] }
 0x360   :  { %v5150_v10 = vld [vmem:[#allocation6 + $0x11c] sm:$0xf] }
 0x361   :  { %v3546_v20 = vmul.f32 %v6256_v17, %v3400_v9 }
 0x362   :  { %v2916_v55 = vpop.f32.mrf.mxu2  ;;  %v2870_v63 = vpop.f32.mrf.mxu1 }
 0x363   :  { %v2917_v30 = vadd.f32 %v2916_v55, %v2868_v38  ;;  %v6260_v5 = vadd.f32 %v6140_v57, %v3546_v20  ;;  %v4727_v57 = vld [vmem:[#allocation6 + $0x538] sm:$0xf0] }
 0x364   :  { %v2965_v62 = vpop.f32.mrf.mxu3  ;;  %v2821_v54 = vpop.f32.mrf.mxu0  ;;  %v4730_v9 = vor.u32 %v5278_v2, %v4727_v57  ;;  %v4215_v20 = vld [vmem:[#allocation6 + $0x138] sm:$0xf0] }
 0x365   :  { %v2822_v29 = vadd.f32 %v2821_v54, %v6237_v58  ;;  %v2966_v8 = vadd.f32 %v2965_v62, %v2917_v30  ;;  %3065 = vmatmul.bf16.gmra.mxu1 %v6685_v36  ;;  %v4218_v62 = vor.u32 %v5150_v10, %v4215_v20  ;;  %v4986_v54 = vor.u32 %v5342_v31, %v4983_v32  ;;  %v5214_v10 = vld [vmem:[#allocation6 + $0x31c] sm:$0xf] }
 0x366   :  { %3300 = vmatpush.bf16.msrb.mxu2 %v4730_v9  ;;  %v4471_v20 = vld [vmem:[#allocation6 + $0x338] sm:$0xf0] }
 0x367   :  { %v2871_v46 = vadd.f32 %v2870_v63, %v2822_v29  ;;  %3016 = vmatmul.bf16.gmra.mxu0 %v6684_v24  ;;  %v3408_v35 = vmax.f32 %v2966_v8, 0.0  ;;  %3114 = vmatmul.bf16.gmra.mxu2 %v6686_v34  ;;  %v6688_v29 = vld [vmem:[#allocation27_spill] sm:$0xff]  ;;  %v4474_v9 = vor.u32 %v5214_v10, %v4471_v20 }
 0x368   :  { %3202 = vmatpush.bf16.msrb.mxu0 %v4218_v62  ;;  %3349 = vmatpush.bf16.msrb.mxu3 %v4986_v54  ;;  %v4183_v54 = vld [vmem:[#allocation6 + $0xf8] sm:$0xf0] }
 0x369   :  { %3163 = vmatmul.bf16.gmra.mxu3 %v6687_v27  ;;  %v3554_v6 = vmul.f32 %v6256_v17, %v3408_v35  ;;  %3251 = vmatpush.bf16.msrb.mxu1 %v4474_v9 }
 0x36a   :  { %v2919_v38 = vpop.f32.mrf.mxu2  ;;  %v2872_v27 = vpop.f32.mrf.mxu1 }
 0x36b   :  { %v2920_v55 = vadd.f32 %v2919_v38, %v2871_v46  ;;  %v6269_v63 = vadd.f32 %v6688_v29, %v3554_v6  ;;  %v5334_v29 = vld [vmem:[#allocation6 + $0x6dc] sm:$0xf] }
 0x36c   :  { %v2968_v26 = vpop.f32.mrf.mxu3  ;;  %v2823_v30 = vpop.f32.mrf.mxu0 }
 0x36d   :  { %v2824_v8 = vadd.f32 %v2823_v30, %v6237_v58  ;;  %v2969_v35 = vadd.f32 %v2968_v26, %v2920_v55  ;;  %v5142_v30 = vld [vmem:[#allocation6 + $0xdc] sm:$0xf] }
 0x36f   :  { %v2873_v34 = vadd.f32 %v2872_v27, %v2824_v8  ;;  %v3416_v2 = vmax.f32 %v2969_v35, 0.0  ;;  %v4951_v8 = vld [vmem:[#allocation6 + $0x6f8] sm:$0xf0] }
 0x371   :  { %v3562_v57 = vmul.f32 %v6256_v17, %v3416_v2 }
 0x372   :  { %v2921_v36 = vpop.f32.mrf.mxu2  ;;  %v2875_v32 = vpop.f32.mrf.mxu1 }
 0x373   :  { %v2922_v46 = vadd.f32 %v2921_v36, %v2873_v34  ;;  %v6274_v6 = vadd.f32 %v6154_v4, %v3562_v57  ;;  %v5270_v4 = vld [vmem:[#allocation6 + $0x4dc] sm:$0xf] }
 0x374   :  { %v2970_v38 = vpop.f32.mrf.mxu3  ;;  %v2826_v24 = vpop.f32.mrf.mxu0  ;;  %v4695_v34 = vld [vmem:[#allocation6 + $0x4f8] sm:$0xf0] }
 0x375   :  { %v2827_v31 = vadd.f32 %v2826_v24, %v6237_v58  ;;  %v2971_v55 = vadd.f32 %v2970_v38, %v2922_v46  ;;  %3070 = vmatmul.bf16.gmra.mxu1 %v5590_v50  ;;  %v4698_v62 = vor.u32 %v5270_v4, %v4695_v34  ;;  %v4186_v46 = vor.u32 %v5142_v30, %v4183_v54  ;;  %v5206_v30 = vld [vmem:[#allocation6 + $0x2dc] sm:$0xf] }
 0x376   :  { %v4954_v38 = vor.u32 %v5334_v29, %v4951_v8  ;;  %v4439_v54 = vld [vmem:[#allocation6 + $0x2f8] sm:$0xf0] }
 0x377   :  { %v2876_v26 = vadd.f32 %v2875_v32, %v2827_v31  ;;  %3021 = vmatmul.bf16.gmra.mxu0 %v5588_v49  ;;  %v3424_v27 = vmax.f32 %v2971_v55, 0.0  ;;  %3119 = vmatmul.bf16.gmra.mxu2 %v5592_v51 }
 0x378   :  { %3301 = vmatpush.bf16.msrb.mxu2 %v4698_v62  ;;  %3203 = vmatpush.bf16.msrb.mxu0 %v4186_v46  ;;  %v4442_v62 = vor.u32 %v5206_v30, %v4439_v54  ;;  %v4663_v46 = vld [vmem:[#allocation6 + $0x4b8] sm:$0xf0] }
 0x379   :  { %3168 = vmatmul.bf16.gmra.mxu3 %v5594_v52  ;;  %v3570_v36 = vmul.f32 %v6256_v17, %v3424_v27 }
 0x37a   :  { %v2924_v24 = vpop.f32.mrf.mxu2  ;;  %v2877_v31 = vpop.f32.mrf.mxu1  ;;  %3350 = vmatpush.bf16.msrb.mxu3 %v4954_v38  ;;  %3252 = vmatpush.bf16.msrb.mxu1 %v4442_v62  ;;  %v5134_v38 = vld [vmem:[#allocation6 + $0x9c] sm:$0xf] }
 0x37b   :  { %v2925_v35 = vadd.f32 %v2924_v24, %v2876_v26  ;;  %v6283_v10 = vadd.f32 %v6163_v59, %v3570_v36 }
 0x37c   :  { %v2973_v2 = vpop.f32.mrf.mxu3  ;;  %v2828_v57 = vpop.f32.mrf.mxu0 }
 0x37d   :  { %v2829_v20 = vadd.f32 %v2828_v57, %v6237_v58  ;;  %v2974_v32 = vadd.f32 %v2973_v2, %v2925_v35 }
 0x37f   :  { %v2878_v9 = vadd.f32 %v2877_v31, %v2829_v20  ;;  %v3432_v55 = vmax.f32 %v2974_v32, 0.0  ;;  %v4151_v32 = vld [vmem:[#allocation6 + $0xb8] sm:$0xf0] }
 0x381   :  { %v3578_v27 = vmul.f32 %v6256_v17, %v3432_v55  ;;  %v4919_v55 = vld [vmem:[#allocation6 + $0x6b8] sm:$0xf0] }
 0x382   :  { %v2926_v4 = vpop.f32.mrf.mxu2  ;;  %v2880_v29 = vpop.f32.mrf.mxu1 }
 0x383   :  { %v2927_v26 = vadd.f32 %v2926_v4, %v2878_v9  ;;  %v6288_v59 = vadd.f32 %v6168_v37, %v3578_v27  ;;  %v5262_v37 = vld [vmem:[#allocation6 + $0x49c] sm:$0xf] }
 0x384   :  { %v2975_v34 = vpop.f32.mrf.mxu3  ;;  %v2831_v24 = vpop.f32.mrf.mxu0  ;;  %v4666_v31 = vor.u32 %v5262_v37, %v4663_v46  ;;  %v5326_v9 = vld [vmem:[#allocation6 + $0x69c] sm:$0xf] }
 0x385   :  { %v2832_v36 = vadd.f32 %v2831_v24, %v6237_v58  ;;  %v2976_v8 = vadd.f32 %v2975_v34, %v2927_v26  ;;  %3075 = vmatmul.bf16.gmra.mxu1 %v5602_v13  ;;  %v4154_v34 = vor.u32 %v5134_v38, %v4151_v32  ;;  %v4922_v24 = vor.u32 %v5326_v9, %v4919_v55 }
 0x386   :  { %3302 = vmatpush.bf16.msrb.mxu2 %v4666_v31 }
 0x387   :  { %v2881_v35 = vadd.f32 %v2880_v29, %v2832_v36  ;;  %3026 = vmatmul.bf16.gmra.mxu0 %v5600_v12  ;;  %v3440_v2 = vmax.f32 %v2976_v8, 0.0  ;;  %3124 = vmatmul.bf16.gmra.mxu2 %v5604_v14 }
 0x388   :  { %3204 = vmatpush.bf16.msrb.mxu0 %v4154_v34  ;;  %3351 = vmatpush.bf16.msrb.mxu3 %v4922_v24  ;;  %v4631_v34 = vld [vmem:[#allocation6 + $0x478] sm:$0xf0] }
 0x389   :  { %3173 = vmatmul.bf16.gmra.mxu3 %v5606_v15  ;;  %v3586_v57 = vmul.f32 %v6256_v17, %v3440_v2  ;;  %v5126_v24 = vld [vmem:[#allocation6 + $0x5c] sm:$0xf] }
 0x38a   :  { %v2929_v20 = vpop.f32.mrf.mxu2  ;;  %v2882_v36 = vpop.f32.mrf.mxu1 }
 0x38b   :  { %v2930_v27 = vadd.f32 %v2929_v20, %v2881_v35  ;;  %v6297_v30 = vadd.f32 %v6177_v7, %v3586_v57  ;;  %v5198_v7 = vld [vmem:[#allocation6 + $0x29c] sm:$0xf] }
 0x38c   :  { %v2978_v4 = vpop.f32.mrf.mxu3  ;;  %v2833_v26 = vpop.f32.mrf.mxu0  ;;  %v4407_v57 = vld [vmem:[#allocation6 + $0x2b8] sm:$0xf0] }
 0x38d   :  { %v2834_v54 = vadd.f32 %v2833_v26, %v6237_v58  ;;  %v2979_v29 = vadd.f32 %v2978_v4, %v2930_v27  ;;  %v4410_v31 = vor.u32 %v5198_v7, %v4407_v57  ;;  %v5254_v26 = vld [vmem:[#allocation6 + $0x45c] sm:$0xf] }
 0x38f   :  { %v2883_v62 = vadd.f32 %v2882_v36, %v2834_v54  ;;  %v3448_v8 = vmax.f32 %v2979_v29, 0.0  ;;  %3253 = vmatpush.bf16.msrb.mxu1 %v4410_v31  ;;  %v4634_v36 = vor.u32 %v5254_v26, %v4631_v34  ;;  %v4119_v29 = vld [vmem:[#allocation6 + $0x78] sm:$0xf0] }
 0x391   :  { %v3594_v2 = vmul.f32 %v6256_v17, %v3448_v8  ;;  %v4887_v8 = vld [vmem:[#allocation6 + $0x678] sm:$0xf0]  ;;  %3303 = vmatpush.bf16.msrb.mxu2 %v4634_v36 }
 0x392   :  { %v2931_v37 = vpop.f32.mrf.mxu2  ;;  %v2885_v9 = vpop.f32.mrf.mxu1 }
 0x393   :  { %v6302_v35 = vadd.f32 %v6182_v16, %v3594_v2  ;;  %v2932_v46 = vadd.f32 %v2931_v37, %v2883_v62  ;;  %v5318_v62 = vld [vmem:[#allocation6 + $0x65c] sm:$0xf] }
 0x394   :  { %v2980_v38 = vpop.f32.mrf.mxu3  ;;  %v2836_v20 = vpop.f32.mrf.mxu0 }
 0x395   :  { %v2837_v32 = vadd.f32 %v2836_v20, %v6237_v58  ;;  %v2981_v55 = vadd.f32 %v2980_v38, %v2932_v46  ;;  %3080 = vmatmul.bf16.gmra.mxu1 %v5614_v41  ;;  %v4122_v38 = vor.u32 %v5126_v24, %v4119_v29  ;;  %v4890_v20 = vor.u32 %v5318_v62, %v4887_v8 }
 0x397   :  { %v2886_v27 = vadd.f32 %v2885_v9, %v2837_v32  ;;  %3031 = vmatmul.bf16.gmra.mxu0 %v5612_v40  ;;  %v3456_v4 = vmax.f32 %v2981_v55, 0.0  ;;  %3129 = vmatmul.bf16.gmra.mxu2 %v5616_v42 }
 0x398   :  { %3205 = vmatpush.bf16.msrb.mxu0 %v4122_v38  ;;  %3352 = vmatpush.bf16.msrb.mxu3 %v4890_v20  ;;  %v6690_v38 = vld [vmem:[#allocation24_spill] sm:$0xff]  ;;  %v6691_v20 = vld [vmem:[#allocation25_spill] sm:$0xff] }
 0x399   :  { %3178 = vmatmul.bf16.gmra.mxu3 %v5618_v43  ;;  %v3602_v16 = vmul.f32 %v6256_v17, %v3456_v4 }
 0x39a   :  { %v2934_v54 = vpop.f32.mrf.mxu2  ;;  %v2887_v32 = vpop.f32.mrf.mxu1 }
 0x39b   :  { %v2935_v2 = vadd.f32 %v2934_v54, %v2886_v27  ;;  %v6311_v7 = vadd.f32 %v6191_v0, %v3602_v16  ;;  %v5190_v0 = vld [vmem:[#allocation6 + $0x25c] sm:$0xf] }
 0x39c   :  { %v2983_v37 = vpop.f32.mrf.mxu3  ;;  %v2838_v46 = vpop.f32.mrf.mxu0  ;;  %v4375_v16 = vld [vmem:[#allocation6 + $0x278] sm:$0xf0] }
 0x39d   :  { %v2839_v57 = vadd.f32 %v2838_v46, %v6237_v58  ;;  %v2984_v9 = vadd.f32 %v2983_v37, %v2935_v2  ;;  %v4378_v36 = vor.u32 %v5190_v0, %v4375_v16  ;;  %v6689_v37 = vld [vmem:[#allocation23_spill] sm:$0xff] }
 0x39f   :  { %v2888_v31 = vadd.f32 %v2887_v32, %v2839_v57  ;;  %v3464_v55 = vmax.f32 %v2984_v9, 0.0  ;;  %3254 = vmatpush.bf16.msrb.mxu1 %v4378_v36  ;;  %v5246_v32 = vld [vmem:[#allocation6 + $0x41c] sm:$0xf]  ;;  %v6693_v36 = vld [vmem:[#allocation18_spill] sm:$0xff] }
 0x3a0   :  { %v4599_v9 = vld [vmem:[#allocation6 + $0x438] sm:$0xf0] }
 0x3a1   :  { %v3610_v4 = vmul.f32 %v6256_v17, %v3464_v55 }
 0x3a2   :  { %v2936_v26 = vpop.f32.mrf.mxu2  ;;  %v2890_v62 = vpop.f32.mrf.mxu1 }
 0x3a3   :  { %v6316_v27 = vadd.f32 %v6196_v61, %v3610_v4  ;;  %v2937_v34 = vadd.f32 %v2936_v26, %v2888_v31  ;;  %v6692_v61 = vld [vmem:[#allocation26_spill] sm:$0xff]  ;;  %v5118_v31 = vld [vmem:[#allocation6 + $0x1c] sm:$0xf]  ;;  %v4602_v4 = vor.u32 %v5246_v32, %v4599_v9 }
 0x3a4   :  { %v2985_v24 = vpop.f32.mrf.mxu3  ;;  %v2841_v54 = vpop.f32.mrf.mxu0  ;;  %v4087_v26 = vld [vmem:[#allocation6 + $0x38] sm:$0xf0] }
 0x3a5   :  { %v2842_v29 = vadd.f32 %v2841_v54, %v6237_v58  ;;  %v2986_v8 = vadd.f32 %v2985_v24, %v2937_v34  ;;  %3085 = vmatmul.bf16.gmra.mxu1 %v6690_v38  ;;  %v5310_v34 = vld [vmem:[#allocation6 + $0x61c] sm:$0xf]  ;;  %3304 = vmatpush.bf16.msrb.mxu2 %v4602_v4 }
 0x3a6   :  { %v4855_v24 = vld [vmem:[#allocation6 + $0x638] sm:$0xf0] }
 0x3a7   :  { %v2891_v2 = vadd.f32 %v2890_v62, %v2842_v29  ;;  %3036 = vmatmul.bf16.gmra.mxu0 %v6689_v37  ;;  %v3472_v46 = vmax.f32 %v2986_v8, 0.0  ;;  %3134 = vmatmul.bf16.gmra.mxu2 %v6691_v20  ;;  %v4090_v29 = vor.u32 %v5118_v31, %v4087_v26  ;;  %v4858_v62 = vor.u32 %v5310_v34, %v4855_v24 }
 0x3a9   :  { %3183 = vmatmul.bf16.gmra.mxu3 %v6692_v61  ;;  %v3618_v57 = vmul.f32 %v6256_v17, %v3472_v46  ;;  %3206 = vmatpush.bf16.msrb.mxu0 %v4090_v29 }
 0x3aa   :  { %v2939_v55 = vpop.f32.mrf.mxu2  ;;  %v2892_v20 = vpop.f32.mrf.mxu1  ;;  %3353 = vmatpush.bf16.msrb.mxu3 %v4858_v62 }
 0x3ab   :  { %v2940_v54 = vadd.f32 %v2939_v55, %v2891_v2  ;;  %v6325_v8 = vadd.f32 %v6693_v36, %v3618_v57  ;;  %v5182_v2 = vld [vmem:[#allocation6 + $0x21c] sm:$0xf] }
 0x3ac   :  { %v2988_v0 = vpop.f32.mrf.mxu3  ;;  %v2843_v16 = vpop.f32.mrf.mxu0  ;;  %v4343_v55 = vld [vmem:[#allocation6 + $0x238] sm:$0xf0] }
 0x3ad   :  { %v2844_v61 = vadd.f32 %v2843_v16, %v6237_v58  ;;  %v2989_v46 = vadd.f32 %v2988_v0, %v2940_v54  ;;  %v4346_v24 = vor.u32 %v5182_v2, %v4343_v55 }
 0x3af   :  { %v2893_v38 = vadd.f32 %v2892_v20, %v2844_v61  ;;  %v3480_v32 = vmax.f32 %v2989_v46, 0.0  ;;  %3255 = vmatpush.bf16.msrb.mxu1 %v4346_v24 }
 0x3b1   :  { %v3626_v9 = vmul.f32 %v6256_v17, %v3480_v32 }
 0x3b2   :  { %v2941_v37 = vpop.f32.mrf.mxu2  ;;  %v2895_v4 = vpop.f32.mrf.mxu1 }
 0x3b3   :  { %v6330_v31 = vadd.f32 %v6210_v18, %v3626_v9  ;;  %v2942_v26 = vadd.f32 %v2941_v37, %v2893_v38 }
 0x3b4   :  { %v2990_v57 = vpop.f32.mrf.mxu3  ;;  %v2846_v34 = vpop.f32.mrf.mxu0 }
 0x3b5   :  { %v2847_v16 = vadd.f32 %v2846_v34, %v6237_v58  ;;  %v2991_v54 = vadd.f32 %v2990_v57, %v2942_v26  ;;  %3090 = vmatmul.bf16.gmra.mxu1 %v5638_v45 }
 0x3b7   :  { %v2896_v0 = vadd.f32 %v2895_v4, %v2847_v16  ;;  %3041 = vmatmul.bf16.gmra.mxu0 %v5636_v44  ;;  %v3488_v20 = vmax.f32 %v2991_v54, 0.0  ;;  %3139 = vmatmul.bf16.gmra.mxu2 %v6643_v39 }
 0x3b9   :  { %3188 = vmatmul.bf16.gmra.mxu3 %v6658_v47  ;;  %v3634_v18 = vmul.f32 %v6256_v17, %v3488_v20 }
 0x3ba   :  { %v2944_v37 = vpop.f32.mrf.mxu2  ;;  %v2897_v46 = vpop.f32.mrf.mxu1 }
 0x3bb   :  { %v2945_v38 = vadd.f32 %v2944_v37, %v2896_v0  ;;  %v6339_v62 = vadd.f32 %v6219_v60, %v3634_v18 }
 0x3bc   :  { %v2993_v61 = vpop.f32.mrf.mxu3  ;;  %v2848_v29 = vpop.f32.mrf.mxu0 }
 0x3bd   :  { %v2849_v36 = vadd.f32 %v2848_v29, %v6237_v58  ;;  %v2994_v32 = vadd.f32 %v2993_v61, %v2945_v38 }
 0x3bf   :  { %v2898_v9 = vadd.f32 %v2897_v46, %v2849_v36  ;;  %v3496_v2 = vmax.f32 %v2994_v32, 0.0 }
 0x3c1   :  { %v3642_v55 = vmul.f32 %v6256_v17, %v3496_v2 }
 0x3c2   :  { %v2946_v26 = vpop.f32.mrf.mxu2  ;;  %v2900_v54 = vpop.f32.mrf.mxu1 }
 0x3c3   :  { %v6344_v57 = vadd.f32 %v6224_v11, %v3642_v55  ;;  %v2947_v34 = vadd.f32 %v2946_v26, %v2898_v9  ;;  %v6356_v55 = vld [vmem:[#allocation8] sm:$0xff] }
 0x3c4   :  { %v2995_v24 = vpop.f32.mrf.mxu3  ;;  %v2851_v16 = vpop.f32.mrf.mxu0  ;;  %v6359_v26 = vperm.slane %v6356_v55, 6 }
 0x3c5   :  { %v2852_v4 = vadd.f32 %v2851_v16, %v6237_v58  ;;  %v2996_v60 = vadd.f32 %v2995_v24, %v2947_v34  ;;  %3095 = vmatmul.bf16.gmra.mxu1 %v5650_v21 }
 0x3c7   :  { %v2901_v0 = vadd.f32 %v2900_v54, %v2852_v4  ;;  %3046 = vmatmul.bf16.gmra.mxu0 %v5648_v19  ;;  %v3504_v20 = vmax.f32 %v2996_v60, 0.0  ;;  %3144 = vmatmul.bf16.gmra.mxu2 %v5652_v22 }
 0x3c9   :  { %3193 = vmatmul.bf16.gmra.mxu3 %v6646_v3  ;;  %v3650_v11 = vmul.f32 %v6256_v17, %v3504_v20 }
 0x3ca   :  { %v2949_v18 = vpop.f32.mrf.mxu2  ;;  %v2902_v46 = vpop.f32.mrf.mxu1 }
 0x3cb   :  { %v2950_v37 = vadd.f32 %v2949_v18, %v2901_v0  ;;  %v6353_v29 = vadd.f32 %v6233_v53, %v3650_v11 }
 0x3cc   :  { %v2998_v38 = vpop.f32.mrf.mxu3  ;;  %v2853_v61 = vpop.f32.mrf.mxu0 }
 0x3cd   :  { %v2854_v36 = vadd.f32 %v2853_v61, %v6237_v58  ;;  %v2999_v32 = vadd.f32 %v2998_v38, %v2950_v37 }
 0x3cf   :  { %v2903_v9 = vadd.f32 %v2902_v46, %v2854_v36  ;;  %v3512_v2 = vmax.f32 %v2999_v32, 0.0 }
 0x3d1   :  { %v3658_v34 = vmul.f32 %v6256_v17, %v3512_v2 }
 0x3d2   :  { %v2951_v24 = vpop.f32.mrf.mxu2  ;;  %v3061_v60 = vpop.f32.mrf.mxu1 }
 0x3d3   :  { %v6363_v16 = vadd.f32 %v6241_v25, %v3658_v34  ;;  %v2952_v4 = vadd.f32 %v2951_v24, %v2903_v9  ;;  %v6376_v9 = vperm.slane %v6253_v1, 6 }
 0x3d4   :  { %v3000_v53 = vpop.f32.mrf.mxu3  ;;  %v3012_v54 = vpop.f32.mrf.mxu0 }
 0x3d5   :  { %v3013_v58 = vadd.f32 %v3012_v54, %v6359_v26  ;;  %v3001_v0 = vadd.f32 %v3000_v53, %v2952_v4  ;;  %3256 = vmatmul.bf16.vlgmr.msrb.gmra.mxu1 %v6647_v33 }
 0x3d7   :  { %v3062_v20 = vadd.f32 %v3061_v60, %v3013_v58  ;;  %3207 = vmatmul.bf16.vlgmr.msrb.gmra.mxu0 %v5564_v48  ;;  %v3520_v11 = vmax.f32 %v3001_v0, 0.0  ;;  %3305 = vmatmul.bf16.vlgmr.msrb.gmra.mxu2 %v6648_v23  ;;  %v6694_v60 = vld [vmem:[#allocation19_spill] sm:$0xff] }
 0x3d9   :  { %3354 = vmatmul.bf16.vlgmr.msrb.gmra.mxu3 %v6661_v28  ;;  %v3666_v25 = vmul.f32 %v6256_v17, %v3520_v11  ;;  %v6696_v11 = vld [vmem:[#allocation21_spill] sm:$0xff] }
 0x3da   :  { %v3110_v18 = vpop.f32.mrf.mxu2  ;;  %v3063_v32 = vpop.f32.mrf.mxu1 }
 0x3db   :  { %v3111_v37 = vadd.f32 %v3110_v18, %v3062_v20  ;;  %v6372_v36 = vadd.f32 %v6250_v56, %v3666_v25  ;;  %v6695_v20 = vld [vmem:[#allocation20_spill] sm:$0xff]  ;;  %v6697_v25 = vld [vmem:[#allocation22_spill] sm:$0xff] }
 0x3dc   :  { %v3159_v38 = vpop.f32.mrf.mxu3  ;;  %v3014_v61 = vpop.f32.mrf.mxu0 }
 0x3dd   :  { %v3015_v46 = vadd.f32 %v3014_v61, %v6359_v26  ;;  %v3160_v48 = vadd.f32 %v3159_v38, %v3111_v37 }
 0x3df   :  { %v3064_v33 = vadd.f32 %v3063_v32, %v3015_v46  ;;  %v3401_v23 = vmax.f32 %v3160_v48, 0.0 }
 0x3e1   :  { %v3547_v28 = vmul.f32 %v6376_v9, %v3401_v23 }
 0x3e2   :  { %v3112_v2 = vpop.f32.mrf.mxu2  ;;  %v3066_v53 = vpop.f32.mrf.mxu1 }
 0x3e3   :  { %v3113_v17 = vadd.f32 %v3112_v2, %v3064_v33  ;;  %v6380_v4 = vadd.f32 %v6260_v5, %v3547_v28 }
 0x3e4   :  { %v3161_v34 = vpop.f32.mrf.mxu3  ;;  %v3017_v24 = vpop.f32.mrf.mxu0 }
 0x3e5   :  { %v3018_v56 = vadd.f32 %v3017_v24, %v6359_v26  ;;  %v3162_v54 = vadd.f32 %v3161_v34, %v3113_v17  ;;  %3261 = vmatmul.bf16.gmra.mxu1 %v6695_v20 }
 0x3e7   :  { %v3067_v58 = vadd.f32 %v3066_v53, %v3018_v56  ;;  %3212 = vmatmul.bf16.gmra.mxu0 %v6694_v60  ;;  %v3409_v0 = vmax.f32 %v3162_v54, 0.0  ;;  %3310 = vmatmul.bf16.gmra.mxu2 %v6696_v11 }
 0x3e9   :  { %3359 = vmatmul.bf16.gmra.mxu3 %v6697_v25  ;;  %v3555_v18 = vmul.f32 %v6376_v9, %v3409_v0 }
 0x3ea   :  { %v3115_v37 = vpop.f32.mrf.mxu2  ;;  %v3068_v48 = vpop.f32.mrf.mxu1 }
 0x3eb   :  { %v3116_v38 = vadd.f32 %v3115_v37, %v3067_v58  ;;  %v6389_v46 = vadd.f32 %v6269_v63, %v3555_v18 }
 0x3ec   :  { %v3164_v5 = vpop.f32.mrf.mxu3  ;;  %v3019_v61 = vpop.f32.mrf.mxu0 }
 0x3ed   :  { %v3020_v32 = vadd.f32 %v3019_v61, %v6359_v26  ;;  %v3165_v33 = vadd.f32 %v3164_v5, %v3116_v38 }
 0x3ef   :  { %v3069_v23 = vadd.f32 %v3068_v48, %v3020_v32  ;;  %v3417_v28 = vmax.f32 %v3165_v33, 0.0 }
 0x3f1   :  { %v3563_v2 = vmul.f32 %v6376_v9, %v3417_v28 }
 0x3f2   :  { %v3117_v17 = vpop.f32.mrf.mxu2  ;;  %v3071_v58 = vpop.f32.mrf.mxu1 }
 0x3f3   :  { %v3118_v34 = vadd.f32 %v3117_v17, %v3069_v23  ;;  %v6394_v53 = vadd.f32 %v6274_v6, %v3563_v2 }
 0x3f4   :  { %v3166_v24 = vpop.f32.mrf.mxu3  ;;  %v3022_v56 = vpop.f32.mrf.mxu0 }
 0x3f5   :  { %v3023_v54 = vadd.f32 %v3022_v56, %v6359_v26  ;;  %v3167_v63 = vadd.f32 %v3166_v24, %v3118_v34  ;;  %3266 = vmatmul.bf16.gmra.mxu1 %v5590_v50 }
 0x3f7   :  { %v3072_v60 = vadd.f32 %v3071_v58, %v3023_v54  ;;  %3217 = vmatmul.bf16.gmra.mxu0 %v5588_v49  ;;  %v3425_v0 = vmax.f32 %v3167_v63, 0.0  ;;  %3315 = vmatmul.bf16.gmra.mxu2 %v5592_v51 }
 0x3f9   :  { %3364 = vmatmul.bf16.gmra.mxu3 %v5594_v52  ;;  %v3571_v20 = vmul.f32 %v6376_v9, %v3425_v0 }
 0x3fa   :  { %v3120_v11 = vpop.f32.mrf.mxu2  ;;  %v3073_v5 = vpop.f32.mrf.mxu1 }
 0x3fb   :  { %v3121_v25 = vadd.f32 %v3120_v11, %v3072_v60  ;;  %v6403_v37 = vadd.f32 %v6283_v10, %v3571_v20 }
 0x3fc   :  { %v3169_v6 = vpop.f32.mrf.mxu3  ;;  %v3024_v18 = vpop.f32.mrf.mxu0 }
 0x3fd   :  { %v3025_v38 = vadd.f32 %v3024_v18, %v6359_v26  ;;  %v3170_v49 = vadd.f32 %v3169_v6, %v3121_v25 }
 0x3ff   :  { %v3074_v61 = vadd.f32 %v3073_v5, %v3025_v38  ;;  %v3433_v32 = vmax.f32 %v3170_v49, 0.0 }
 0x401   :  { %v3579_v50 = vmul.f32 %v6376_v9, %v3433_v32 }
 0x402   :  { %v3122_v51 = vpop.f32.mrf.mxu2  ;;  %v3076_v2 = vpop.f32.mrf.mxu1 }
 0x403   :  { %v3123_v48 = vadd.f32 %v3122_v51, %v3074_v61  ;;  %v6408_v23 = vadd.f32 %v6288_v59, %v3579_v50 }
 0x404   :  { %v3171_v52 = vpop.f32.mrf.mxu3  ;;  %v3027_v33 = vpop.f32.mrf.mxu0 }
 0x405   :  { %v3028_v28 = vadd.f32 %v3027_v33, %v6359_v26  ;;  %v3172_v10 = vadd.f32 %v3171_v52, %v3123_v48  ;;  %3271 = vmatmul.bf16.gmra.mxu1 %v5602_v13 }
 0x407   :  { %v3077_v17 = vadd.f32 %v3076_v2, %v3028_v28  ;;  %3222 = vmatmul.bf16.gmra.mxu0 %v5600_v12  ;;  %v3441_v34 = vmax.f32 %v3172_v10, 0.0  ;;  %3320 = vmatmul.bf16.gmra.mxu2 %v5604_v14 }
 0x409   :  { %3369 = vmatmul.bf16.gmra.mxu3 %v5606_v15  ;;  %v3587_v24 = vmul.f32 %v6376_v9, %v3441_v34 }
 0x40a   :  { %v3125_v56 = vpop.f32.mrf.mxu2  ;;  %v3078_v0 = vpop.f32.mrf.mxu1 }
 0x40b   :  { %v3126_v54 = vadd.f32 %v3125_v56, %v3077_v17  ;;  %v6417_v63 = vadd.f32 %v6297_v30, %v3587_v24 }
 0x40c   :  { %v3174_v59 = vpop.f32.mrf.mxu3  ;;  %v3029_v58 = vpop.f32.mrf.mxu0 }
 0x40d   :  { %v3030_v60 = vadd.f32 %v3029_v58, %v6359_v26  ;;  %v3175_v12 = vadd.f32 %v3174_v59, %v3126_v54  ;;  %v6698_v58 = vld [vmem:[#allocation23_spill] sm:$0xff] }
 0x40f   :  { %v3079_v20 = vadd.f32 %v3078_v0, %v3030_v60  ;;  %v3449_v11 = vmax.f32 %v3175_v12, 0.0  ;;  %v6699_v0 = vld [vmem:[#allocation24_spill] sm:$0xff]  ;;  %v6700_v12 = vld [vmem:[#allocation25_spill] sm:$0xff] }
 0x411   :  { %v3595_v13 = vmul.f32 %v6376_v9, %v3449_v11 }
 0x412   :  { %v3127_v14 = vpop.f32.mrf.mxu2  ;;  %v3081_v5 = vpop.f32.mrf.mxu1 }
 0x413   :  { %v3128_v25 = vadd.f32 %v3127_v14, %v3079_v20  ;;  %v6422_v18 = vadd.f32 %v6302_v35, %v3595_v13  ;;  %v6701_v20 = vld [vmem:[#allocation26_spill] sm:$0xff] }
 0x414   :  { %v3176_v15 = vpop.f32.mrf.mxu3  ;;  %v3032_v6 = vpop.f32.mrf.mxu0 }
 0x415   :  { %v3033_v38 = vadd.f32 %v3032_v6, %v6359_v26  ;;  %v3177_v30 = vadd.f32 %v3176_v15, %v3128_v25  ;;  %3276 = vmatmul.bf16.gmra.mxu1 %v5614_v41 }
 0x417   :  { %v3082_v49 = vadd.f32 %v3081_v5, %v3033_v38  ;;  %3227 = vmatmul.bf16.gmra.mxu0 %v5612_v40  ;;  %v3457_v61 = vmax.f32 %v3177_v30, 0.0  ;;  %3325 = vmatmul.bf16.gmra.mxu2 %v5616_v42 }
 0x419   :  { %3374 = vmatmul.bf16.gmra.mxu3 %v5618_v43  ;;  %v3603_v32 = vmul.f32 %v6376_v9, %v3457_v61 }
 0x41a   :  { %v3130_v50 = vpop.f32.mrf.mxu2  ;;  %v3083_v28 = vpop.f32.mrf.mxu1 }
 0x41b   :  { %v3131_v51 = vadd.f32 %v3130_v50, %v3082_v49  ;;  %v6431_v52 = vadd.f32 %v6311_v7, %v3603_v32 }
 0x41c   :  { %v3179_v35 = vpop.f32.mrf.mxu3  ;;  %v3034_v48 = vpop.f32.mrf.mxu0 }
 0x41d   :  { %v3035_v33 = vadd.f32 %v3034_v48, %v6359_v26  ;;  %v3180_v40 = vadd.f32 %v3179_v35, %v3131_v51 }
 0x41f   :  { %v3084_v2 = vadd.f32 %v3083_v28, %v3035_v33  ;;  %v3465_v10 = vmax.f32 %v3180_v40, 0.0 }
 0x421   :  { %v3611_v41 = vmul.f32 %v6376_v9, %v3465_v10 }
 0x422   :  { %v3132_v42 = vpop.f32.mrf.mxu2  ;;  %v3086_v54 = vpop.f32.mrf.mxu1 }
 0x423   :  { %v3133_v17 = vadd.f32 %v3132_v42, %v3084_v2  ;;  %v6436_v24 = vadd.f32 %v6316_v27, %v3611_v41 }
 0x424   :  { %v3181_v43 = vpop.f32.mrf.mxu3  ;;  %v3037_v34 = vpop.f32.mrf.mxu0 }
 0x425   :  { %v3038_v56 = vadd.f32 %v3037_v34, %v6359_v26  ;;  %v3182_v7 = vadd.f32 %v3181_v43, %v3133_v17  ;;  %3281 = vmatmul.bf16.gmra.mxu1 %v6699_v0 }
 0x427   :  { %v3087_v59 = vadd.f32 %v3086_v54, %v3038_v56  ;;  %3232 = vmatmul.bf16.gmra.mxu0 %v6698_v58  ;;  %v3473_v60 = vmax.f32 %v3182_v7, 0.0  ;;  %3330 = vmatmul.bf16.gmra.mxu2 %v6700_v12 }
 0x429   :  { %3379 = vmatmul.bf16.gmra.mxu3 %v6701_v20  ;;  %v3619_v11 = vmul.f32 %v6376_v9, %v3473_v60 }
 0x42a   :  { %v3135_v13 = vpop.f32.mrf.mxu2  ;;  %v3088_v38 = vpop.f32.mrf.mxu1 }
 0x42b   :  { %v3136_v14 = vadd.f32 %v3135_v13, %v3087_v59  ;;  %v6445_v15 = vadd.f32 %v6325_v8, %v3619_v11 }
 0x42c   :  { %v3184_v27 = vpop.f32.mrf.mxu3  ;;  %v3039_v25 = vpop.f32.mrf.mxu0 }
 0x42d   :  { %v3040_v6 = vadd.f32 %v3039_v25, %v6359_v26  ;;  %v3185_v5 = vadd.f32 %v3184_v27, %v3136_v14 }
 0x42f   :  { %v3089_v30 = vadd.f32 %v3088_v38, %v3040_v6  ;;  %v3481_v49 = vmax.f32 %v3185_v5, 0.0 }
 0x431   :  { %v3627_v61 = vmul.f32 %v6376_v9, %v3481_v49 }
 0x432   :  { %v3137_v32 = vpop.f32.mrf.mxu2  ;;  %v3091_v28 = vpop.f32.mrf.mxu1 }
 0x433   :  { %v3138_v50 = vadd.f32 %v3137_v32, %v3089_v30  ;;  %v6450_v48 = vadd.f32 %v6330_v31, %v3627_v61 }
 0x434   :  { %v3186_v51 = vpop.f32.mrf.mxu3  ;;  %v3042_v35 = vpop.f32.mrf.mxu0 }
 0x435   :  { %v3043_v33 = vadd.f32 %v3042_v35, %v6359_v26  ;;  %v3187_v8 = vadd.f32 %v3186_v51, %v3138_v50  ;;  %3286 = vmatmul.bf16.gmra.mxu1 %v5638_v45 }
 0x437   :  { %v3092_v40 = vadd.f32 %v3091_v28, %v3043_v33  ;;  %3237 = vmatmul.bf16.gmra.mxu0 %v5636_v44  ;;  %v3489_v2 = vmax.f32 %v3187_v8, 0.0  ;;  %3335 = vmatmul.bf16.gmra.mxu2 %v6643_v39 }
 0x439   :  { %3384 = vmatmul.bf16.gmra.mxu3 %v6658_v47  ;;  %v3635_v10 = vmul.f32 %v6376_v9, %v3489_v2 }
 0x43a   :  { %v3140_v41 = vpop.f32.mrf.mxu2  ;;  %v3093_v56 = vpop.f32.mrf.mxu1 }
 0x43b   :  { %v3141_v42 = vadd.f32 %v3140_v41, %v3092_v40  ;;  %v6459_v43 = vadd.f32 %v6339_v62, %v3635_v10 }
 0x43c   :  { %v3189_v31 = vpop.f32.mrf.mxu3  ;;  %v3044_v17 = vpop.f32.mrf.mxu0 }
 0x43d   :  { %v3045_v34 = vadd.f32 %v3044_v17, %v6359_v26  ;;  %v3190_v44 = vadd.f32 %v3189_v31, %v3141_v42  ;;  %v6490_v17 = vperm.slane %v6253_v1, 7 }
 0x43f   :  { %v3094_v54 = vadd.f32 %v3093_v56, %v3045_v34  ;;  %v3497_v7 = vmax.f32 %v3190_v44, 0.0 }
 0x441   :  { %v3643_v45 = vmul.f32 %v6376_v9, %v3497_v7 }
 0x442   :  { %v3142_v39 = vpop.f32.mrf.mxu2  ;;  %v3096_v12 = vpop.f32.mrf.mxu1 }
 0x443   :  { %v3143_v59 = vadd.f32 %v3142_v39, %v3094_v54  ;;  %v6464_v60 = vadd.f32 %v6344_v57, %v3643_v45 }
 0x444   :  { %v3191_v47 = vpop.f32.mrf.mxu3  ;;  %v3047_v58 = vpop.f32.mrf.mxu0 }
 0x445   :  { %v3048_v0 = vadd.f32 %v3047_v58, %v6359_v26  ;;  %v3192_v62 = vadd.f32 %v3191_v47, %v3143_v59  ;;  %3291 = vmatmul.bf16.gmra.mxu1 %v5650_v21  ;;  %v6477_v21 = vperm.slane %v6356_v55, 7 }
 0x447   :  { %v3097_v20 = vadd.f32 %v3096_v12, %v3048_v0  ;;  %3242 = vmatmul.bf16.gmra.mxu0 %v5648_v19  ;;  %v3505_v11 = vmax.f32 %v3192_v62, 0.0  ;;  %3340 = vmatmul.bf16.gmra.mxu2 %v5652_v22 }
 0x449   :  { %3389 = vmatmul.bf16.gmra.mxu3 %v6646_v3  ;;  %v3651_v13 = vmul.f32 %v6376_v9, %v3505_v11 }
 0x44a   :  { %v3145_v14 = vpop.f32.mrf.mxu2  ;;  %v3098_v5 = vpop.f32.mrf.mxu1 }
 0x44b   :  { %v3146_v27 = vadd.f32 %v3145_v14, %v3097_v20  ;;  %v6473_v6 = vadd.f32 %v6353_v29, %v3651_v13 }
 0x44c   :  { %v3194_v57 = vpop.f32.mrf.mxu3  ;;  %v3049_v25 = vpop.f32.mrf.mxu0 }
 0x44d   :  { %v3050_v38 = vadd.f32 %v3049_v25, %v6359_v26  ;;  %v3195_v19 = vadd.f32 %v3194_v57, %v3146_v27 }
 0x44f   :  { %v3099_v30 = vadd.f32 %v3098_v5, %v3050_v38  ;;  %v3513_v49 = vmax.f32 %v3195_v19, 0.0 }
 0x451   :  { %v3659_v22 = vmul.f32 %v6376_v9, %v3513_v49 }
 0x452   :  { %v3147_v3 = vpop.f32.mrf.mxu2  ;;  %v3257_v35 = vpop.f32.mrf.mxu1 }
 0x453   :  { %v3148_v61 = vadd.f32 %v3147_v3, %v3099_v30  ;;  %v6481_v51 = vadd.f32 %v6363_v16, %v3659_v22 }
 0x454   :  { %v3196_v32 = vpop.f32.mrf.mxu3  ;;  %v3208_v50 = vpop.f32.mrf.mxu0 }
 0x455   :  { %v3209_v29 = vadd.f32 %v3208_v50, %v6477_v21  ;;  %v3197_v26 = vadd.f32 %v3196_v32, %v3148_v61 }
 0x457   :  { %v3521_v33 = vmax.f32 %v3197_v26, 0.0  ;;  %v3258_v28 = vadd.f32 %v3257_v35, %v3209_v29 }
 0x459   :  { %v3667_v8 = vmul.f32 %v6376_v9, %v3521_v33 }
 0x45a   :  { %v3306_v40 = vpop.f32.mrf.mxu2  ;;  %v3259_v42 = vpop.f32.mrf.mxu1 }
 0x45b   :  { %v3307_v55 = vadd.f32 %v3306_v40, %v3258_v28  ;;  %v6486_v41 = vadd.f32 %v6372_v36, %v3667_v8 }
 0x45c   :  { %v3355_v2 = vpop.f32.mrf.mxu3  ;;  %v3210_v10 = vpop.f32.mrf.mxu0 }
 0x45d   :  { %v3356_v31 = vadd.f32 %v3355_v2, %v3307_v55  ;;  %v3211_v16 = vadd.f32 %v3210_v10, %v6477_v21 }
 0x45f   :  { %v3402_v34 = vmax.f32 %v3356_v31, 0.0  ;;  %v3260_v56 = vadd.f32 %v3259_v42, %v3211_v16 }
 0x461   :  { %v3548_v44 = vmul.f32 %v6490_v17, %v3402_v34 }
 0x462   :  { %v3308_v54 = vpop.f32.mrf.mxu2  ;;  %v3262_v59 = vpop.f32.mrf.mxu1 }
 0x463   :  { %v3309_v9 = vadd.f32 %v3308_v54, %v3260_v56  ;;  %v3675_v39 = vadd.f32 %v6380_v4, %v3548_v44 }
 0x464   :  { %v3357_v7 = vpop.f32.mrf.mxu3  ;;  %v3213_v45 = vpop.f32.mrf.mxu0 }
 0x465   :  { %v3214_v36 = vadd.f32 %v3213_v45, %v6477_v21  ;;  %v3358_v47 = vadd.f32 %v3357_v7, %v3309_v9  ;;  %3676 = vadd.xlane.f32.xlu0 %v3675_v39 }
 0x467   :  { %v3410_v58 = vmax.f32 %v3358_v47, 0.0  ;;  %v3263_v0 = vadd.f32 %v3262_v59, %v3214_v36 }
 0x469   :  { %v3556_v1 = vmul.f32 %v6490_v17, %v3410_v58 }
 0x46a   :  { %v3311_v12 = vpop.f32.mrf.mxu2  ;;  %v3264_v14 = vpop.f32.mrf.mxu1 }
 0x46b   :  { %v3312_v62 = vadd.f32 %v3311_v12, %v3263_v0  ;;  %v3684_v13 = vadd.f32 %v6389_v46, %v3556_v1 }
 0x46c   :  { %v3360_v20 = vpop.f32.mrf.mxu3  ;;  %v3215_v11 = vpop.f32.mrf.mxu0 }
 0x46d   :  { %v3361_v27 = vadd.f32 %v3360_v20, %v3312_v62  ;;  %v3216_v57 = vadd.f32 %v3215_v11, %v6477_v21  ;;  %3685 = vadd.xlane.f32.xlu0 %v3684_v13 }
 0x46f   :  { %v3418_v4 = vmax.f32 %v3361_v27, 0.0  ;;  %v3265_v25 = vadd.f32 %v3264_v14, %v3216_v57 }
 0x471   :  { %v3564_v38 = vmul.f32 %v6490_v17, %v3418_v4 }
 0x472   :  { %v3313_v5 = vpop.f32.mrf.mxu2  ;;  %v3267_v61 = vpop.f32.mrf.mxu1 }
 0x473   :  { %v3314_v19 = vadd.f32 %v3313_v5, %v3265_v25  ;;  %v3693_v22 = vadd.f32 %v6394_v53, %v3564_v38 }
 0x474   :  { %v3362_v30 = vpop.f32.mrf.mxu3  ;;  %v3218_v49 = vpop.f32.mrf.mxu0 }
 0x475   :  { %v3219_v3 = vadd.f32 %v3218_v49, %v6477_v21  ;;  %v3363_v32 = vadd.f32 %v3362_v30, %v3314_v19  ;;  %3694 = vadd.xlane.f32.xlu1 %v3693_v22 }
 0x477   :  { %v3426_v46 = vmax.f32 %v3363_v32, 0.0  ;;  %v3268_v50 = vadd.f32 %v3267_v61, %v3219_v3 }
 0x479   :  { %v3572_v29 = vmul.f32 %v6490_v17, %v3426_v46 }
 0x47a   :  { %v3316_v35 = vpop.f32.mrf.mxu2  ;;  %v3269_v40 = vpop.f32.mrf.mxu1 }
 0x47b   :  { %v3317_v26 = vadd.f32 %v3316_v35, %v3268_v50  ;;  %v3702_v8 = vadd.f32 %v6403_v37, %v3572_v29 }
 0x47c   :  { %v3365_v33 = vpop.f32.mrf.mxu3  ;;  %v3220_v28 = vpop.f32.mrf.mxu0 }
 0x47d   :  { %v3366_v55 = vadd.f32 %v3365_v33, %v3317_v26  ;;  %v3221_v2 = vadd.f32 %v3220_v28, %v6477_v21  ;;  %3703 = vadd.xlane.f32.xlu1 %v3702_v8 }
 0x47f   :  { %v3434_v53 = vmax.f32 %v3366_v55, 0.0  ;;  %v3270_v10 = vadd.f32 %v3269_v40, %v3221_v2 }
 0x481   :  { %v3580_v42 = vmul.f32 %v6490_v17, %v3434_v53 }
 0x482   :  { %v3318_v31 = vpop.f32.mrf.mxu2  ;;  %v3272_v9 = vpop.f32.mrf.mxu1 }
 0x483   :  { %v3319_v16 = vadd.f32 %v3318_v31, %v3270_v10  ;;  %v3711_v44 = vadd.f32 %v6408_v23, %v3580_v42 }
 0x484   :  { %v3367_v34 = vpop.f32.mrf.mxu3  ;;  %v3223_v56 = vpop.f32.mrf.mxu0 }
 0x485   :  { %v3224_v54 = vadd.f32 %v3223_v56, %v6477_v21  ;;  %v3368_v7 = vadd.f32 %v3367_v34, %v3319_v16  ;;  %3712 = vadd.xlane.f32.xlu2 %v3711_v44 }
 0x487   :  { %v3442_v37 = vmax.f32 %v3368_v7, 0.0  ;;  %v3273_v45 = vadd.f32 %v3272_v9, %v3224_v54 }
 0x489   :  { %v3588_v39 = vmul.f32 %v6490_v17, %v3442_v37 }
 0x48a   :  { %v3321_v36 = vpop.f32.mrf.mxu2  ;;  %v3274_v1 = vpop.f32.mrf.mxu1 }
 0x48b   :  { %v3322_v59 = vadd.f32 %v3321_v36, %v3273_v45  ;;  %v3720_v0 = vadd.f32 %v6417_v63, %v3588_v39 }
 0x48c   :  { %v3370_v47 = vpop.f32.mrf.mxu3  ;;  %v3225_v58 = vpop.f32.mrf.mxu0 }
 0x48d   :  { %v3371_v12 = vadd.f32 %v3370_v47, %v3322_v59  ;;  %v3226_v62 = vadd.f32 %v3225_v58, %v6477_v21  ;;  %3721 = vadd.xlane.f32.xlu2 %v3720_v0 }
 0x48f   :  { %v3450_v23 = vmax.f32 %v3371_v12, 0.0  ;;  %v3275_v11 = vadd.f32 %v3274_v1, %v3226_v62 }
 0x491   :  { %v3596_v20 = vmul.f32 %v6490_v17, %v3450_v23 }
 0x492   :  { %v3323_v13 = vpop.f32.mrf.mxu2  ;;  %v3277_v38 = vpop.f32.mrf.mxu1 }
 0x493   :  { %v3324_v14 = vadd.f32 %v3323_v13, %v3275_v11  ;;  %v3729_v4 = vadd.f32 %v6422_v18, %v3596_v20 }
 0x494   :  { %v3372_v27 = vpop.f32.mrf.mxu3  ;;  %v3228_v57 = vpop.f32.mrf.mxu0 }
 0x495   :  { %v3229_v25 = vadd.f32 %v3228_v57, %v6477_v21  ;;  %v3373_v5 = vadd.f32 %v3372_v27, %v3324_v14  ;;  %3730 = vadd.xlane.f32.xlu0 %v3729_v4 }
 0x497   :  { %v3458_v63 = vmax.f32 %v3373_v5, 0.0  ;;  %v3278_v19 = vadd.f32 %v3277_v38, %v3229_v25 }
 0x499   :  { %v3604_v30 = vmul.f32 %v6490_v17, %v3458_v63 }
 0x49a   :  { %v3326_v49 = vpop.f32.mrf.mxu2  ;;  %v3279_v46 = vpop.f32.mrf.mxu1 }
 0x49b   :  { %v3327_v22 = vadd.f32 %v3326_v49, %v3278_v19  ;;  %v3738_v32 = vadd.f32 %v6431_v52, %v3604_v30 }
 0x49c   :  { %v3375_v3 = vpop.f32.mrf.mxu3  ;;  %v3230_v61 = vpop.f32.mrf.mxu0 }
 0x49d   :  { %v3376_v50 = vadd.f32 %v3375_v3, %v3327_v22  ;;  %v3231_v29 = vadd.f32 %v3230_v61, %v6477_v21  ;;  %3739 = vadd.xlane.f32.xlu1 %v3738_v32 }
 0x49f   :  { %v3466_v18 = vmax.f32 %v3376_v50, 0.0  ;;  %v3280_v26 = vadd.f32 %v3279_v46, %v3231_v29 }
 0x4a1   :  { %v3612_v35 = vmul.f32 %v6490_v17, %v3466_v18 }
 0x4a2   :  { %v3328_v33 = vpop.f32.mrf.mxu2  ;;  %v3282_v53 = vpop.f32.mrf.mxu1 }
 0x4a3   :  { %v3329_v28 = vadd.f32 %v3328_v33, %v3280_v26  ;;  %v3747_v55 = vadd.f32 %v6436_v24, %v3612_v35 }
 0x4a4   :  { %v3377_v8 = vpop.f32.mrf.mxu3  ;;  %v3233_v40 = vpop.f32.mrf.mxu0 }
 0x4a5   :  { %v3234_v2 = vadd.f32 %v3233_v40, %v6477_v21  ;;  %v3378_v10 = vadd.f32 %v3377_v8, %v3329_v28  ;;  %3748 = vadd.xlane.f32.xlu2 %v3747_v55 }
 0x4a7   :  { %v3474_v52 = vmax.f32 %v3378_v10, 0.0  ;;  %v3283_v42 = vadd.f32 %v3282_v53, %v3234_v2 }
 0x4a9   :  { %v3620_v31 = vmul.f32 %v6490_v17, %v3474_v52 }
 0x4aa   :  { %v3331_v16 = vpop.f32.mrf.mxu2  ;;  %v3284_v9 = vpop.f32.mrf.mxu1 }
 0x4ab   :  { %v3332_v34 = vadd.f32 %v3331_v16, %v3283_v42  ;;  %v3756_v54 = vadd.f32 %v6445_v15, %v3620_v31 }
 0x4ac   :  { %v3380_v56 = vpop.f32.mrf.mxu3  ;;  %v3235_v44 = vpop.f32.mrf.mxu0 }
 0x4ad   :  { %v3381_v7 = vadd.f32 %v3380_v56, %v3332_v34  ;;  %v3236_v37 = vadd.f32 %v3235_v44, %v6477_v21  ;;  %3757 = vadd.xlane.f32.xlu0 %v3756_v54 }
 0x4af   :  { %v3482_v24 = vmax.f32 %v3381_v7, 0.0  ;;  %v3285_v39 = vadd.f32 %v3284_v9, %v3236_v37 }
 0x4b1   :  { %v3628_v45 = vmul.f32 %v6490_v17, %v3482_v24  ;;  %v3847_v24 = vlaneseq }
 0x4b2   :  { %v3333_v36 = vpop.f32.mrf.mxu2  ;;  %v3287_v12 = vpop.f32.mrf.mxu1 }
 0x4b3   :  { %v3334_v59 = vadd.f32 %v3333_v36, %v3285_v39  ;;  %v3765_v0 = vadd.f32 %v6450_v48, %v3628_v45 }
 0x4b4   :  { %v3382_v47 = vpop.f32.mrf.mxu3  ;;  %v3238_v58 = vpop.f32.mrf.mxu0 }
 0x4b5   :  { %v3239_v1 = vadd.f32 %v3238_v58, %v6477_v21  ;;  %v3383_v62 = vadd.f32 %v3382_v47, %v3334_v59  ;;  %3766 = vadd.xlane.f32.xlu1 %v3765_v0  ;;  %v6543_v59 = vstv %s6591_s4  ;;  %s5521_s4 = smov [#allocation11]  }
 0x4b6   :  { %s3917_s15 = sshll.u32 %s5521_s4, 4  ;;  %s3918_s15 = int_to_ptr.vmem [resolvable:$true] %s3917_s15 }
 0x4b7   :  { %v3490_v15 = vmax.f32 %v3383_v62, 0.0  ;;  %v3288_v23 = vadd.f32 %v3287_v12, %v3239_v1 }
 0x4b9   :  { %v3636_v20 = vmul.f32 %v6490_v17, %v3490_v15 }
 0x4ba   :  { %v3336_v11 = vpop.f32.mrf.mxu2  ;;  %v3289_v4 = vpop.f32.mrf.mxu1 }
 0x4bb   :  { %v3337_v13 = vadd.f32 %v3336_v11, %v3288_v23  ;;  %v3774_v57 = vadd.f32 %v6459_v43, %v3636_v20 }
 0x4bc   :  { %v3385_v14 = vpop.f32.mrf.mxu3  ;;  %v3240_v27 = vpop.f32.mrf.mxu0 }
 0x4bd   :  { %v3386_v25 = vadd.f32 %v3385_v14, %v3337_v13  ;;  %v3241_v38 = vadd.f32 %v3240_v27, %v6477_v21  ;;  %3775 = vadd.xlane.f32.xlu2 %v3774_v57 }
 0x4bf   :  { %v3498_v48 = vmax.f32 %v3386_v25, 0.0  ;;  %v3290_v63 = vadd.f32 %v3289_v4, %v3241_v38 }
 0x4c1   :  { %v3644_v5 = vmul.f32 %v6490_v17, %v3498_v48 }
 0x4c2   :  { %v3338_v19 = vpop.f32.mrf.mxu2  ;;  %v3292_v43 = vpop.f32.mrf.mxu1 }
 0x4c3   :  { %v3339_v30 = vadd.f32 %v3338_v19, %v3290_v63  ;;  %v3783_v3 = vadd.f32 %v6464_v60, %v3644_v5 }
 0x4c4   :  { %v3387_v49 = vpop.f32.mrf.mxu3  ;;  %v3243_v22 = vpop.f32.mrf.mxu0 }
 0x4c5   :  { %v3244_v61 = vadd.f32 %v3243_v22, %v6477_v21  ;;  %v3388_v32 = vadd.f32 %v3387_v49, %v3339_v30  ;;  %3784 = vadd.xlane.f32.xlu0 %v3783_v3 }
 0x4c7   :  { %v3506_v46 = vmax.f32 %v3388_v32, 0.0  ;;  %v3293_v50 = vadd.f32 %v3292_v43, %v3244_v61 }
 0x4c9   :  { %v3652_v29 = vmul.f32 %v6490_v17, %v3506_v46 }
 0x4ca   :  { %v3341_v18 = vpop.f32.mrf.mxu2  ;;  %v3294_v55 = vpop.f32.mrf.mxu1 }
 0x4cb   :  { %v3342_v35 = vadd.f32 %v3341_v18, %v3293_v50  ;;  %v3792_v28 = vadd.f32 %v6473_v6, %v3652_v29 }
 0x4cc   :  { %v3390_v26 = vpop.f32.mrf.mxu3  ;;  %v3245_v33 = vpop.f32.mrf.mxu0 }
 0x4cd   :  { %v3391_v8 = vadd.f32 %v3390_v26, %v3342_v35  ;;  %v3246_v40 = vadd.f32 %v3245_v33, %v6477_v21  ;;  %3793 = vadd.xlane.f32.xlu1 %v3792_v28 }
 0x4cf   :  { %v3514_v60 = vmax.f32 %v3391_v8, 0.0  ;;  %v3295_v53 = vadd.f32 %v3294_v55, %v3246_v40 }
 0x4d1   :  { %v3660_v2 = vmul.f32 %v6490_v17, %v3514_v60 }
 0x4d2   :  { %v3343_v10 = vpop.f32.mrf.mxu2 }
 0x4d3   :  { %v3344_v52 = vadd.f32 %v3343_v10, %v3295_v53  ;;  %v3801_v42 = vadd.f32 %v6481_v51, %v3660_v2  ;;  %v6538_v51 = vand.u32 127, %v3847_v24 }
 0x4d4   :  { %v3392_v31 = vpop.f32.mrf.mxu3 }
 0x4d5   :  { %v3393_v16 = vadd.f32 %v3392_v31, %v3344_v52  ;;  %3802 = vadd.xlane.f32.xlu2 %v3801_v42  ;;  %v3854_v58 = vadd.s32 4294967280, %v6538_v51  ;;  %v3858_v1 = vadd.s32 4294967272, %v6538_v51  ;;  %v3862_v20 = vadd.s32 4294967264, %v6538_v51 }
 0x4d6   :  { %v3866_v4 = vadd.s32 4294967256, %v6538_v51  ;;  %v3870_v48 = vadd.s32 4294967248, %v6538_v51  ;;  %v3874_v19 = vadd.s32 4294967240, %v6538_v51  ;;  %v3878_v22 = vadd.s32 4294967232, %v6538_v51 }
 0x4d7   :  { %v3522_v34 = vmax.f32 %v3393_v16, 0.0  ;;  %v3882_v43 = vadd.s32 4294967224, %v6538_v51  ;;  %v3886_v18 = vadd.s32 4294967216, %v6538_v51  ;;  %v3890_v8 = vadd.s32 4294967208, %v6538_v51 }
 0x4d8   :  { %v3677_v21 = vpop.xlane.xlu0 %3676  ;;  %v3894_v2 = vadd.s32 4294967200, %v6538_v51  ;;  %v3898_v42 = vadd.s32 4294967192, %v6538_v51  ;;  %v3906_v24 = vadd.s32 4294967176, %v6538_v51 }
 0x4d9   :  { %v3668_v56 = vmul.f32 %v6490_v17, %v3522_v34  ;;  %v3815_v47 = vadd.f32 %v6543_v59, %v3677_v21 }
 0x4db   :  { %v3810_v6 = vadd.f32 %v6486_v41, %v3668_v56  ;;  %v3850_v41 = vadd.s32 4294967288, %v6538_v51  ;;  %v3849_v14 = vperm.slane %v3815_v47, %v6538_v51  ;;  %v3902_v56 = vadd.s32 4294967184, %v6538_v51 }
 0x4dd   :  { %3811 = vadd.xlane.f32.xlu0 %v3810_v6 }
 0x4e0   :  { %v3686_v9 = vpop.xlane.xlu0 %3685 }
 0x4e1   :  { %v3816_v17 = vadd.f32 %v6543_v59, %v3686_v9 }
 0x4e3   :  { %v3851_v15 = vperm.slane %v3816_v17, %v3850_v41 }
 0x4e5   :  { %v3853_v38 = vsel %vm3852_vm0, %v3851_v15, %v3849_v14 }
 0x4e8   :  { %v3695_v44 = vpop.xlane.xlu1 %3694 }
 0x4e9   :  { %v3817_v0 = vadd.f32 %v6543_v59, %v3695_v44 }
 0x4eb   :  { %v3855_v27 = vperm.slane %v3817_v0, %v3854_v58 }
 0x4ed   :  { %v3857_v49 = vsel %vm3856_vm1, %v3855_v27, %v3853_v38 }
 0x4f0   :  { %v3704_v7 = vpop.xlane.xlu1 %3703 }
 0x4f1   :  { %v3818_v12 = vadd.f32 %v6543_v59, %v3704_v7 }
 0x4f3   :  { %v3859_v57 = vperm.slane %v3818_v12, %v3858_v1 }
 0x4f5   :  { %v3861_v61 = vsel %vm3860_vm2, %v3859_v57, %v3857_v49 }
 0x4f8   :  { %v3713_v54 = vpop.xlane.xlu2 %3712 }
 0x4f9   :  { %v3819_v11 = vadd.f32 %v6543_v59, %v3713_v54 }
 0x4fb   :  { %v3863_v63 = vperm.slane %v3819_v11, %v3862_v20 }
 0x4fd   :  { %v3865_v33 = vsel %vm3864_vm3, %v3863_v63, %v3861_v61 }
 0x500   :  { %v3722_v37 = vpop.xlane.xlu2 %3721 }
 0x501   :  { %v3820_v25 = vadd.f32 %v6543_v59, %v3722_v37 }
 0x503   :  { %v3867_v32 = vperm.slane %v3820_v25, %v3866_v4 }
 0x505   :  { %v3869_v10 = vsel %vm3868_vm4, %v3867_v32, %v3865_v33 }
 0x508   :  { %v3731_v45 = vpop.xlane.xlu0 %3730 }
 0x509   :  { %v3821_v5 = vadd.f32 %v6543_v59, %v3731_v45 }
 0x50b   :  { %v3871_v29 = vperm.slane %v3821_v5, %v3870_v48 }
 0x50d   :  { %v3873_v16 = vsel %vm3872_vm5, %v3871_v29, %v3869_v10 }
 0x510   :  { %v3740_v39 = vpop.xlane.xlu1 %3739 }
 0x511   :  { %v3822_v30 = vadd.f32 %v6543_v59, %v3740_v39 }
 0x513   :  { %v3875_v28 = vperm.slane %v3822_v30, %v3874_v19 }
 0x515   :  { %v3877_v21 = vsel %vm3876_vm6, %v3875_v28, %v3873_v16 }
 0x518   :  { %v3749_v36 = vpop.xlane.xlu2 %3748 }
 0x519   :  { %v3823_v3 = vadd.f32 %v6543_v59, %v3749_v36 }
 0x51b   :  { %v3879_v55 = vperm.slane %v3823_v3, %v3878_v22 }
 0x51d   :  { %v3881_v54 = vsel %vm3880_vm7, %v3879_v55, %v3877_v21 }
 0x520   :  { %v3758_v62 = vpop.xlane.xlu0 %3757 }
 0x521   :  { %v3824_v46 = vadd.f32 %v6543_v59, %v3758_v62 }
 0x523   :  { %v3883_v52 = vperm.slane %v3824_v46, %v3882_v43 }
 0x525   :  { %v3885_v7 = vsel %vm3884_vm8, %v3883_v52, %v3881_v54 }
 0x528   :  { %v3767_v23 = vpop.xlane.xlu1 %3766 }
 0x529   :  { %v3825_v35 = vadd.f32 %v6543_v59, %v3767_v23 }
 0x52b   :  { %v3887_v34 = vperm.slane %v3825_v35, %v3886_v18 }
 0x52d   :  { %v3889_v45 = vsel %vm3888_vm9, %v3887_v34, %v3885_v7 }
 0x530   :  { %v3776_v13 = vpop.xlane.xlu2 %3775 }
 0x531   :  { %v3826_v40 = vadd.f32 %v6543_v59, %v3776_v13 }
 0x533   :  { %v3891_v44 = vperm.slane %v3826_v40, %v3890_v8 }
 0x535   :  { %v3893_v41 = vsel %vm3892_vm10, %v3891_v44, %v3889_v45 }
 0x538   :  { %v3785_v50 = vpop.xlane.xlu0 %3784 }
 0x539   :  { %v3827_v53 = vadd.f32 %v6543_v59, %v3785_v50 }
 0x53b   :  { %v3895_v9 = vperm.slane %v3827_v53, %v3894_v2 }
 0x53d   :  { %v3897_v47 = vsel %vm3896_vm11, %v3895_v9, %v3893_v41 }
 0x540   :  { %v3794_v26 = vpop.xlane.xlu1 %3793 }
 0x541   :  { %v3828_v31 = vadd.f32 %v6543_v59, %v3794_v26 }
 0x543   :  { %v3899_v37 = vperm.slane %v3828_v31, %v3898_v42 }
 0x545   :  { %v3901_v58 = vsel %vm3900_vm12, %v3899_v37, %v3897_v47 }
 0x548   :  { %v3803_v60 = vpop.xlane.xlu2 %3802 }
 0x549   :  { %v3829_v6 = vadd.f32 %v6543_v59, %v3803_v60 }
 0x54b   :  { %v3903_v39 = vperm.slane %v3829_v6, %v3902_v56 }
 0x54d   :  { %v3905_v1 = vsel %vm3904_vm13, %v3903_v39, %v3901_v58 }
 0x550   :  { %v3812_v36 = vpop.xlane.xlu0 %3811 }
 0x551   :  { %v3830_v17 = vadd.f32 %v6543_v59, %v3812_v36 }
 0x553   :  { %v3907_v0 = vperm.slane %v3830_v17, %v3906_v24 }
 0x555   :  { %v3909_v51 = vsel %vm3908_vm14, %v3907_v0, %v3905_v1 }
 0x556   :  { %3911 = vst [vmem:[#allocation11] sm:$0x1] %v3909_v51 }
 0x557   :  { %3922 = dma.vmem_to_hbm [thread:$0]  %s3918_s15, 16, %s3920_s18, [#allocation5]  }
 0x558   :  { %5511 = dma.done.wait [#allocation5], 16  }
 0x559   :  { %5512 = vsyncadd [#allocation5], 4294967280 }
 0x55a   :  { %3927 = vsyncpa [#allocation4], 1 }
 0x55b   :  { %3928 = vsyncpa [#allocation7], 1 }
 0x55c   :  { %3929 = vsyncpa [#allocation10], 1 }
 0x55d   :  { %3930 = vsyncpa [#allocation5], 1 }

</bundles_post_ra>
